<compile_context>
chip_gen: v7x
topology: tpu7x:2x2x1
jax: 0.10.0
libtpu: 0.0.40
codegen_flags: <defaults>
</compile_context>

<pallas_src>
import functools
import math

import numpy as np
import jax
import jax.numpy as jnp
from jax.experimental import pallas as pl
from jax.experimental.pallas import tpu as pltpu


def _round_up(x, m):
    return ((x + m - 1) // m) * m


def _fused_shared_conv_kernel(x_ref, w1_ref, b1_ref, w2_ref, b2_ref, w3_ref, b3_ref,
                              o_ref, xpad_ref, y1_ref, y2_ref,
                              *, H, W, H2, W2, H3, W3, C1P, C2P, C3P, row_chunk):
    """One grid step = one batch image.

    x_ref  : (1, H, W)            raw input image (single channel)
    w1_ref : (9, C1P)             conv1 taps (kh*3+kw, cout), cout zero-padded to 128
    b1_ref : (1, C1P)
    w2_ref : (9, C1P, C2P)        conv2 taps, cin/cout zero-padded to 128
    b2_ref : (1, C2P)
    w3_ref : (9, C2P, C3P)        conv3 taps
    b3_ref : (1, C3P)
    o_ref  : (1, H3*W3, C3P)      lane-dense output block
    xpad_ref : VMEM (H+2, W+2)          zero-padded input
    y1_ref   : VMEM (H+2, W+2, C1P)     zero-padded conv1+relu output
    y2_ref   : VMEM (H2+2, W2+2, C2P)   zero-padded conv2+relu output
    """
    f32 = jnp.float32

    # Padded slabs: borders must be zero; interiors are fully overwritten below.
    xpad_ref[...] = jnp.zeros_like(xpad_ref)
    y1_ref[...] = jnp.zeros_like(y1_ref)
    y2_ref[...] = jnp.zeros_like(y2_ref)
    xpad_ref[1:H + 1, 1:W + 1] = x_ref[0]

    # ---------------- Layer 1: 3x3, stride 1, Cin=1 -> im2col matmul, K=9 ----------------
    w1 = w1_ref[...]                       # (9, C1P)
    b1 = b1_ref[...]                       # (1, C1P)
    for h0 in range(0, H, row_chunk):
        # 9 shifted slabs of the padded input covering output rows [h0, h0+row_chunk).
        slabs = [xpad_ref[h0 + kh:h0 + kh + row_chunk, kw:kw + W]
                 for kh in range(3) for kw in range(3)]            # 9 x (row_chunk, W)
        patches = jnp.stack(slabs, axis=-1).reshape(row_chunk * W, 9)
        y = jnp.dot(patches, w1, preferred_element_type=f32)       # MXU: (M,9)@(9,C1P)
        y = jnp.maximum(y + b1, 0.0)
        y1_ref[1 + h0:1 + h0 + row_chunk, 1:W + 1, :] = y.reshape(row_chunk, W, C1P)

    # ---------------- Layer 2: 3x3, stride 2 -> 9 accumulated dots, K=C1P ----------------
    acc2 = jnp.zeros((H2 * W2, C2P), f32)
    for t in range(9):
        kh, kw = divmod(t, 3)
        # out2[i,j] needs y1pad[2i+kh, 2j+kw, :]  ->  strided load (channels stay lane-dense).
        patch = y1_ref[pl.ds(kh, H2, stride=2), pl.ds(kw, W2, stride=2), :]   # (H2,W2,C1P)
        acc2 = acc2 + jnp.dot(patch.reshape(H2 * W2, C1P), w2_ref[t],
                              preferred_element_type=f32)
    y2 = jnp.maximum(acc2 + b2_ref[...], 0.0)                      # (H2*W2, C2P)
    y2_ref[1:H2 + 1, 1:W2 + 1, :] = y2.reshape(H2, W2, C2P)

    # ---------------- Layer 3: 3x3, stride 2 -> 9 accumulated dots, K=C2P ----------------
    acc3 = jnp.zeros((H3 * W3, C3P), f32)
    for t in range(9):
        kh, kw = divmod(t, 3)
        patch = y2_ref[pl.ds(kh, H3, stride=2), pl.ds(kw, W3, stride=2), :]   # (H3,W3,C2P)
        acc3 = acc3 + jnp.dot(patch.reshape(H3 * W3, C2P), w3_ref[t],
                              preferred_element_type=f32)
    y3 = jnp.maximum(acc3 + b3_ref[...], 0.0)                      # (H3*W3, C3P) lane-dense
    o_ref[0] = y3.astype(o_ref.dtype)


def shared_conv_forward(params, x_nchw):
    """Pallas implementation of SharedConvolutionalLayers.forward (returns a list, like the module)."""
    (w1, b1), (w2, b2), (w3, b3) = params        # HWIO weights
    N, cin, H, W = x_nchw.shape
    assert cin == 1, "module's conv1 has in_channels=1"
    C1, C2, C3 = w1.shape[-1], w2.shape[-1], w3.shape[-1]
    C1P, C2P, C3P = _round_up(C1, 128), _round_up(C2, 128), _round_up(C3, 128)

    # Conv output sizes (kernel=3, pad=1): stride 1, then stride 2, then stride 2.
    H2, W2 = (H - 1) // 2 + 1, (W - 1) // 2 + 1
    H3, W3 = (H2 - 1) // 2 + 1, (W2 - 1) // 2 + 1
    row_chunk = math.gcd(H, 8)                   # layer-1 M-chunking (8 rows per matmul)

    # ---- weight prep (tiny, lane-dense): flatten taps, zero-pad channel dims to 128 ----
    w1p = jnp.zeros((9, C1P), jnp.float32).at[:, :C1].set(w1.reshape(9, C1))
    b1p = jnp.zeros((1, C1P), jnp.float32).at[:, :C1].set(b1.reshape(1, C1))
    w2p = jnp.zeros((9, C1P, C2P), jnp.float32).at[:, :C1, :C2].set(w2.reshape(9, C1, C2))
    b2p = jnp.zeros((1, C2P), jnp.float32).at[:, :C2].set(b2.reshape(1, C2))
    w3p = jnp.zeros((9, C2P, C3P), jnp.float32).at[:, :C2, :C3].set(w3.reshape(9, C2, C3))
    b3p = jnp.zeros((1, C3P), jnp.float32).at[:, :C3].set(b3.reshape(1, C3))

    x2d = x_nchw[:, 0, :, :]                     # (N, H, W) -- single input channel

    kernel = functools.partial(_fused_shared_conv_kernel,
                               H=H, W=W, H2=H2, W2=W2, H3=H3, W3=W3,
                               C1P=C1P, C2P=C2P, C3P=C3P, row_chunk=row_chunk)

    out_p = pl.pallas_call(
        kernel,
        out_shape=jax.ShapeDtypeStruct((N, H3 * W3, C3P), jnp.float32),
        grid_spec=pltpu.PrefetchScalarGridSpec(
            num_scalar_prefetch=0,
            grid=(N,),
            in_specs=[
                pl.BlockSpec((1, H, W), lambda n: (n, 0, 0)),
                pl.BlockSpec((9, C1P), lambda n: (0, 0)),
                pl.BlockSpec((1, C1P), lambda n: (0, 0)),
                pl.BlockSpec((9, C1P, C2P), lambda n: (0, 0, 0)),
                pl.BlockSpec((1, C2P), lambda n: (0, 0)),
                pl.BlockSpec((9, C2P, C3P), lambda n: (0, 0, 0)),
                pl.BlockSpec((1, C3P), lambda n: (0, 0)),
            ],
            out_specs=pl.BlockSpec((1, H3 * W3, C3P), lambda n: (n, 0, 0)),
            scratch_shapes=[
                pltpu.VMEM((H + 2, W + 2), jnp.float32),          # padded input
                pltpu.VMEM((H + 2, W + 2, C1P), jnp.float32),     # padded conv1 output
                pltpu.VMEM((H2 + 2, W2 + 2, C2P), jnp.float32),   # padded conv2 output
            ],
        ),
        compiler_params=pltpu.CompilerParams(dimension_semantics=("parallel",)),
    )(x2d, w1p, b1p, w2p, b2p, w3p, b3p)

    out = out_p[:, :, :C3].reshape(N, H3, W3, C3)      # drop channel padding (exact zeros)
    return [jnp.transpose(out, (0, 3, 1, 2))]          # NHWC -> NCHW


def init_params(key, out_channels):
    """Deterministic init matching torch.nn.Conv2d default bounds (U(-1/sqrt(fan_in), ...)), HWIO."""
    specs = [(1, 48), (48, 128), (128, out_channels)]
    params = []
    for i, (cin, cout) in enumerate(specs):
        kw_, kb_ = jax.random.split(jax.random.fold_in(key, i))
        fan_in = cin * 3 * 3
        bound = 1.0 / (fan_in ** 0.5)
        w = jax.random.uniform(kw_, (3, 3, cin, cout), jnp.float32, -bound, bound)
        b = jax.random.uniform(kb_, (cout,), jnp.float32, -bound, bound)
        params.append((w, b))
    return params


def reference_forward(params, x_nchw):
    """Pure-JAX reference (same math as the PyTorch module)."""
    x = x_nchw
    for (w, b), stride in zip(params, (1, 2, 2)):
        w_oihw = jnp.transpose(w, (3, 2, 0, 1))
        x = jax.lax.conv_general_dilated(
            x, w_oihw, (stride, stride), ((1, 1), (1, 1)),
            dimension_numbers=("NCHW", "OIHW", "NCHW"))
        x = jax.nn.relu(x + b.reshape(1, -1, 1, 1))
    return [x]


if __name__ == "__main__":
    key = jax.random.PRNGKey(0)
    k_x, k_p = jax.random.split(key)

    out_channels = 64
    # Module's conv1 has in_channels=1, so input is (N, 1, H, W).
    x = jax.random.normal(k_x, (2, 1, 16, 16), dtype=jnp.float32)
    params = init_params(k_p, out_channels)

    out_list = jax.jit(shared_conv_forward)(params, x)
    out = jax.block_until_ready(out_list[0])
    assert out.shape == (2, out_channels, 4, 4), out.shape

    ref = reference_forward(params, x)[0]
    np.testing.assert_allclose(np.asarray(out), np.asarray(ref), rtol=2e-4, atol=2e-4)

    print("KERNEL_OK")
</pallas_src>

<mosaic_0001>
module attributes {stable_mosaic.version = 11 : i64} {
  func.func @_fused_shared_conv_kernel(%arg0: i32, %arg1: memref<1x16x16xf32, #tpu.memory_space<vmem>>, %arg2: memref<9x128xf32, #tpu.memory_space<vmem>>, %arg3: memref<1x128xf32, #tpu.memory_space<vmem>>, %arg4: memref<9x128x128xf32, #tpu.memory_space<vmem>>, %arg5: memref<1x128xf32, #tpu.memory_space<vmem>>, %arg6: memref<9x128x128xf32, #tpu.memory_space<vmem>>, %arg7: memref<1x128xf32, #tpu.memory_space<vmem>>, %arg8: memref<1x16x128xf32, #tpu.memory_space<vmem>>, %arg9: memref<18x18xf32, #tpu.memory_space<vmem>>, %arg10: memref<18x18x128xf32, #tpu.memory_space<vmem>>, %arg11: memref<10x10x128xf32, #tpu.memory_space<vmem>>) attributes {dimension_semantics = [#tpu.dimension_semantics<parallel>], iteration_bounds = array<i64: 2>, scalar_prefetch = 0 : i64, scratch_operands = 3 : i64, tpu.core_type = #tpu.core_type<tc>, window_params = [{transform_indices = @transform_0, window_bounds = array<i64: 1, 16, 16>}, {pipeline_mode = #tpu.pipeline_mode<synchronous>, transform_indices = @transform_1, window_bounds = array<i64: 9, 128>}, {pipeline_mode = #tpu.pipeline_mode<synchronous>, transform_indices = @transform_2, window_bounds = array<i64: 1, 128>}, {pipeline_mode = #tpu.pipeline_mode<synchronous>, transform_indices = @transform_3, window_bounds = array<i64: 9, 128, 128>}, {pipeline_mode = #tpu.pipeline_mode<synchronous>, transform_indices = @transform_4, window_bounds = array<i64: 1, 128>}, {pipeline_mode = #tpu.pipeline_mode<synchronous>, transform_indices = @transform_5, window_bounds = array<i64: 9, 128, 128>}, {pipeline_mode = #tpu.pipeline_mode<synchronous>, transform_indices = @transform_6, window_bounds = array<i64: 1, 128>}, {transform_indices = @transform_7, window_bounds = array<i64: 1, 16, 128>}]} {
    %cst = arith.constant 0.000000e+00 : f32
    %0 = vector.broadcast %cst : f32 to vector<18x18xf32>
    %c0 = arith.constant 0 : index
    %c0_0 = arith.constant 0 : index
    %1 = vector.load %arg9[%c0, %c0_0] : memref<18x18xf32, #tpu.memory_space<vmem>>, vector<18x18xf32>
    tpu.vector_store %arg9[%c0, %c0_0], %0 {strides = array<i32>} : memref<18x18xf32, #tpu.memory_space<vmem>>, vector<18x18xf32>,
    %cst_1 = arith.constant 0.000000e+00 : f32
    %2 = vector.broadcast %cst_1 : f32 to vector<18x18x128xf32>
    %c0_2 = arith.constant 0 : index
    %c0_3 = arith.constant 0 : index
    %c0_4 = arith.constant 0 : index
    %3 = vector.load %arg10[%c0_2, %c0_3, %c0_4] : memref<18x18x128xf32, #tpu.memory_space<vmem>>, vector<18x18x128xf32>
    tpu.vector_store %arg10[%c0_2, %c0_3, %c0_4], %2 {strides = array<i32>} : memref<18x18x128xf32, #tpu.memory_space<vmem>>, vector<18x18x128xf32>,
    %cst_5 = arith.constant 0.000000e+00 : f32
    %4 = vector.broadcast %cst_5 : f32 to vector<10x10x128xf32>
    %c0_6 = arith.constant 0 : index
    %c0_7 = arith.constant 0 : index
    %c0_8 = arith.constant 0 : index
    %5 = vector.load %arg11[%c0_6, %c0_7, %c0_8] : memref<10x10x128xf32, #tpu.memory_space<vmem>>, vector<10x10x128xf32>
    tpu.vector_store %arg11[%c0_6, %c0_7, %c0_8], %4 {strides = array<i32>} : memref<10x10x128xf32, #tpu.memory_space<vmem>>, vector<10x10x128xf32>,
    %c0_9 = arith.constant 0 : index
    %c0_10 = arith.constant 0 : index
    %c0_11 = arith.constant 0 : index
    %6 = vector.load %arg1[%c0_9, %c0_10, %c0_11] : memref<1x16x16xf32, #tpu.memory_space<vmem>>, vector<1x16x16xf32>
    %7 = vector.shape_cast %6 : vector<1x16x16xf32> to vector<16x16xf32>
    %c1 = arith.constant 1 : index
    %c1_12 = arith.constant 1 : index
    %8 = vector.load %arg9[%c1, %c1_12] : memref<18x18xf32, #tpu.memory_space<vmem>>, vector<16x16xf32>
    tpu.vector_store %arg9[%c1, %c1_12], %7 {strides = array<i32>} : memref<18x18xf32, #tpu.memory_space<vmem>>, vector<16x16xf32>,
    %c0_13 = arith.constant 0 : index
    %c0_14 = arith.constant 0 : index
    %9 = vector.load %arg2[%c0_13, %c0_14] : memref<9x128xf32, #tpu.memory_space<vmem>>, vector<9x128xf32>
    %c0_15 = arith.constant 0 : index
    %c0_16 = arith.constant 0 : index
    %10 = vector.load %arg3[%c0_15, %c0_16] : memref<1x128xf32, #tpu.memory_space<vmem>>, vector<1x128xf32>
    %c0_17 = arith.constant 0 : index
    %c0_18 = arith.constant 0 : index
    %11 = vector.load %arg9[%c0_17, %c0_18] : memref<18x18xf32, #tpu.memory_space<vmem>>, vector<8x16xf32>
    %c0_19 = arith.constant 0 : index
    %c1_20 = arith.constant 1 : index
    %12 = vector.load %arg9[%c0_19, %c1_20] : memref<18x18xf32, #tpu.memory_space<vmem>>, vector<8x16xf32>
    %c0_21 = arith.constant 0 : index
    %c2 = arith.constant 2 : index
    %13 = vector.load %arg9[%c0_21, %c2] : memref<18x18xf32, #tpu.memory_space<vmem>>, vector<8x16xf32>
    %c1_22 = arith.constant 1 : index
    %c0_23 = arith.constant 0 : index
    %14 = vector.load %arg9[%c1_22, %c0_23] : memref<18x18xf32, #tpu.memory_space<vmem>>, vector<8x16xf32>
    %c1_24 = arith.constant 1 : index
    %c1_25 = arith.constant 1 : index
    %15 = vector.load %arg9[%c1_24, %c1_25] : memref<18x18xf32, #tpu.memory_space<vmem>>, vector<8x16xf32>
    %c1_26 = arith.constant 1 : index
    %c2_27 = arith.constant 2 : index
    %16 = vector.load %arg9[%c1_26, %c2_27] : memref<18x18xf32, #tpu.memory_space<vmem>>, vector<8x16xf32>
    %c2_28 = arith.constant 2 : index
    %c0_29 = arith.constant 0 : index
    %17 = vector.load %arg9[%c2_28, %c0_29] : memref<18x18xf32, #tpu.memory_space<vmem>>, vector<8x16xf32>
    %c2_30 = arith.constant 2 : index
    %c1_31 = arith.constant 1 : index
    %18 = vector.load %arg9[%c2_30, %c1_31] : memref<18x18xf32, #tpu.memory_space<vmem>>, vector<8x16xf32>
    %c2_32 = arith.constant 2 : index
    %c2_33 = arith.constant 2 : index
    %19 = vector.load %arg9[%c2_32, %c2_33] : memref<18x18xf32, #tpu.memory_space<vmem>>, vector<8x16xf32>
    %20 = vector.shape_cast %11 : vector<8x16xf32> to vector<8x16x1xf32>
    %21 = vector.shape_cast %12 : vector<8x16xf32> to vector<8x16x1xf32>
    %22 = vector.shape_cast %13 : vector<8x16xf32> to vector<8x16x1xf32>
    %23 = vector.shape_cast %14 : vector<8x16xf32> to vector<8x16x1xf32>
    %24 = vector.shape_cast %15 : vector<8x16xf32> to vector<8x16x1xf32>
    %25 = vector.shape_cast %16 : vector<8x16xf32> to vector<8x16x1xf32>
    %26 = vector.shape_cast %17 : vector<8x16xf32> to vector<8x16x1xf32>
    %27 = vector.shape_cast %18 : vector<8x16xf32> to vector<8x16x1xf32>
    %28 = vector.shape_cast %19 : vector<8x16xf32> to vector<8x16x1xf32>
    %29 = tpu.concatenate %20, %21, %22, %23, %24, %25, %26, %27, %28 in 2 : vector<8x16x1xf32>, vector<8x16x1xf32>, vector<8x16x1xf32>, vector<8x16x1xf32>, vector<8x16x1xf32>, vector<8x16x1xf32>, vector<8x16x1xf32>, vector<8x16x1xf32>, vector<8x16x1xf32> -> vector<8x16x9xf32>
    %30 = vector.shape_cast %29 : vector<8x16x9xf32> to vector<128x9xf32>
    %cst_34 = arith.constant dense<0.000000e+00> : vector<128x128xf32>
    %31 = tpu.matmul %30, %9, %cst_34 {dimension_numbers = #tpu.dot_dimension_numbers<[1], [0], [0], [1], [0, 0, 1, 1], [], []>} : vector<128x9xf32>, vector<9x128xf32>, vector<128x128xf32> -> vector<128x128xf32>
    %32 = vector.broadcast %10 : vector<1x128xf32> to vector<128x128xf32>
    %33 = arith.addf %31, %32 : vector<128x128xf32>
    %cst_35 = arith.constant 0.000000e+00 : f32
    %34 = vector.broadcast %cst_35 : f32 to vector<128x128xf32>
    %35 = arith.maximumf %33, %34 : vector<128x128xf32>
    %36 = vector.shape_cast %35 : vector<128x128xf32> to vector<8x16x128xf32>
    %c1_36 = arith.constant 1 : index
    %c1_37 = arith.constant 1 : index
    %c0_38 = arith.constant 0 : index
    %37 = vector.load %arg10[%c1_36, %c1_37, %c0_38] : memref<18x18x128xf32, #tpu.memory_space<vmem>>, vector<8x16x128xf32>
    tpu.vector_store %arg10[%c1_36, %c1_37, %c0_38], %36 {strides = array<i32>} : memref<18x18x128xf32, #tpu.memory_space<vmem>>, vector<8x16x128xf32>,
    %c8 = arith.constant 8 : index
    %c0_39 = arith.constant 0 : index
    %38 = vector.load %arg9[%c8, %c0_39] : memref<18x18xf32, #tpu.memory_space<vmem>>, vector<8x16xf32>
    %c8_40 = arith.constant 8 : index
    %c1_41 = arith.constant 1 : index
    %39 = vector.load %arg9[%c8_40, %c1_41] : memref<18x18xf32, #tpu.memory_space<vmem>>, vector<8x16xf32>
    %c8_42 = arith.constant 8 : index
    %c2_43 = arith.constant 2 : index
    %40 = vector.load %arg9[%c8_42, %c2_43] : memref<18x18xf32, #tpu.memory_space<vmem>>, vector<8x16xf32>
    %c9 = arith.constant 9 : index
    %c0_44 = arith.constant 0 : index
    %41 = vector.load %arg9[%c9, %c0_44] : memref<18x18xf32, #tpu.memory_space<vmem>>, vector<8x16xf32>
    %c9_45 = arith.constant 9 : index
    %c1_46 = arith.constant 1 : index
    %42 = vector.load %arg9[%c9_45, %c1_46] : memref<18x18xf32, #tpu.memory_space<vmem>>, vector<8x16xf32>
    %c9_47 = arith.constant 9 : index
    %c2_48 = arith.constant 2 : index
    %43 = vector.load %arg9[%c9_47, %c2_48] : memref<18x18xf32, #tpu.memory_space<vmem>>, vector<8x16xf32>
    %c10 = arith.constant 10 : index
    %c0_49 = arith.constant 0 : index
    %44 = vector.load %arg9[%c10, %c0_49] : memref<18x18xf32, #tpu.memory_space<vmem>>, vector<8x16xf32>
    %c10_50 = arith.constant 10 : index
    %c1_51 = arith.constant 1 : index
    %45 = vector.load %arg9[%c10_50, %c1_51] : memref<18x18xf32, #tpu.memory_space<vmem>>, vector<8x16xf32>
    %c10_52 = arith.constant 10 : index
    %c2_53 = arith.constant 2 : index
    %46 = vector.load %arg9[%c10_52, %c2_53] : memref<18x18xf32, #tpu.memory_space<vmem>>, vector<8x16xf32>
    %47 = vector.shape_cast %38 : vector<8x16xf32> to vector<8x16x1xf32>
    %48 = vector.shape_cast %39 : vector<8x16xf32> to vector<8x16x1xf32>
    %49 = vector.shape_cast %40 : vector<8x16xf32> to vector<8x16x1xf32>
    %50 = vector.shape_cast %41 : vector<8x16xf32> to vector<8x16x1xf32>
    %51 = vector.shape_cast %42 : vector<8x16xf32> to vector<8x16x1xf32>
    %52 = vector.shape_cast %43 : vector<8x16xf32> to vector<8x16x1xf32>
    %53 = vector.shape_cast %44 : vector<8x16xf32> to vector<8x16x1xf32>
    %54 = vector.shape_cast %45 : vector<8x16xf32> to vector<8x16x1xf32>
    %55 = vector.shape_cast %46 : vector<8x16xf32> to vector<8x16x1xf32>
    %56 = tpu.concatenate %47, %48, %49, %50, %51, %52, %53, %54, %55 in 2 : vector<8x16x1xf32>, vector<8x16x1xf32>, vector<8x16x1xf32>, vector<8x16x1xf32>, vector<8x16x1xf32>, vector<8x16x1xf32>, vector<8x16x1xf32>, vector<8x16x1xf32>, vector<8x16x1xf32> -> vector<8x16x9xf32>
    %57 = vector.shape_cast %56 : vector<8x16x9xf32> to vector<128x9xf32>
    %cst_54 = arith.constant dense<0.000000e+00> : vector<128x128xf32>
    %58 = tpu.matmul %57, %9, %cst_54 {dimension_numbers = #tpu.dot_dimension_numbers<[1], [0], [0], [1], [0, 0, 1, 1], [], []>} : vector<128x9xf32>, vector<9x128xf32>, vector<128x128xf32> -> vector<128x128xf32>
    %59 = vector.broadcast %10 : vector<1x128xf32> to vector<128x128xf32>
    %60 = arith.addf %58, %59 : vector<128x128xf32>
    %cst_55 = arith.constant 0.000000e+00 : f32
    %61 = vector.broadcast %cst_55 : f32 to vector<128x128xf32>
    %62 = arith.maximumf %60, %61 : vector<128x128xf32>
    %63 = vector.shape_cast %62 : vector<128x128xf32> to vector<8x16x128xf32>
    %c9_56 = arith.constant 9 : index
    %c1_57 = arith.constant 1 : index
    %c0_58 = arith.constant 0 : index
    %64 = vector.load %arg10[%c9_56, %c1_57, %c0_58] : memref<18x18x128xf32, #tpu.memory_space<vmem>>, vector<8x16x128xf32>
    tpu.vector_store %arg10[%c9_56, %c1_57, %c0_58], %63 {strides = array<i32>} : memref<18x18x128xf32, #tpu.memory_space<vmem>>, vector<8x16x128xf32>,
    %cst_59 = arith.constant 0.000000e+00 : f32
    %65 = vector.broadcast %cst_59 : f32 to vector<64x128xf32>
    %c0_60 = arith.constant 0 : index
    %c0_61 = arith.constant 0 : index
    %c0_62 = arith.constant 0 : index
    %66 = tpu.strided_load %arg10[%c0_60, %c0_61, %c0_62] {strides = array<i32: 2, 2, 1>} : memref<18x18x128xf32, #tpu.memory_space<vmem>>, vector<8x8x128xf32>
    %67 = vector.shape_cast %66 : vector<8x8x128xf32> to vector<64x128xf32>
    %c0_63 = arith.constant 0 : index
    %c0_64 = arith.constant 0 : index
    %c0_65 = arith.constant 0 : index
    %68 = vector.load %arg4[%c0_63, %c0_64, %c0_65] : memref<9x128x128xf32, #tpu.memory_space<vmem>>, vector<1x128x128xf32>
    %69 = vector.shape_cast %68 : vector<1x128x128xf32> to vector<128x128xf32>
    %cst_66 = arith.constant dense<0.000000e+00> : vector<64x128xf32>
    %70 = tpu.matmul %67, %69, %cst_66 {dimension_numbers = #tpu.dot_dimension_numbers<[1], [0], [0], [1], [0, 0, 1, 1], [], []>} : vector<64x128xf32>, vector<128x128xf32>, vector<64x128xf32> -> vector<64x128xf32>
    %71 = arith.addf %65, %70 : vector<64x128xf32>
    %c0_67 = arith.constant 0 : index
    %c1_68 = arith.constant 1 : index
    %c0_69 = arith.constant 0 : index
    %72 = tpu.strided_load %arg10[%c0_67, %c1_68, %c0_69] {strides = array<i32: 2, 2, 1>} : memref<18x18x128xf32, #tpu.memory_space<vmem>>, vector<8x8x128xf32>
    %73 = vector.shape_cast %72 : vector<8x8x128xf32> to vector<64x128xf32>
    %c1_70 = arith.constant 1 : index
    %c0_71 = arith.constant 0 : index
    %c0_72 = arith.constant 0 : index
    %74 = vector.load %arg4[%c1_70, %c0_71, %c0_72] : memref<9x128x128xf32, #tpu.memory_space<vmem>>, vector<1x128x128xf32>
    %75 = vector.shape_cast %74 : vector<1x128x128xf32> to vector<128x128xf32>
    %cst_73 = arith.constant dense<0.000000e+00> : vector<64x128xf32>
    %76 = tpu.matmul %73, %75, %cst_73 {dimension_numbers = #tpu.dot_dimension_numbers<[1], [0], [0], [1], [0, 0, 1, 1], [], []>} : vector<64x128xf32>, vector<128x128xf32>, vector<64x128xf32> -> vector<64x128xf32>
    %77 = arith.addf %71, %76 : vector<64x128xf32>
    %c0_74 = arith.constant 0 : index
    %c2_75 = arith.constant 2 : index
    %c0_76 = arith.constant 0 : index
    %78 = tpu.strided_load %arg10[%c0_74, %c2_75, %c0_76] {strides = array<i32: 2, 2, 1>} : memref<18x18x128xf32, #tpu.memory_space<vmem>>, vector<8x8x128xf32>
    %79 = vector.shape_cast %78 : vector<8x8x128xf32> to vector<64x128xf32>
    %c2_77 = arith.constant 2 : index
    %c0_78 = arith.constant 0 : index
    %c0_79 = arith.constant 0 : index
    %80 = vector.load %arg4[%c2_77, %c0_78, %c0_79] : memref<9x128x128xf32, #tpu.memory_space<vmem>>, vector<1x128x128xf32>
    %81 = vector.shape_cast %80 : vector<1x128x128xf32> to vector<128x128xf32>
    %cst_80 = arith.constant dense<0.000000e+00> : vector<64x128xf32>
    %82 = tpu.matmul %79, %81, %cst_80 {dimension_numbers = #tpu.dot_dimension_numbers<[1], [0], [0], [1], [0, 0, 1, 1], [], []>} : vector<64x128xf32>, vector<128x128xf32>, vector<64x128xf32> -> vector<64x128xf32>
    %83 = arith.addf %77, %82 : vector<64x128xf32>
    %c1_81 = arith.constant 1 : index
    %c0_82 = arith.constant 0 : index
    %c0_83 = arith.constant 0 : index
    %84 = tpu.strided_load %arg10[%c1_81, %c0_82, %c0_83] {strides = array<i32: 2, 2, 1>} : memref<18x18x128xf32, #tpu.memory_space<vmem>>, vector<8x8x128xf32>
    %85 = vector.shape_cast %84 : vector<8x8x128xf32> to vector<64x128xf32>
    %c3 = arith.constant 3 : index
    %c0_84 = arith.constant 0 : index
    %c0_85 = arith.constant 0 : index
    %86 = vector.load %arg4[%c3, %c0_84, %c0_85] : memref<9x128x128xf32, #tpu.memory_space<vmem>>, vector<1x128x128xf32>
    %87 = vector.shape_cast %86 : vector<1x128x128xf32> to vector<128x128xf32>
    %cst_86 = arith.constant dense<0.000000e+00> : vector<64x128xf32>
    %88 = tpu.matmul %85, %87, %cst_86 {dimension_numbers = #tpu.dot_dimension_numbers<[1], [0], [0], [1], [0, 0, 1, 1], [], []>} : vector<64x128xf32>, vector<128x128xf32>, vector<64x128xf32> -> vector<64x128xf32>
    %89 = arith.addf %83, %88 : vector<64x128xf32>
    %c1_87 = arith.constant 1 : index
    %c1_88 = arith.constant 1 : index
    %c0_89 = arith.constant 0 : index
    %90 = tpu.strided_load %arg10[%c1_87, %c1_88, %c0_89] {strides = array<i32: 2, 2, 1>} : memref<18x18x128xf32, #tpu.memory_space<vmem>>, vector<8x8x128xf32>
    %91 = vector.shape_cast %90 : vector<8x8x128xf32> to vector<64x128xf32>
    %c4 = arith.constant 4 : index
    %c0_90 = arith.constant 0 : index
    %c0_91 = arith.constant 0 : index
    %92 = vector.load %arg4[%c4, %c0_90, %c0_91] : memref<9x128x128xf32, #tpu.memory_space<vmem>>, vector<1x128x128xf32>
    %93 = vector.shape_cast %92 : vector<1x128x128xf32> to vector<128x128xf32>
    %cst_92 = arith.constant dense<0.000000e+00> : vector<64x128xf32>
    %94 = tpu.matmul %91, %93, %cst_92 {dimension_numbers = #tpu.dot_dimension_numbers<[1], [0], [0], [1], [0, 0, 1, 1], [], []>} : vector<64x128xf32>, vector<128x128xf32>, vector<64x128xf32> -> vector<64x128xf32>
    %95 = arith.addf %89, %94 : vector<64x128xf32>
    %c1_93 = arith.constant 1 : index
    %c2_94 = arith.constant 2 : index
    %c0_95 = arith.constant 0 : index
    %96 = tpu.strided_load %arg10[%c1_93, %c2_94, %c0_95] {strides = array<i32: 2, 2, 1>} : memref<18x18x128xf32, #tpu.memory_space<vmem>>, vector<8x8x128xf32>
    %97 = vector.shape_cast %96 : vector<8x8x128xf32> to vector<64x128xf32>
    %c5 = arith.constant 5 : index
    %c0_96 = arith.constant 0 : index
    %c0_97 = arith.constant 0 : index
    %98 = vector.load %arg4[%c5, %c0_96, %c0_97] : memref<9x128x128xf32, #tpu.memory_space<vmem>>, vector<1x128x128xf32>
    %99 = vector.shape_cast %98 : vector<1x128x128xf32> to vector<128x128xf32>
    %cst_98 = arith.constant dense<0.000000e+00> : vector<64x128xf32>
    %100 = tpu.matmul %97, %99, %cst_98 {dimension_numbers = #tpu.dot_dimension_numbers<[1], [0], [0], [1], [0, 0, 1, 1], [], []>} : vector<64x128xf32>, vector<128x128xf32>, vector<64x128xf32> -> vector<64x128xf32>
    %101 = arith.addf %95, %100 : vector<64x128xf32>
    %c2_99 = arith.constant 2 : index
    %c0_100 = arith.constant 0 : index
    %c0_101 = arith.constant 0 : index
    %102 = tpu.strided_load %arg10[%c2_99, %c0_100, %c0_101] {strides = array<i32: 2, 2, 1>} : memref<18x18x128xf32, #tpu.memory_space<vmem>>, vector<8x8x128xf32>
    %103 = vector.shape_cast %102 : vector<8x8x128xf32> to vector<64x128xf32>
    %c6 = arith.constant 6 : index
    %c0_102 = arith.constant 0 : index
    %c0_103 = arith.constant 0 : index
    %104 = vector.load %arg4[%c6, %c0_102, %c0_103] : memref<9x128x128xf32, #tpu.memory_space<vmem>>, vector<1x128x128xf32>
    %105 = vector.shape_cast %104 : vector<1x128x128xf32> to vector<128x128xf32>
    %cst_104 = arith.constant dense<0.000000e+00> : vector<64x128xf32>
    %106 = tpu.matmul %103, %105, %cst_104 {dimension_numbers = #tpu.dot_dimension_numbers<[1], [0], [0], [1], [0, 0, 1, 1], [], []>} : vector<64x128xf32>, vector<128x128xf32>, vector<64x128xf32> -> vector<64x128xf32>
    %107 = arith.addf %101, %106 : vector<64x128xf32>
    %c2_105 = arith.constant 2 : index
    %c1_106 = arith.constant 1 : index
    %c0_107 = arith.constant 0 : index
    %108 = tpu.strided_load %arg10[%c2_105, %c1_106, %c0_107] {strides = array<i32: 2, 2, 1>} : memref<18x18x128xf32, #tpu.memory_space<vmem>>, vector<8x8x128xf32>
    %109 = vector.shape_cast %108 : vector<8x8x128xf32> to vector<64x128xf32>
    %c7 = arith.constant 7 : index
    %c0_108 = arith.constant 0 : index
    %c0_109 = arith.constant 0 : index
    %110 = vector.load %arg4[%c7, %c0_108, %c0_109] : memref<9x128x128xf32, #tpu.memory_space<vmem>>, vector<1x128x128xf32>
    %111 = vector.shape_cast %110 : vector<1x128x128xf32> to vector<128x128xf32>
    %cst_110 = arith.constant dense<0.000000e+00> : vector<64x128xf32>
    %112 = tpu.matmul %109, %111, %cst_110 {dimension_numbers = #tpu.dot_dimension_numbers<[1], [0], [0], [1], [0, 0, 1, 1], [], []>} : vector<64x128xf32>, vector<128x128xf32>, vector<64x128xf32> -> vector<64x128xf32>
    %113 = arith.addf %107, %112 : vector<64x128xf32>
    %c2_111 = arith.constant 2 : index
    %c2_112 = arith.constant 2 : index
    %c0_113 = arith.constant 0 : index
    %114 = tpu.strided_load %arg10[%c2_111, %c2_112, %c0_113] {strides = array<i32: 2, 2, 1>} : memref<18x18x128xf32, #tpu.memory_space<vmem>>, vector<8x8x128xf32>
    %115 = vector.shape_cast %114 : vector<8x8x128xf32> to vector<64x128xf32>
    %c8_114 = arith.constant 8 : index
    %c0_115 = arith.constant 0 : index
    %c0_116 = arith.constant 0 : index
    %116 = vector.load %arg4[%c8_114, %c0_115, %c0_116] : memref<9x128x128xf32, #tpu.memory_space<vmem>>, vector<1x128x128xf32>
    %117 = vector.shape_cast %116 : vector<1x128x128xf32> to vector<128x128xf32>
    %cst_117 = arith.constant dense<0.000000e+00> : vector<64x128xf32>
    %118 = tpu.matmul %115, %117, %cst_117 {dimension_numbers = #tpu.dot_dimension_numbers<[1], [0], [0], [1], [0, 0, 1, 1], [], []>} : vector<64x128xf32>, vector<128x128xf32>, vector<64x128xf32> -> vector<64x128xf32>
    %119 = arith.addf %113, %118 : vector<64x128xf32>
    %c0_118 = arith.constant 0 : index
    %c0_119 = arith.constant 0 : index
    %120 = vector.load %arg5[%c0_118, %c0_119] : memref<1x128xf32, #tpu.memory_space<vmem>>, vector<1x128xf32>
    %121 = vector.broadcast %120 : vector<1x128xf32> to vector<64x128xf32>
    %122 = arith.addf %119, %121 : vector<64x128xf32>
    %cst_120 = arith.constant 0.000000e+00 : f32
    %123 = vector.broadcast %cst_120 : f32 to vector<64x128xf32>
    %124 = arith.maximumf %122, %123 : vector<64x128xf32>
    %125 = vector.shape_cast %124 : vector<64x128xf32> to vector<8x8x128xf32>
    %c1_121 = arith.constant 1 : index
    %c1_122 = arith.constant 1 : index
    %c0_123 = arith.constant 0 : index
    %126 = vector.load %arg11[%c1_121, %c1_122, %c0_123] : memref<10x10x128xf32, #tpu.memory_space<vmem>>, vector<8x8x128xf32>
    tpu.vector_store %arg11[%c1_121, %c1_122, %c0_123], %125 {strides = array<i32>} : memref<10x10x128xf32, #tpu.memory_space<vmem>>, vector<8x8x128xf32>,
    %cst_124 = arith.constant 0.000000e+00 : f32
    %127 = vector.broadcast %cst_124 : f32 to vector<16x128xf32>
    %c0_125 = arith.constant 0 : index
    %c0_126 = arith.constant 0 : index
    %c0_127 = arith.constant 0 : index
    %128 = tpu.strided_load %arg11[%c0_125, %c0_126, %c0_127] {strides = array<i32: 2, 2, 1>} : memref<10x10x128xf32, #tpu.memory_space<vmem>>, vector<4x4x128xf32>
    %129 = vector.shape_cast %128 : vector<4x4x128xf32> to vector<16x128xf32>
    %c0_128 = arith.constant 0 : index
    %c0_129 = arith.constant 0 : index
    %c0_130 = arith.constant 0 : index
    %130 = vector.load %arg6[%c0_128, %c0_129, %c0_130] : memref<9x128x128xf32, #tpu.memory_space<vmem>>, vector<1x128x128xf32>
    %131 = vector.shape_cast %130 : vector<1x128x128xf32> to vector<128x128xf32>
    %cst_131 = arith.constant dense<0.000000e+00> : vector<16x128xf32>
    %132 = tpu.matmul %129, %131, %cst_131 {dimension_numbers = #tpu.dot_dimension_numbers<[1], [0], [0], [1], [0, 0, 1, 1], [], []>} : vector<16x128xf32>, vector<128x128xf32>, vector<16x128xf32> -> vector<16x128xf32>
    %133 = arith.addf %127, %132 : vector<16x128xf32>
    %c0_132 = arith.constant 0 : index
    %c1_133 = arith.constant 1 : index
    %c0_134 = arith.constant 0 : index
    %134 = tpu.strided_load %arg11[%c0_132, %c1_133, %c0_134] {strides = array<i32: 2, 2, 1>} : memref<10x10x128xf32, #tpu.memory_space<vmem>>, vector<4x4x128xf32>
    %135 = vector.shape_cast %134 : vector<4x4x128xf32> to vector<16x128xf32>
    %c1_135 = arith.constant 1 : index
    %c0_136 = arith.constant 0 : index
    %c0_137 = arith.constant 0 : index
    %136 = vector.load %arg6[%c1_135, %c0_136, %c0_137] : memref<9x128x128xf32, #tpu.memory_space<vmem>>, vector<1x128x128xf32>
    %137 = vector.shape_cast %136 : vector<1x128x128xf32> to vector<128x128xf32>
    %cst_138 = arith.constant dense<0.000000e+00> : vector<16x128xf32>
    %138 = tpu.matmul %135, %137, %cst_138 {dimension_numbers = #tpu.dot_dimension_numbers<[1], [0], [0], [1], [0, 0, 1, 1], [], []>} : vector<16x128xf32>, vector<128x128xf32>, vector<16x128xf32> -> vector<16x128xf32>
    %139 = arith.addf %133, %138 : vector<16x128xf32>
    %c0_139 = arith.constant 0 : index
    %c2_140 = arith.constant 2 : index
    %c0_141 = arith.constant 0 : index
    %140 = tpu.strided_load %arg11[%c0_139, %c2_140, %c0_141] {strides = array<i32: 2, 2, 1>} : memref<10x10x128xf32, #tpu.memory_space<vmem>>, vector<4x4x128xf32>
    %141 = vector.shape_cast %140 : vector<4x4x128xf32> to vector<16x128xf32>
    %c2_142 = arith.constant 2 : index
    %c0_143 = arith.constant 0 : index
    %c0_144 = arith.constant 0 : index
    %142 = vector.load %arg6[%c2_142, %c0_143, %c0_144] : memref<9x128x128xf32, #tpu.memory_space<vmem>>, vector<1x128x128xf32>
    %143 = vector.shape_cast %142 : vector<1x128x128xf32> to vector<128x128xf32>
    %cst_145 = arith.constant dense<0.000000e+00> : vector<16x128xf32>
    %144 = tpu.matmul %141, %143, %cst_145 {dimension_numbers = #tpu.dot_dimension_numbers<[1], [0], [0], [1], [0, 0, 1, 1], [], []>} : vector<16x128xf32>, vector<128x128xf32>, vector<16x128xf32> -> vector<16x128xf32>
    %145 = arith.addf %139, %144 : vector<16x128xf32>
    %c1_146 = arith.constant 1 : index
    %c0_147 = arith.constant 0 : index
    %c0_148 = arith.constant 0 : index
    %146 = tpu.strided_load %arg11[%c1_146, %c0_147, %c0_148] {strides = array<i32: 2, 2, 1>} : memref<10x10x128xf32, #tpu.memory_space<vmem>>, vector<4x4x128xf32>
    %147 = vector.shape_cast %146 : vector<4x4x128xf32> to vector<16x128xf32>
    %c3_149 = arith.constant 3 : index
    %c0_150 = arith.constant 0 : index
    %c0_151 = arith.constant 0 : index
    %148 = vector.load %arg6[%c3_149, %c0_150, %c0_151] : memref<9x128x128xf32, #tpu.memory_space<vmem>>, vector<1x128x128xf32>
    %149 = vector.shape_cast %148 : vector<1x128x128xf32> to vector<128x128xf32>
    %cst_152 = arith.constant dense<0.000000e+00> : vector<16x128xf32>
    %150 = tpu.matmul %147, %149, %cst_152 {dimension_numbers = #tpu.dot_dimension_numbers<[1], [0], [0], [1], [0, 0, 1, 1], [], []>} : vector<16x128xf32>, vector<128x128xf32>, vector<16x128xf32> -> vector<16x128xf32>
    %151 = arith.addf %145, %150 : vector<16x128xf32>
    %c1_153 = arith.constant 1 : index
    %c1_154 = arith.constant 1 : index
    %c0_155 = arith.constant 0 : index
    %152 = tpu.strided_load %arg11[%c1_153, %c1_154, %c0_155] {strides = array<i32: 2, 2, 1>} : memref<10x10x128xf32, #tpu.memory_space<vmem>>, vector<4x4x128xf32>
    %153 = vector.shape_cast %152 : vector<4x4x128xf32> to vector<16x128xf32>
    %c4_156 = arith.constant 4 : index
    %c0_157 = arith.constant 0 : index
    %c0_158 = arith.constant 0 : index
    %154 = vector.load %arg6[%c4_156, %c0_157, %c0_158] : memref<9x128x128xf32, #tpu.memory_space<vmem>>, vector<1x128x128xf32>
    %155 = vector.shape_cast %154 : vector<1x128x128xf32> to vector<128x128xf32>
    %cst_159 = arith.constant dense<0.000000e+00> : vector<16x128xf32>
    %156 = tpu.matmul %153, %155, %cst_159 {dimension_numbers = #tpu.dot_dimension_numbers<[1], [0], [0], [1], [0, 0, 1, 1], [], []>} : vector<16x128xf32>, vector<128x128xf32>, vector<16x128xf32> -> vector<16x128xf32>
    %157 = arith.addf %151, %156 : vector<16x128xf32>
    %c1_160 = arith.constant 1 : index
    %c2_161 = arith.constant 2 : index
    %c0_162 = arith.constant 0 : index
    %158 = tpu.strided_load %arg11[%c1_160, %c2_161, %c0_162] {strides = array<i32: 2, 2, 1>} : memref<10x10x128xf32, #tpu.memory_space<vmem>>, vector<4x4x128xf32>
    %159 = vector.shape_cast %158 : vector<4x4x128xf32> to vector<16x128xf32>
    %c5_163 = arith.constant 5 : index
    %c0_164 = arith.constant 0 : index
    %c0_165 = arith.constant 0 : index
    %160 = vector.load %arg6[%c5_163, %c0_164, %c0_165] : memref<9x128x128xf32, #tpu.memory_space<vmem>>, vector<1x128x128xf32>
    %161 = vector.shape_cast %160 : vector<1x128x128xf32> to vector<128x128xf32>
    %cst_166 = arith.constant dense<0.000000e+00> : vector<16x128xf32>
    %162 = tpu.matmul %159, %161, %cst_166 {dimension_numbers = #tpu.dot_dimension_numbers<[1], [0], [0], [1], [0, 0, 1, 1], [], []>} : vector<16x128xf32>, vector<128x128xf32>, vector<16x128xf32> -> vector<16x128xf32>
    %163 = arith.addf %157, %162 : vector<16x128xf32>
    %c2_167 = arith.constant 2 : index
    %c0_168 = arith.constant 0 : index
    %c0_169 = arith.constant 0 : index
    %164 = tpu.strided_load %arg11[%c2_167, %c0_168, %c0_169] {strides = array<i32: 2, 2, 1>} : memref<10x10x128xf32, #tpu.memory_space<vmem>>, vector<4x4x128xf32>
    %165 = vector.shape_cast %164 : vector<4x4x128xf32> to vector<16x128xf32>
    %c6_170 = arith.constant 6 : index
    %c0_171 = arith.constant 0 : index
    %c0_172 = arith.constant 0 : index
    %166 = vector.load %arg6[%c6_170, %c0_171, %c0_172] : memref<9x128x128xf32, #tpu.memory_space<vmem>>, vector<1x128x128xf32>
    %167 = vector.shape_cast %166 : vector<1x128x128xf32> to vector<128x128xf32>
    %cst_173 = arith.constant dense<0.000000e+00> : vector<16x128xf32>
    %168 = tpu.matmul %165, %167, %cst_173 {dimension_numbers = #tpu.dot_dimension_numbers<[1], [0], [0], [1], [0, 0, 1, 1], [], []>} : vector<16x128xf32>, vector<128x128xf32>, vector<16x128xf32> -> vector<16x128xf32>
    %169 = arith.addf %163, %168 : vector<16x128xf32>
    %c2_174 = arith.constant 2 : index
    %c1_175 = arith.constant 1 : index
    %c0_176 = arith.constant 0 : index
    %170 = tpu.strided_load %arg11[%c2_174, %c1_175, %c0_176] {strides = array<i32: 2, 2, 1>} : memref<10x10x128xf32, #tpu.memory_space<vmem>>, vector<4x4x128xf32>
    %171 = vector.shape_cast %170 : vector<4x4x128xf32> to vector<16x128xf32>
    %c7_177 = arith.constant 7 : index
    %c0_178 = arith.constant 0 : index
    %c0_179 = arith.constant 0 : index
    %172 = vector.load %arg6[%c7_177, %c0_178, %c0_179] : memref<9x128x128xf32, #tpu.memory_space<vmem>>, vector<1x128x128xf32>
    %173 = vector.shape_cast %172 : vector<1x128x128xf32> to vector<128x128xf32>
    %cst_180 = arith.constant dense<0.000000e+00> : vector<16x128xf32>
    %174 = tpu.matmul %171, %173, %cst_180 {dimension_numbers = #tpu.dot_dimension_numbers<[1], [0], [0], [1], [0, 0, 1, 1], [], []>} : vector<16x128xf32>, vector<128x128xf32>, vector<16x128xf32> -> vector<16x128xf32>
    %175 = arith.addf %169, %174 : vector<16x128xf32>
    %c2_181 = arith.constant 2 : index
    %c2_182 = arith.constant 2 : index
    %c0_183 = arith.constant 0 : index
    %176 = tpu.strided_load %arg11[%c2_181, %c2_182, %c0_183] {strides = array<i32: 2, 2, 1>} : memref<10x10x128xf32, #tpu.memory_space<vmem>>, vector<4x4x128xf32>
    %177 = vector.shape_cast %176 : vector<4x4x128xf32> to vector<16x128xf32>
    %c8_184 = arith.constant 8 : index
    %c0_185 = arith.constant 0 : index
    %c0_186 = arith.constant 0 : index
    %178 = vector.load %arg6[%c8_184, %c0_185, %c0_186] : memref<9x128x128xf32, #tpu.memory_space<vmem>>, vector<1x128x128xf32>
    %179 = vector.shape_cast %178 : vector<1x128x128xf32> to vector<128x128xf32>
    %cst_187 = arith.constant dense<0.000000e+00> : vector<16x128xf32>
    %180 = tpu.matmul %177, %179, %cst_187 {dimension_numbers = #tpu.dot_dimension_numbers<[1], [0], [0], [1], [0, 0, 1, 1], [], []>} : vector<16x128xf32>, vector<128x128xf32>, vector<16x128xf32> -> vector<16x128xf32>
    %181 = arith.addf %175, %180 : vector<16x128xf32>
    %c0_188 = arith.constant 0 : index
    %c0_189 = arith.constant 0 : index
    %182 = vector.load %arg7[%c0_188, %c0_189] : memref<1x128xf32, #tpu.memory_space<vmem>>, vector<1x128xf32>
    %183 = vector.broadcast %182 : vector<1x128xf32> to vector<16x128xf32>
    %184 = arith.addf %181, %183 : vector<16x128xf32>
    %cst_190 = arith.constant 0.000000e+00 : f32
    %185 = vector.broadcast %cst_190 : f32 to vector<16x128xf32>
    %186 = arith.maximumf %184, %185 : vector<16x128xf32>
    %c0_191 = arith.constant 0 : index
    %c0_192 = arith.constant 0 : index
    %c0_193 = arith.constant 0 : index
    %187 = vector.load %arg8[%c0_191, %c0_192, %c0_193] : memref<1x16x128xf32, #tpu.memory_space<vmem>>, vector<1x16x128xf32>
    %188 = vector.shape_cast %187 : vector<1x16x128xf32> to vector<16x128xf32>
    %189 = vector.shape_cast %186 : vector<16x128xf32> to vector<1x16x128xf32>
    tpu.vector_store %arg8[%c0_191, %c0_192, %c0_193], %189 {strides = array<i32>} : memref<1x16x128xf32, #tpu.memory_space<vmem>>, vector<1x16x128xf32>,
    return
  }
  func.func @transform_0(%arg0: i32) -> (i32, i32, i32) {
    %c0_i32 = arith.constant 0 : i32
    %c0_i32_0 = arith.constant 0 : i32
    %c0_i32_1 = arith.constant 0 : i32
    return %arg0, %c0_i32, %c0_i32_0 : i32, i32, i32
  }
  func.func @transform_1(%arg0: i32) -> (i32, i32) {
    %c0_i32 = arith.constant 0 : i32
    %c0_i32_0 = arith.constant 0 : i32
    %c0_i32_1 = arith.constant 0 : i32
    return %c0_i32, %c0_i32_0 : i32, i32
  }
  func.func @transform_2(%arg0: i32) -> (i32, i32) {
    %c0_i32 = arith.constant 0 : i32
    %c0_i32_0 = arith.constant 0 : i32
    %c0_i32_1 = arith.constant 0 : i32
    return %c0_i32, %c0_i32_0 : i32, i32
  }
  func.func @transform_3(%arg0: i32) -> (i32, i32, i32) {
    %c0_i32 = arith.constant 0 : i32
    %c0_i32_0 = arith.constant 0 : i32
    %c0_i32_1 = arith.constant 0 : i32
    %c0_i32_2 = arith.constant 0 : i32
    return %c0_i32, %c0_i32_0, %c0_i32_1 : i32, i32, i32
  }
  func.func @transform_4(%arg0: i32) -> (i32, i32) {
    %c0_i32 = arith.constant 0 : i32
    %c0_i32_0 = arith.constant 0 : i32
    %c0_i32_1 = arith.constant 0 : i32
    return %c0_i32, %c0_i32_0 : i32, i32
  }
  func.func @transform_5(%arg0: i32) -> (i32, i32, i32) {
    %c0_i32 = arith.constant 0 : i32
    %c0_i32_0 = arith.constant 0 : i32
    %c0_i32_1 = arith.constant 0 : i32
    %c0_i32_2 = arith.constant 0 : i32
    return %c0_i32, %c0_i32_0, %c0_i32_1 : i32, i32, i32
  }
  func.func @transform_6(%arg0: i32) -> (i32, i32) {
    %c0_i32 = arith.constant 0 : i32
    %c0_i32_0 = arith.constant 0 : i32
    %c0_i32_1 = arith.constant 0 : i32
    return %c0_i32, %c0_i32_0 : i32, i32
  }
  func.func @transform_7(%arg0: i32) -> (i32, i32, i32) {
    %c0_i32 = arith.constant 0 : i32
    %c0_i32_0 = arith.constant 0 : i32
    %c0_i32_1 = arith.constant 0 : i32
    return %arg0, %c0_i32, %c0_i32_0 : i32, i32, i32
  }
}

</mosaic_0001>

<bundles_post_ra>
// kernel: shared_conv_forward.1
= control target key start
LH: loop header
LB: loop body
LE: loop exit
PB: predicated region body
PF: predicated region fallthrough
CT: control target
= control target key end

     0   :  { %12 = vsyncpa [#allocation6], 0  ;;  %s9369_s0 = inlined_call_operand.vmem [shape: f32[2,16,16], index: 0, kind: input, shape index: {}]   ;;  %s9370_s1 = inlined_call_operand.vmem [shape: f32[9,128], index: 1, kind: input, shape index: {}]   ;;  %s9371_s2 = inlined_call_operand.vmem [shape: f32[1,128], index: 2, kind: input, shape index: {}]   ;;  %s9372_s3 = inlined_call_operand.vmem [shape: f32[9,128,128], index: 3, kind: input, shape index: {}]   ;;  %s9373_s4 = inlined_call_operand.vmem [shape: f32[1,128], index: 4, kind: input, shape index: {}]   ;;  %s9374_s5 = inlined_call_operand.vmem [shape: f32[9,128,128], index: 5, kind: input, shape index: {}]   ;;  %s9375_s6 = inlined_call_operand.vmem [shape: f32[1,128], index: 6, kind: input, shape index: {}]   ;;  %s9376_s7 = inlined_call_operand.hbm [shape: f32[2,16,128], index: 7, kind: output, shape index: {}]  }
   0x1   :  { %14 = vsyncpa [#allocation6 + $0x1], 0  ;;  %s7179_s24 = smov 0   ;;  %s7181_s25 = smov 0  }
   0x2   :  { %s7183_s26 = smov 0   ;;  %s7185_s27 = smov 0  }
   0x3 LB: > { %s7200_s28 = sadd.s32 4294967295, %s7131_s27   ;;  %s4868_s29 = sadd.s32 4294967294, %s7131_s27   ;;  %s7131_s27 = sphi %s7185_s27, %s9409_s27   ;;  %s7127_s26 = sphi %s7183_s26, %s9408_s26   ;;  %s7123_s25 = sphi %s7181_s25, %s9407_s25   ;;  %s7119_s24 = sphi %s7179_s24, %s9406_s24  }
   0x4   : > { %s7204_s30 = sadd.s32 1, %s7131_s27   ;;  %s179_s8 = sadd.s32 1, %s7127_s26 }
   0x5   : > { %s176_s9 = ssub.s32 %s7131_s27, %s7204_s30  ;;  %p189_p0 = scmp.ne.s32.totalorder %s7127_s26, %s7123_s25 }
   0x6   : > { %p177_p1 = scmp.eq.s32.totalorder %s176_s9, 0  ;;  %p190_p2 = scmp.eq.s32.totalorder %s7200_s28, 1 }
   0x7   : > { %p195_p3 = scmp.ne.s32.totalorder %s7123_s25, %s7119_s24  ;;  %p196_p4 = scmp.eq.s32.totalorder %s4868_s29, 1 }
   0x8   : > { %s7215_s10 = scalar_select %p177_p1, %s7127_s26, %s179_s8  }
   0x9   : > { %p7217_p5 = por %p190_p2, %p189_p0  ;;  %p7221_p6 = por %p196_p4, %p195_p3 }
   0xa   : > { %p4871_p7 = scmp.ge.s32.totalorder %s7131_s27, 1  ;;  %p240_p8 = scmp.lt.s32.totalorder %s7131_s27, 3 }
   0xc   : > { %p241_p9 = pnand %p4871_p7, %p240_p8 }
   0xe   : > { %244 = sbr.rel (%p241_p9) target bundleno = 1948 (0x79c), region = 48 }
  0x15   : > { %p272_p10 = scmp.lt.s32.totalorder %s7200_s28, 1  ;;  %vm277_vm0 = vcmask 146432   ;;  %vm280_vm1 = vcmask 140288   ;;  %v7133_v0 = vmov 0.0   ;;  %s7134_s18 = smov 1   ;;  %v375_v3 = vlaneseq  ;;  %v369_v61 = vld [vmem:[%s9370_s1] sm:$0xff] }
  0x16   : > { %278 = vst.msk [vmem:[#allocation2] sm:$0xff] %vm277_vm0, %v7133_v0  ;;  %279 = vst.msk [vmem:[#allocation2 + $0x8] sm:$0xff] %vm277_vm0, %v7133_v0  ;;  %vm366_vm2 = vcmask 138248   ;;  %v370_v62 = vld [vmem:[%s9370_s1 + $0x8] sm:$0x1]  ;;  %vm1214_vm3 = vcmask 1040384  }
  0x17   : > { %282 = vst [vmem:[#allocation3] sm:$0xff] %v7133_v0  ;;  %283 = vst [vmem:[#allocation3 + $0x8] sm:$0xff] %v7133_v0  ;;  %s273_s13 = scalar_select %p272_p10, %s7200_s28, 1  ;;  %v376_v5 = vshrl.u32 %v375_v3, 7  ;;  %v6356_v63 = vpack.c.bf16 %v370_v62, %v369_v61  ;;  %vm7135_vm4 = vmmov 1   ;;  %vm1023_vm6 = vcmask 7168  }
  0x18   : > { %284 = vst [vmem:[#allocation3 + $0x10] sm:$0x3] %v7133_v0  ;;  %285 = vst [vmem:[#allocation3 + $0x18] sm:$0xff] %v7133_v0  ;;  %vm1040_vm7 = vcmask 15360   ;;  %vm1057_vm8 = vcmask 23552   ;;  %vm1074_vm9 = vcmask 31744  }
  0x19   : > { %286 = vst [vmem:[#allocation3 + $0x20] sm:$0xff] %v7133_v0  ;;  %287 = vst [vmem:[#allocation3 + $0x28] sm:$0x3] %v7133_v0  ;;  %s5173_s14 = sshll.u32 %s273_s13, 4  ;;  %v7307_v7 = vsub.s32 0, %v376_v5  ;;  %v410_v8 = vsub.s32 3, %v376_v5 }
  0x1a   : > { %288 = vst [vmem:[#allocation3 + $0x30] sm:$0xff] %v7133_v0  ;;  %289 = vst [vmem:[#allocation3 + $0x38] sm:$0xff] %v7133_v0  ;;  %s276_s17 = scalar_lea.vmem %s9369_s0, %s5173_s14  ;;  %v421_v9 = vsub.s32 4, %v376_v5  ;;  %v432_v10 = vsub.s32 5, %v376_v5  ;;  %v443_v13 = vsub.s32 6, %v376_v5  ;;  %v454_v14 = vsub.s32 7, %v376_v5 }
  0x1b   : > { %290 = vst [vmem:[#allocation3 + $0x40] sm:$0x3] %v7133_v0  ;;  %291 = vst [vmem:[#allocation3 + $0x48] sm:$0xff] %v7133_v0  ;;  %v356_v1 = vld [vmem:[%s276_s17] sm:$0xff]  ;;  %v357_v2 = vld [vmem:[%s276_s17 + $0x8] sm:$0xff]  ;;  %v7348_v28 = vsub.s32 1, %v376_v5 }
  0x1c   : > { %292 = vst [vmem:[#allocation3 + $0x50] sm:$0xff] %v7133_v0  ;;  %293 = vst [vmem:[#allocation3 + $0x58] sm:$0x3] %v7133_v0  ;;  %360 = vrot.lane.b32.xlu0 %v356_v1, %s7134_s18  ;;  %v7350_v29 = vsub.s32 2, %v376_v5  ;;  %vm1091_vm10 = vcmask 39936   ;;  %vm1108_vm11 = vcmask 48128  }
  0x1d   : > { %294 = vst [vmem:[#allocation3 + $0x60] sm:$0xff] %v7133_v0  ;;  %295 = vst [vmem:[#allocation3 + $0x68] sm:$0xff] %v7133_v0  ;;  %vm1125_vm12 = vcmask 56320   ;;  %vm1142_vm13 = vcmask 64512   ;;  %vm1165_vm14 = vcmask 72704   ;;  %s269_s17 = sand.u32 1, %s7123_s25  }
  0x1e   : > { %296 = vst [vmem:[#allocation3 + $0x70] sm:$0x3] %v7133_v0  ;;  %297 = vst [vmem:[#allocation3 + $0x78] sm:$0xff] %v7133_v0  ;;  %s5174_s23 = sshll.u32 %s7200_s28, 8  ;;  %s9328_s13 = scalar_lea.sflag [#allocation6], %s269_s17 }
  0x1f   : > { %298 = vst [vmem:[#allocation3 + $0x80] sm:$0xff] %v7133_v0  ;;  %299 = vst [vmem:[#allocation3 + $0x88] sm:$0x3] %v7133_v0  ;;  %s9326_s9 = scalar_lea.hbm %s9376_s7, %s5174_s23  ;;  %s7136_s14 = smov [#allocation5]  }
  0x20   : > { %300 = vst [vmem:[#allocation3 + $0x90] sm:$0xff] %v7133_v0  ;;  %301 = vst [vmem:[#allocation3 + $0x98] sm:$0xff] %v7133_v0  ;;  %362 = vrot.lane.b32.xlu0 %v357_v2, %s7134_s18  ;;  %s4872_s18 = sshll.u32 %s269_s17, 4  ;;  %s7073_s15 = sshll.u32 %s7136_s14, 4  ;;  %s7074_s15 = int_to_ptr.vmem [resolvable:$false] %s7073_s15 }
  0x21   : > { %302 = vst [vmem:[#allocation3 + $0xa0] sm:$0x3] %v7133_v0  ;;  %303 = vst [vmem:[#allocation3 + $0xa8] sm:$0xff] %v7133_v0  ;;  %s271_s21 = scalar_lea.vmem [#allocation5], %s4872_s18  ;;  %s7075_s16 = scalar_lea.vmem %s7074_s15, 512 }
  0x22   : > { %304 = vst [vmem:[#allocation3 + $0xb0] sm:$0xff] %v7133_v0  ;;  %305 = vst [vmem:[#allocation3 + $0xb8] sm:$0x3] %v7133_v0  ;;  %s4738_s22 = sshll.u32 %s271_s21, 4  ;;  %s9321_s22 = int_to_ptr.vmem [resolvable:$true] %s4738_s22 }
  0x23   : > { %306 = vst [vmem:[#allocation3 + $0xc0] sm:$0xff] %v7133_v0  ;;  %307 = vst [vmem:[#allocation3 + $0xc8] sm:$0xff] %v7133_v0  ;;  %s7069_s28 = scalar_lea.vmem %s9321_s22, 256  ;;  %p7076_p0 = scmp.lt.s32.totalorder %s9321_s22, %s7074_s15 }
  0x24   : > { %308 = vst [vmem:[#allocation3 + $0xd0] sm:$0x3] %v7133_v0  ;;  %309 = vst [vmem:[#allocation3 + $0xd8] sm:$0xff] %v7133_v0  ;;  %p7070_p11 = scmp.ne.s32.totalorder %s9321_s22, %s7069_s28  ;;  %p7077_p1 = scmp.lt.s32.totalorder %s7075_s16, %s7069_s28 }
  0x25   : > { %310 = vst [vmem:[#allocation3 + $0xe0] sm:$0xff] %v7133_v0  ;;  %311 = vst [vmem:[#allocation3 + $0xe8] sm:$0x3] %v7133_v0 }
  0x26   : > { %312 = vst [vmem:[#allocation3 + $0xf0] sm:$0xff] %v7133_v0  ;;  %313 = vst [vmem:[#allocation3 + $0xf8] sm:$0xff] %v7133_v0  ;;  %p7071_p12 = pnand %p7070_p11, %p7217_p5  ;;  %p7078_p2 = por %p7077_p1, %p7076_p0 }
  0x27   : > { %314 = vst [vmem:[#allocation3 + $0x100] sm:$0x3] %v7133_v0  ;;  %315 = vst [vmem:[#allocation3 + $0x108] sm:$0xff] %v7133_v0 }
  0x28   : > { %316 = vst [vmem:[#allocation3 + $0x110] sm:$0xff] %v7133_v0  ;;  %317 = vst [vmem:[#allocation3 + $0x118] sm:$0x3] %v7133_v0  ;;  %p7072_p13 = pneg %p7071_p12 }
  0x29   : > { %318 = vst [vmem:[#allocation3 + $0x120] sm:$0xff] %v7133_v0  ;;  %319 = vst [vmem:[#allocation3 + $0x128] sm:$0xff] %v7133_v0 }
  0x2a   : > { %320 = vst [vmem:[#allocation3 + $0x130] sm:$0x3] %v7133_v0  ;;  %321 = vst [vmem:[#allocation3 + $0x138] sm:$0xff] %v7133_v0  ;;  %p7079_p3 = pnand %p7078_p2, %p7072_p13 }
  0x2b   : > { %322 = vst [vmem:[#allocation3 + $0x140] sm:$0xff] %v7133_v0  ;;  %323 = vst [vmem:[#allocation3 + $0x148] sm:$0x3] %v7133_v0 }
  0x2c   : > { %324 = vst [vmem:[#allocation3 + $0x150] sm:$0xff] %v7133_v0  ;;  %325 = vst [vmem:[#allocation3 + $0x158] sm:$0xff] %v7133_v0 }
  0x2d   : > { %326 = vst [vmem:[#allocation3 + $0x160] sm:$0x3] %v7133_v0  ;;  %327 = vst [vmem:[#allocation3 + $0x168] sm:$0xff] %v7133_v0 }
  0x2e   : > { %328 = vst [vmem:[#allocation3 + $0x170] sm:$0xff] %v7133_v0  ;;  %329 = vst [vmem:[#allocation3 + $0x178] sm:$0x3] %v7133_v0 }
  0x2f   : > { %330 = vst [vmem:[#allocation3 + $0x180] sm:$0xff] %v7133_v0  ;;  %331 = vst [vmem:[#allocation3 + $0x188] sm:$0xff] %v7133_v0 }
  0x30   : > { %332 = vst [vmem:[#allocation3 + $0x190] sm:$0x3] %v7133_v0  ;;  %336 = vst [vmem:[#allocation4] sm:$0xff] %v7133_v0 }
  0x31   : > { %337 = vst [vmem:[#allocation4 + $0x8] sm:$0x3] %v7133_v0  ;;  %338 = vst [vmem:[#allocation4 + $0x10] sm:$0xff] %v7133_v0 }
  0x32   : > { %339 = vst [vmem:[#allocation4 + $0x18] sm:$0x3] %v7133_v0  ;;  %340 = vst [vmem:[#allocation4 + $0x20] sm:$0xff] %v7133_v0 }
  0x33   : > { %341 = vst [vmem:[#allocation4 + $0x28] sm:$0x3] %v7133_v0  ;;  %342 = vst [vmem:[#allocation4 + $0x30] sm:$0xff] %v7133_v0 }
  0x34   : > { %343 = vst [vmem:[#allocation4 + $0x38] sm:$0x3] %v7133_v0  ;;  %344 = vst [vmem:[#allocation4 + $0x40] sm:$0xff] %v7133_v0 }
  0x35   : > { %345 = vst [vmem:[#allocation4 + $0x48] sm:$0x3] %v7133_v0  ;;  %346 = vst [vmem:[#allocation4 + $0x50] sm:$0xff] %v7133_v0 }
  0x36   : > { %347 = vst [vmem:[#allocation4 + $0x58] sm:$0x3] %v7133_v0  ;;  %348 = vst [vmem:[#allocation4 + $0x60] sm:$0xff] %v7133_v0 }
  0x37   : > { %349 = vst [vmem:[#allocation4 + $0x68] sm:$0x3] %v7133_v0  ;;  %350 = vst [vmem:[#allocation4 + $0x70] sm:$0xff] %v7133_v0 }
  0x38   : > { %351 = vst [vmem:[#allocation4 + $0x78] sm:$0x3] %v7133_v0  ;;  %352 = vst [vmem:[#allocation4 + $0x80] sm:$0xff] %v7133_v0 }
  0x39   : > { %353 = vst [vmem:[#allocation4 + $0x88] sm:$0x3] %v7133_v0  ;;  %281 = vst.msk [vmem:[#allocation2 + $0x10] sm:$0x3] %vm280_vm1, %v7133_v0 }
  0x3a   : > { %vm6357_vm5 = vmpackc.low %vm1214_vm3, %vm7135_vm4 }
  0x3b   : > { %6358 = vmatprep.subr.msk.bf16.mxu0 %vm6357_vm5, %v6356_v63  ;;  %6364 = vmatprep.subr.msk.bf16.mxu1 %vm6357_vm5, %v6356_v63 }
  0x3c   : > { %6361 = vmatpush3.bf16.msk.msra.mxu0 %vm6357_vm5, %v6356_v63  ;;  %6367 = vmatpush3.bf16.msk.msra.mxu1 %vm6357_vm5, %v6356_v63 }
  0x8e   : > { %v361_v4 = vpop.permute.xlu0 %360 }
  0x8f   : > { %367 = vst.msk [vmem:[#allocation2 + $0x1] sm:$0xff] %vm366_vm2, %v361_v4 }
  0x92   : > { %v363_v6 = vpop.permute.xlu0 %362 }
  0x93   : > { %368 = vst.msk [vmem:[#allocation2 + $0x9] sm:$0xff] %vm366_vm2, %v363_v6 }
  0x96   : > { %v7309_v11 = vld [vmem:[#allocation2] sm:$0xff] }
  0x97   : > { %v7311_v12 = vld [vmem:[#allocation2 + $0x1] sm:$0xff]  ;;  %v378_v15 = vrot.slane %v7309_v11, %v7307_v7  ;;  %v7316_v16 = vrot.slane %v7309_v11, %v410_v8  ;;  %v7322_v18 = vrot.slane %v7309_v11, %v421_v9  ;;  %v7328_v20 = vrot.slane %v7309_v11, %v432_v10 }
  0x98   : > { %v7319_v17 = vrot.slane %v7311_v12, %v410_v8  ;;  %v7325_v19 = vrot.slane %v7311_v12, %v421_v9  ;;  %v7337_v24 = vrot.slane %v7311_v12, %v432_v10  ;;  %v7340_v25 = vrot.slane %v7309_v11, %v443_v13 }
  0x99   : > { %384 = vbcast.lane.b32.xlu0 %v378_v15, 264  ;;  %380 = vbcast.lane.b32.xlu1 %v378_v15, 256  ;;  %v7343_v26 = vrot.slane %v7311_v12, %v443_v13  ;;  %v7346_v27 = vrot.slane %v7309_v11, %v454_v14  ;;  %v594_v31 = vrot.slane %v7311_v12, %v7307_v7 }
  0x9a   : > { %v7330_v21 = vld [vmem:[#allocation2 + $0x2] sm:$0xff]  ;;  %v7352_v30 = vld [vmem:[#allocation2 + $0xa] sm:$0xff]  ;;  %v7398_v44 = vrot.slane %v7311_v12, %v454_v14  ;;  %v389_v58 = vrot.slane %v7309_v11, %v7348_v28  ;;  %v605_v60 = vrot.slane %v7311_v12, %v7348_v28  ;;  %v400_v0 = vrot.slane %v7309_v11, %v7350_v29 }
  0x9b   : > { %v7332_v22 = vld [vmem:[#allocation2 + $0x8] sm:$0xff]  ;;  %v7357_v32 = vrot.slane %v7330_v21, %v410_v8  ;;  %v7368_v35 = vrot.slane %v7330_v21, %v421_v9  ;;  %v7372_v36 = vrot.slane %v7352_v30, %v7348_v28  ;;  %v7382_v39 = vrot.slane %v7330_v21, %v432_v10 }
  0x9c   : > { %v7334_v23 = vld [vmem:[#allocation2 + $0x9] sm:$0xff]  ;;  %v7365_v34 = vrot.slane %v7332_v22, %v7350_v29  ;;  %v7379_v38 = vrot.slane %v7332_v22, %v410_v8  ;;  %v7386_v40 = vrot.slane %v7352_v30, %v7350_v29  ;;  %v7392_v42 = vrot.slane %v7332_v22, %v421_v9 }
  0x9d   : > { %529 = vbcast.lane.b32.xlu0 %v378_v15, 258  ;;  %465 = vbcast.lane.b32.xlu1 %v378_v15, 257  ;;  %v7361_v33 = vrot.slane %v7334_v23, %v7348_v28  ;;  %v7376_v37 = vrot.slane %v7334_v23, %v7350_v29  ;;  %v7389_v41 = vrot.slane %v7334_v23, %v410_v8 }
  0x9e   : > { %v7395_v43 = vrot.slane %v7330_v21, %v443_v13  ;;  %v7401_v45 = vrot.slane %v7352_v30, %v410_v8  ;;  %v7404_v46 = vrot.slane %v7334_v23, %v421_v9  ;;  %v7407_v47 = vrot.slane %v7330_v21, %v454_v14 }
  0x9f   : > { %v7410_v48 = vrot.slane %v7332_v22, %v432_v10  ;;  %v7413_v49 = vrot.slane %v7352_v30, %v421_v9  ;;  %v7416_v50 = vrot.slane %v7334_v23, %v432_v10  ;;  %v7419_v51 = vrot.slane %v7352_v30, %v432_v10 }
  0xa0   : > { %v7422_v52 = vrot.slane %v7332_v22, %v443_v13  ;;  %v7425_v53 = vrot.slane %v7334_v23, %v443_v13  ;;  %v7428_v54 = vrot.slane %v7352_v30, %v443_v13  ;;  %v7431_v55 = vrot.slane %v7332_v22, %v454_v14 }
  0xa1   : > { %596 = vbcast.lane.b32.xlu0 %v594_v31, 256  ;;  %469 = vbcast.lane.b32.xlu1 %v378_v15, 265  ;;  %9388 = vst [vmem:[#allocation8_spill] sm:$0xff] %v7413_v49  ;;  %9389 = vst [vmem:[#allocation9_spill] sm:$0xff] %v7416_v50  ;;  %v7434_v56 = vrot.slane %v7334_v23, %v454_v14  ;;  %v7437_v57 = vrot.slane %v7352_v30, %v454_v14 }
  0xa2   : > { %9390 = vst [vmem:[#allocation10_spill] sm:$0xff] %v7419_v51  ;;  %9391 = vst [vmem:[#allocation11_spill] sm:$0xff] %v7422_v52  ;;  %v810_v59 = vrot.slane %v7330_v21, %v7307_v7  ;;  %v821_v1 = vrot.slane %v7330_v21, %v7348_v28  ;;  %v616_v2 = vrot.slane %v7311_v12, %v7350_v29 }
  0xa3   : > { %9392 = vst [vmem:[#allocation12_spill] sm:$0xff] %v7425_v53  ;;  %9393 = vst [vmem:[#allocation13_spill] sm:$0xff] %v7428_v54  ;;  %v1402_v3 = vrot.slane %v7332_v22, %v7307_v7  ;;  %v832_v4 = vrot.slane %v7330_v21, %v7350_v29 }
  0xa4   : > { %9394 = vst [vmem:[#allocation14_spill] sm:$0xff] %v7431_v55  ;;  %9395 = vst [vmem:[#allocation15_spill] sm:$0xff] %v7434_v56 }
  0xa5   : > { %9396 = vst [vmem:[#allocation16_spill] sm:$0xff] %v7437_v57  ;;  %681 = vbcast.lane.b32.xlu0 %v594_v31, 257  ;;  %533 = vbcast.lane.b32.xlu1 %v378_v15, 266  ;;  %v1413_v57 = vrot.slane %v7332_v22, %v7348_v28 }
  0xa9   : > { %473 = vbcast.lane.b32.xlu0 %v389_v58, 257  ;;  %600 = vbcast.lane.b32.xlu1 %v594_v31, 264 }
  0xad   : > { %745 = vbcast.lane.b32.xlu0 %v594_v31, 258  ;;  %391 = vbcast.lane.b32.xlu1 %v389_v58, 256 }
  0xb1   : > { %477 = vbcast.lane.b32.xlu0 %v389_v58, 265  ;;  %685 = vbcast.lane.b32.xlu1 %v594_v31, 265 }
  0xb5   : > { %749 = vbcast.lane.b32.xlu0 %v594_v31, 266  ;;  %395 = vbcast.lane.b32.xlu1 %v389_v58, 264 }
  0xb9   : > { %541 = vbcast.lane.b32.xlu0 %v389_v58, 266  ;;  %537 = vbcast.lane.b32.xlu1 %v389_v58, 258 }
  0xbd   : > { %816 = vbcast.lane.b32.xlu0 %v810_v59, 264  ;;  %812 = vbcast.lane.b32.xlu1 %v810_v59, 256 }
  0xc1   : > { %611 = vbcast.lane.b32.xlu0 %v605_v60, 264  ;;  %607 = vbcast.lane.b32.xlu1 %v605_v60, 256 }
  0xc5   : > { %901 = vbcast.lane.b32.xlu0 %v810_v59, 265  ;;  %897 = vbcast.lane.b32.xlu1 %v810_v59, 257 }
  0xc9   : > { %402 = vbcast.lane.b32.xlu0 %v400_v0, 256  ;;  %689 = vbcast.lane.b32.xlu1 %v605_v60, 257 }
  0xcd   : > { %693 = vbcast.lane.b32.xlu0 %v605_v60, 265  ;;  %961 = vbcast.lane.b32.xlu1 %v810_v59, 258 }
  0xd1   : > { %965 = vbcast.lane.b32.xlu0 %v810_v59, 266  ;;  %481 = vbcast.lane.b32.xlu1 %v400_v0, 257 }
  0xd5   : > { %485 = vbcast.lane.b32.xlu0 %v400_v0, 265  ;;  %753 = vbcast.lane.b32.xlu1 %v605_v60, 258 }
  0xd9   : > { %757 = vbcast.lane.b32.xlu0 %v605_v60, 266  ;;  %406 = vbcast.lane.b32.xlu1 %v400_v0, 264 }
  0xdd   : > { %549 = vbcast.lane.b32.xlu0 %v400_v0, 266  ;;  %545 = vbcast.lane.b32.xlu1 %v400_v0, 258 }
  0xe1   : > { %827 = vbcast.lane.b32.xlu0 %v821_v1, 264  ;;  %823 = vbcast.lane.b32.xlu1 %v821_v1, 256 }
  0xe5   : > { %622 = vbcast.lane.b32.xlu0 %v616_v2, 264  ;;  %618 = vbcast.lane.b32.xlu1 %v616_v2, 256 }
  0xe9   : > { %909 = vbcast.lane.b32.xlu0 %v821_v1, 265  ;;  %905 = vbcast.lane.b32.xlu1 %v821_v1, 257 }
  0xed   : > { %413 = vbcast.lane.b32.xlu0 %v7316_v16, 256  ;;  %697 = vbcast.lane.b32.xlu1 %v616_v2, 257 }
  0xf1   : > { %701 = vbcast.lane.b32.xlu0 %v616_v2, 265  ;;  %969 = vbcast.lane.b32.xlu1 %v821_v1, 258 }
  0xf5   : > { %973 = vbcast.lane.b32.xlu0 %v821_v1, 266  ;;  %489 = vbcast.lane.b32.xlu1 %v7316_v16, 257 }
  0xf9   : > { %493 = vbcast.lane.b32.xlu0 %v7316_v16, 265  ;;  %761 = vbcast.lane.b32.xlu1 %v616_v2, 258 }
  0xfd   : > { %765 = vbcast.lane.b32.xlu0 %v616_v2, 266  ;;  %417 = vbcast.lane.b32.xlu1 %v7316_v16, 264 }
 0x101   : > { %1404 = vbcast.lane.b32.xlu0 %v1402_v3, 256  ;;  %553 = vbcast.lane.b32.xlu1 %v7316_v16, 258 }
 0x105   : > { %557 = vbcast.lane.b32.xlu0 %v7316_v16, 266  ;;  %834 = vbcast.lane.b32.xlu1 %v832_v4, 256  ;;  %v7476_v16 = vrot.slane %v7334_v23, %v7307_v7 }
 0x109   : > { %838 = vbcast.lane.b32.xlu0 %v832_v4, 264  ;;  %1489 = vbcast.lane.b32.xlu1 %v1402_v3, 257 }
 0x10b   : > { %v381_v5 = vpop.permute.xlu1 %380  ;;  %v7467_v6 = vpop.permute.xlu0 %384 }
 0x10d   : > { %1408 = vbcast.lane.b32.xlu0 %v1402_v3, 264  ;;  %629 = vbcast.lane.b32.xlu1 %v7319_v17, 256 }
 0x10f   : > { %v466_v8 = vpop.permute.xlu1 %465  ;;  %v530_v9 = vpop.permute.xlu0 %529 }
 0x110   : > { %v1024_v2 = vsel %vm1023_vm6, %v381_v5, %v466_v8 }
 0x111   : > { %1553 = vbcast.lane.b32.xlu0 %v1402_v3, 258  ;;  %913 = vbcast.lane.b32.xlu1 %v832_v4, 257  ;;  %v1041_v56 = vsel %vm1040_vm7, %v1024_v2, %v530_v9 }
 0x113   : > { %v470_v10 = vpop.permute.xlu1 %469  ;;  %v597_v11 = vpop.permute.xlu0 %596 }
 0x114   : > { %v1058_v55 = vsel %vm1057_vm8, %v1041_v56, %v597_v11  ;;  %v1025_v22 = vsel %vm1023_vm6, %v7467_v6, %v470_v10 }
 0x115   : > { %705 = vbcast.lane.b32.xlu0 %v7319_v17, 257  ;;  %1493 = vbcast.lane.b32.xlu1 %v1402_v3, 265 }
 0x117   : > { %v534_v12 = vpop.permute.xlu1 %533  ;;  %v682_v13 = vpop.permute.xlu0 %681 }
 0x118   : > { %v1075_v5 = vsel %vm1074_vm9, %v1058_v55, %v682_v13 }
 0x119   : > { %977 = vbcast.lane.b32.xlu0 %v832_v4, 258  ;;  %633 = vbcast.lane.b32.xlu1 %v7319_v17, 264 }
 0x11b   : > { %v601_v14 = vpop.permute.xlu1 %600  ;;  %v7472_v15 = vpop.permute.xlu0 %473 }
 0x11d   : > { %1620 = vbcast.lane.b32.xlu0 %v7476_v16, 256  ;;  %917 = vbcast.lane.b32.xlu1 %v832_v4, 265 }
 0x11f   : > { %v7479_v21 = vpop.permute.xlu1 %391  ;;  %v746_v29 = vpop.permute.xlu0 %745 }
 0x120   : > { %v1092_v28 = vsel %vm1091_vm10, %v1075_v5, %v746_v29 }
 0x121   : > { %497 = vbcast.lane.b32.xlu0 %v7322_v18, 257  ;;  %1557 = vbcast.lane.b32.xlu1 %v1402_v3, 266 }
 0x123   : > { %v686_v31 = vpop.permute.xlu1 %685  ;;  %v7482_v58 = vpop.permute.xlu0 %477 }
 0x125   : > { %769 = vbcast.lane.b32.xlu0 %v7319_v17, 258  ;;  %424 = vbcast.lane.b32.xlu1 %v7322_v18, 256 }
 0x127   : > { %v7486_v59 = vpop.permute.xlu1 %395  ;;  %v750_v23 = vpop.permute.xlu0 %749 }
 0x129   : > { %1624 = vbcast.lane.b32.xlu0 %v7476_v16, 264  ;;  %709 = vbcast.lane.b32.xlu1 %v7319_v17, 265 }
 0x12b   : > { %v7490_v60 = vpop.permute.xlu1 %537  ;;  %v7492_v61 = vpop.permute.xlu0 %541 }
 0x12d   : > { %428 = vbcast.lane.b32.xlu0 %v7322_v18, 264  ;;  %981 = vbcast.lane.b32.xlu1 %v832_v4, 266 }
 0x12f   : > { %v813_v62 = vpop.permute.xlu1 %812  ;;  %v817_v63 = vpop.permute.xlu0 %816 }
 0x130   : > { %v1109_v56 = vsel %vm1108_vm11, %v1092_v28, %v813_v62  ;;  %v7547_v28 = vrot.slane %v7352_v30, %v7307_v7 }
 0x131   : > { %561 = vbcast.lane.b32.xlu0 %v7322_v18, 258  ;;  %1705 = vbcast.lane.b32.xlu1 %v7476_v16, 257 }
 0x133   : > { %v7497_v0 = vpop.permute.xlu1 %607  ;;  %v7499_v1 = vpop.permute.xlu0 %611 }
 0x135   : > { %845 = vbcast.lane.b32.xlu0 %v7357_v32, 256  ;;  %501 = vbcast.lane.b32.xlu1 %v7322_v18, 265 }
 0x137   : > { %v898_v3 = vpop.permute.xlu1 %897  ;;  %v902_v4 = vpop.permute.xlu0 %901 }
 0x138   : > { %v1126_v9 = vsel %vm1125_vm12, %v1109_v56, %v898_v3 }
 0x139   : > { %1497 = vbcast.lane.b32.xlu0 %v1413_v57, 257  ;;  %773 = vbcast.lane.b32.xlu1 %v7319_v17, 266  ;;  %v1042_v17 = vsel %vm1040_vm7, %v1025_v22, %v534_v12 }
 0x13a   : > { %v1059_v8 = vsel %vm1057_vm8, %v1042_v17, %v601_v14 }
 0x13b   : > { %v690_v54 = vpop.permute.xlu1 %689  ;;  %v7509_v53 = vpop.permute.xlu0 %402  ;;  %v1076_v13 = vsel %vm1074_vm9, %v1059_v8, %v686_v31 }
 0x13c   : > { %v1093_v10 = vsel %vm1091_vm10, %v1076_v13, %v750_v23 }
 0x13d   : > { %1769 = vbcast.lane.b32.xlu0 %v7476_v16, 258  ;;  %1415 = vbcast.lane.b32.xlu1 %v1413_v57, 256  ;;  %v1110_v12 = vsel %vm1108_vm11, %v1093_v10, %v817_v63 }
 0x13e   : > { %v1127_v14 = vsel %vm1125_vm12, %v1110_v12, %v902_v4 }
 0x13f   : > { %v962_v11 = vpop.permute.xlu1 %961  ;;  %v694_v55 = vpop.permute.xlu0 %693 }
 0x140   : > { %v1143_v6 = vsel %vm1142_vm13, %v1126_v9, %v962_v11  ;;  %v1026_v9 = vsel %vm1023_vm6, %v7479_v21, %v7472_v15 }
 0x141   : > { %640 = vbcast.lane.b32.xlu0 %v7325_v19, 256  ;;  %1709 = vbcast.lane.b32.xlu1 %v7476_v16, 265  ;;  %v1043_v7 = vsel %vm1040_vm7, %v1026_v9, %v7490_v60 }
 0x142   : > { %5593 = vmatprep.mubr.msk.f32.mxu0 %vm1165_vm14, %v1143_v6  ;;  %v1060_v30 = vsel %vm1057_vm8, %v1043_v7, %v7497_v0  ;;  %v1027_v6 = vsel %vm1023_vm6, %v7486_v59, %v7482_v58 }
 0x143   : > { %v7528_v29 = vpop.permute.xlu1 %481  ;;  %v966_v62 = vpop.permute.xlu0 %965  ;;  %v1077_v13 = vsel %vm1074_vm9, %v1060_v30, %v690_v54  ;;  %v1044_v21 = vsel %vm1040_vm7, %v1027_v6, %v7492_v61 }
 0x144   : > { %v1144_v2 = vsel %vm1142_vm13, %v1127_v14, %v966_v62  ;;  %v1061_v0 = vsel %vm1057_vm8, %v1044_v21, %v7499_v1 }
 0x145   : > { %921 = vbcast.lane.b32.xlu0 %v7357_v32, 257  ;;  %565 = vbcast.lane.b32.xlu1 %v7322_v18, 266  ;;  %v1078_v58 = vsel %vm1074_vm9, %v1061_v0, %v694_v55 }
 0x146   : > { %5594 = vmatmul.mubr.msk.f32.vlgmr.msra.gmra.mrb[0].mxu0 %vm1165_vm14, %v1144_v2 }
 0x147   : > { %v754_v31 = vpop.permute.xlu1 %753  ;;  %v7534_v23 = vpop.permute.xlu0 %485 }
 0x148   : > { %v1094_v15 = vsel %vm1091_vm10, %v1077_v13, %v754_v31 }
 0x149   : > { %1501 = vbcast.lane.b32.xlu0 %v1413_v57, 265  ;;  %849 = vbcast.lane.b32.xlu1 %v7357_v32, 264 }
 0x14b   : > { %v7537_v63 = vpop.permute.xlu1 %406  ;;  %v758_v3 = vpop.permute.xlu0 %757 }
 0x14c   : > { %v1095_v14 = vsel %vm1091_vm10, %v1078_v58, %v758_v3 }
 0x14d   : > { %1773 = vbcast.lane.b32.xlu0 %v7476_v16, 266  ;;  %1419 = vbcast.lane.b32.xlu1 %v1413_v57, 264 }
 0x14f   : > { %v7540_v4 = vpop.permute.xlu1 %545  ;;  %v7542_v5 = vpop.permute.xlu0 %549 }
 0x151   : > { %644 = vbcast.lane.b32.xlu0 %v7325_v19, 264  ;;  %1561 = vbcast.lane.b32.xlu1 %v1413_v57, 258 }
 0x153   : > { %v824_v18 = vpop.permute.xlu1 %823  ;;  %v828_v22 = vpop.permute.xlu0 %827 }
 0x154   : > { %v1111_v60 = vsel %vm1108_vm11, %v1094_v15, %v824_v18  ;;  %v1112_v61 = vsel %vm1108_vm11, %v1095_v14, %v828_v22 }
 0x155   : > { %925 = vbcast.lane.b32.xlu0 %v7357_v32, 265  ;;  %1836 = vbcast.lane.b32.xlu1 %v7547_v28, 256 }
 0x157   : > { %v7551_v17 = vpop.permute.xlu1 %618  ;;  %v7553_v16 = vpop.permute.xlu0 %622 }
 0x159   : > { %1565 = vbcast.lane.b32.xlu0 %v1413_v57, 266  ;;  %713 = vbcast.lane.b32.xlu1 %v7325_v19, 257 }
 0x15b   : > { %v906_v56 = vpop.permute.xlu1 %905  ;;  %v910_v8 = vpop.permute.xlu0 %909 }
 0x15c   : > { %v1128_v54 = vsel %vm1125_vm12, %v1111_v60, %v906_v56  ;;  %v1129_v1 = vsel %vm1125_vm12, %v1112_v61, %v910_v8 }
 0x15d   : > { %985 = vbcast.lane.b32.xlu1 %v7357_v32, 258  ;;  %1840 = vbcast.lane.b32.xlu0 %v7547_v28, 264 }
 0x15f   : > { %v698_v11 = vpop.permute.xlu1 %697  ;;  %v7565_v57 = vpop.permute.xlu0 %413 }
 0x161   : > { %1631 = vbcast.lane.b32.xlu1 %v7361_v33, 256  ;;  %435 = vbcast.lane.b32.xlu0 %v7328_v20, 256 }
 0x163   : > { %v970_v10 = vpop.permute.xlu1 %969  ;;  %v7580_v12 = vpop.permute.xlu0 %701 }
 0x164   : > { %v1145_v59 = vsel %vm1142_vm13, %v1128_v54, %v970_v10 }
 0x165   : > { %1921 = vbcast.lane.b32.xlu1 %v7547_v28, 257  ;;  %717 = vbcast.lane.b32.xlu0 %v7325_v19, 265 }
 0x166   : > { %5596 = vmatprep.mubr.msk.f32.mxu0 %vm1165_vm14, %v1145_v59 }
 0x167   : > { %v7590_v62 = vpop.permute.xlu1 %489  ;;  %v974_v2 = vpop.permute.xlu0 %973 }
 0x168   : > { %v1146_v31 = vsel %vm1142_vm13, %v1129_v1, %v974_v2 }
 0x169   : > { %505 = vbcast.lane.b32.xlu1 %v7328_v20, 257  ;;  %989 = vbcast.lane.b32.xlu0 %v7357_v32, 266 }
 0x16a   : > { %5597 = vmatmul.mubr.msk.f32.gmra.mrb[2].mxu0 %vm1165_vm14, %v1146_v31  ;;  %v1029_v31 = vsel %vm1023_vm6, %v7537_v63, %v7534_v23 }
 0x16b   : > { %v762_v55 = vpop.permute.xlu1 %761  ;;  %v7596_v3 = vpop.permute.xlu0 %493 }
 0x16d   : > { %777 = vbcast.lane.b32.xlu1 %v7325_v19, 258  ;;  %1713 = vbcast.lane.b32.xlu0 %v7361_v33, 257 }
 0x16f   : > { %v7600_v18 = vpop.permute.xlu1 %417  ;;  %v766_v22 = vpop.permute.xlu0 %765 }
 0x171   : > { %1635 = vbcast.lane.b32.xlu1 %v7361_v33, 264  ;;  %1985 = vbcast.lane.b32.xlu0 %v7547_v28, 258 }
 0x173   : > { %v7604_v56 = vpop.permute.xlu1 %553  ;;  %v7606_v8 = vpop.permute.xlu0 %1404 }
 0x175   : > { %1925 = vbcast.lane.b32.xlu1 %v7547_v28, 265  ;;  %509 = vbcast.lane.b32.xlu0 %v7328_v20, 265 }
 0x177   : > { %v835_v32 = vpop.permute.xlu1 %834  ;;  %v7610_v9 = vpop.permute.xlu0 %557 }
 0x179   : > { %439 = vbcast.lane.b32.xlu1 %v7328_v20, 264  ;;  %781 = vbcast.lane.b32.xlu0 %v7325_v19, 266  ;;  %v1028_v19 = vsel %vm1023_vm6, %v7509_v53, %v7528_v29 }
 0x17a   : > { %v1045_v60 = vsel %vm1040_vm7, %v1028_v19, %v7540_v4 }
 0x17b   : > { %v7614_v7 = vpop.permute.xlu1 %1489  ;;  %v839_v30 = vpop.permute.xlu0 %838  ;;  %v1062_v0 = vsel %vm1057_vm8, %v1045_v60, %v7551_v17 }
 0x17c   : > { %v1079_v58 = vsel %vm1074_vm9, %v1062_v0, %v698_v11 }
 0x17d   : > { %569 = vbcast.lane.b32.xlu1 %v7328_v20, 258  ;;  %1426 = vbcast.lane.b32.xlu0 %v7365_v34, 256  ;;  %v1096_v59 = vsel %vm1091_vm10, %v1079_v58, %v762_v55  ;;  %v1046_v55 = vsel %vm1040_vm7, %v1029_v31, %v7542_v5 }
 0x17e   : > { %v1113_v53 = vsel %vm1108_vm11, %v1096_v59, %v835_v32  ;;  %v1063_v32 = vsel %vm1057_vm8, %v1046_v55, %v7553_v16 }
 0x17f   : > { %v7618_v13 = vpop.permute.xlu1 %629  ;;  %v7620_v6 = vpop.permute.xlu0 %1408  ;;  %v1080_v19 = vsel %vm1074_vm9, %v1063_v32, %v7580_v12 }
 0x180   : > { %v1097_v60 = vsel %vm1091_vm10, %v1080_v19, %v766_v22 }
 0x181   : > { %856 = vbcast.lane.b32.xlu1 %v7368_v35, 256  ;;  %1717 = vbcast.lane.b32.xlu0 %v7361_v33, 265  ;;  %v1114_v23 = vsel %vm1108_vm11, %v1097_v60, %v839_v30 }
 0x183   : > { %v914_v15 = vpop.permute.xlu1 %913  ;;  %v7624_v21 = vpop.permute.xlu0 %1553 }
 0x184   : > { %v1130_v29 = vsel %vm1125_vm12, %v1113_v53, %v914_v15 }
 0x185   : > { %1505 = vbcast.lane.b32.xlu1 %v7365_v34, 257  ;;  %1989 = vbcast.lane.b32.xlu0 %v7547_v28, 266 }
 0x187   : > { %v7635_v54 = vpop.permute.xlu1 %1493  ;;  %v7637_v10 = vpop.permute.xlu0 %705 }
 0x189   : > { %1777 = vbcast.lane.b32.xlu1 %v7361_v33, 258  ;;  %651 = vbcast.lane.b32.xlu0 %v7337_v24, 256 }
 0x18b   : > { %v7645_v4 = vpop.permute.xlu1 %633  ;;  %v978_v28 = vpop.permute.xlu0 %977 }
 0x18c   : > { %v1147_v17 = vsel %vm1142_vm13, %v1130_v29, %v978_v28 }
 0x18d   : > { %573 = vbcast.lane.b32.xlu1 %v7328_v20, 266  ;;  %929 = vbcast.lane.b32.xlu0 %v7368_v35, 257 }
 0x18e   : > { %5599 = vmatprep.mubr.msk.f32.mxu0 %vm1165_vm14, %v1147_v17 }
 0x18f   : > { %v918_v11 = vpop.permute.xlu1 %917  ;;  %v7651_v14 = vpop.permute.xlu0 %1620 }
 0x190   : > { %v1131_v63 = vsel %vm1125_vm12, %v1114_v23, %v918_v11 }
 0x191   : > { %860 = vbcast.lane.b32.xlu1 %v7368_v35, 264  ;;  %1509 = vbcast.lane.b32.xlu0 %v7365_v34, 265 }
 0x193   : > { %v7655_v61 = vpop.permute.xlu1 %1557  ;;  %v7657_v1 = vpop.permute.xlu0 %497 }
 0x195   : > { %1430 = vbcast.lane.b32.xlu1 %v7365_v34, 264  ;;  %1781 = vbcast.lane.b32.xlu0 %v7361_v33, 266 }
 0x197   : > { %v7661_v20 = vpop.permute.xlu1 %424  ;;  %v7663_v2 = vpop.permute.xlu0 %769 }
 0x199   : > { %1569 = vbcast.lane.b32.xlu1 %v7365_v34, 258  ;;  %655 = vbcast.lane.b32.xlu0 %v7337_v24, 264 }
 0x19b   : > { %v7674_v15 = vpop.permute.xlu1 %709  ;;  %v7676_v33 = vpop.permute.xlu0 %1624 }
 0x19d   : > { %1847 = vbcast.lane.b32.xlu1 %v7372_v36, 256  ;;  %933 = vbcast.lane.b32.xlu0 %v7368_v35, 265 }
 0x19f   : > { %v982_v5 = vpop.permute.xlu1 %981  ;;  %v7685_v0 = vpop.permute.xlu0 %428 }
 0x1a0   : > { %v1148_v16 = vsel %vm1142_vm13, %v1131_v63, %v982_v5 }
 0x1a1   : > { %721 = vbcast.lane.b32.xlu1 %v7337_v24, 257  ;;  %1573 = vbcast.lane.b32.xlu0 %v7365_v34, 266 }
 0x1a2   : > { %5600 = vmatmul.mubr.msk.f32.gmra.mrb[4].mxu0 %vm1165_vm14, %v1148_v16  ;;  %v1030_v16 = vsel %vm1023_vm6, %v7565_v57, %v7590_v62 }
 0x1a3   : > { %v7691_v12 = vpop.permute.xlu1 %1705  ;;  %v7693_v22 = vpop.permute.xlu0 %561 }
 0x1a5   : > { %993 = vbcast.lane.b32.xlu1 %v7368_v35, 258  ;;  %1851 = vbcast.lane.b32.xlu0 %v7372_v36, 264 }
 0x1a7   : > { %v7697_v30 = vpop.permute.xlu1 %501  ;;  %v846_v58 = vpop.permute.xlu0 %845 }
 0x1a9   : > { %1642 = vbcast.lane.b32.xlu1 %v7376_v37, 256  ;;  %446 = vbcast.lane.b32.xlu0 %v7340_v25, 256 }
 0x1ab   : > { %v774_v59 = vpop.permute.xlu1 %773  ;;  %v7701_v53 = vpop.permute.xlu0 %1497 }
 0x1ad   : > { %1929 = vbcast.lane.b32.xlu1 %v7372_v36, 257  ;;  %725 = vbcast.lane.b32.xlu0 %v7337_v24, 265 }
 0x1af   : > { %v7705_v34 = vpop.permute.xlu1 %1415  ;;  %v7707_v29 = vpop.permute.xlu0 %1769 }
 0x1b1   : > { %513 = vbcast.lane.b32.xlu1 %v7340_v25, 257  ;;  %997 = vbcast.lane.b32.xlu0 %v7368_v35, 266 }
 0x1b3   : > { %v7711_v28 = vpop.permute.xlu1 %1709  ;;  %v7713_v17 = vpop.permute.xlu0 %640 }
 0x1b5   : > { %785 = vbcast.lane.b32.xlu1 %v7337_v24, 258  ;;  %1721 = vbcast.lane.b32.xlu0 %v7376_v37, 257 }
 0x1b7   : > { %v7717_v11 = vpop.permute.xlu1 %565  ;;  %v922_v31 = vpop.permute.xlu0 %921 }
 0x1b9   : > { %1646 = vbcast.lane.b32.xlu1 %v7376_v37, 264  ;;  %1993 = vbcast.lane.b32.xlu0 %v7372_v36, 258 }
 0x1bb   : > { %v850_v55 = vpop.permute.xlu1 %849  ;;  %v7721_v32 = vpop.permute.xlu0 %1501 }
 0x1bd   : > { %1933 = vbcast.lane.b32.xlu1 %v7372_v36, 265  ;;  %517 = vbcast.lane.b32.xlu0 %v7340_v25, 265 }
 0x1bf   : > { %v7725_v35 = vpop.permute.xlu1 %1419  ;;  %v7727_v19 = vpop.permute.xlu0 %1773 }
 0x1c1   : > { %450 = vbcast.lane.b32.xlu1 %v7340_v25, 264  ;;  %789 = vbcast.lane.b32.xlu0 %v7337_v24, 266  ;;  %v1047_v24 = vsel %vm1040_vm7, %v1030_v16, %v7604_v56 }
 0x1c2   : > { %v1064_v52 = vsel %vm1057_vm8, %v1047_v24, %v7618_v13 }
 0x1c3   : > { %v7731_v60 = vpop.permute.xlu1 %1561  ;;  %v7733_v23 = vpop.permute.xlu0 %644  ;;  %v1081_v49 = vsel %vm1074_vm9, %v1064_v52, %v7637_v10 }
 0x1c4   : > { %v1098_v57 = vsel %vm1091_vm10, %v1081_v49, %v7663_v2 }
 0x1c5   : > { %577 = vbcast.lane.b32.xlu1 %v7340_v25, 258  ;;  %1437 = vbcast.lane.b32.xlu0 %v7379_v38, 256  ;;  %v1115_v62 = vsel %vm1108_vm11, %v1098_v57, %v846_v58 }
 0x1c6   : > { %v1132_v56 = vsel %vm1125_vm12, %v1115_v62, %v922_v31 }
 0x1c7   : > { %v1837_v63 = vpop.permute.xlu1 %1836  ;;  %v926_v5 = vpop.permute.xlu0 %925 }
 0x1c9   : > { %867 = vbcast.lane.b32.xlu1 %v7382_v39, 256  ;;  %1725 = vbcast.lane.b32.xlu0 %v7376_v37, 265 }
 0x1cb   : > { %v7746_v51 = vpop.permute.xlu1 %713  ;;  %v7748_v50 = vpop.permute.xlu0 %1565 }
 0x1cd   : > { %1513 = vbcast.lane.b32.xlu1 %v7379_v38, 257  ;;  %1997 = vbcast.lane.b32.xlu0 %v7372_v36, 266  ;;  %v1031_v36 = vsel %vm1023_vm6, %v7600_v18, %v7596_v3 }
 0x1ce   : > { %v1048_v10 = vsel %vm1040_vm7, %v1031_v36, %v7610_v9 }
 0x1cf   : > { %v986_v16 = vpop.permute.xlu1 %985  ;;  %v7758_v13 = vpop.permute.xlu0 %1840  ;;  %v1065_v2 = vsel %vm1057_vm8, %v1048_v10, %v7645_v4 }
 0x1d0   : > { %v1149_v24 = vsel %vm1142_vm13, %v1132_v56, %v986_v16  ;;  %v1082_v57 = vsel %vm1074_vm9, %v1065_v2, %v7674_v15  ;;  %v2047_v56 = vsel %vm1023_vm6, %v7606_v8, %v7614_v7 }
 0x1d1   : > { %1785 = vbcast.lane.b32.xlu1 %v7376_v37, 258  ;;  %662 = vbcast.lane.b32.xlu0 %v7343_v26, 256  ;;  %v1099_v62 = vsel %vm1091_vm10, %v1082_v57, %v774_v59  ;;  %v2063_v15 = vsel %vm1040_vm7, %v2047_v56, %v7624_v21 }
 0x1d2   : > { %5602 = vmatprep.mubr.msk.f32.mxu0 %vm1165_vm14, %v1149_v24  ;;  %v2079_v59 = vsel %vm1057_vm8, %v2063_v15, %v7651_v14 }
 0x1d3   : > { %v7764_v49 = vpop.permute.xlu1 %1631  ;;  %v7766_v52 = vpop.permute.xlu0 %435  ;;  %v2095_v16 = vsel %vm1074_vm9, %v2079_v59, %v7691_v12 }
 0x1d4   : > { %v2111_v8 = vsel %vm1091_vm10, %v2095_v16, %v7707_v29 }
 0x1d5   : > { %581 = vbcast.lane.b32.xlu1 %v7340_v25, 266  ;;  %937 = vbcast.lane.b32.xlu0 %v7382_v39, 257  ;;  %v1116_v25 = vsel %vm1108_vm11, %v1099_v62, %v850_v55 }
 0x1d6   : > { %v1133_v3 = vsel %vm1125_vm12, %v1116_v25, %v926_v5 }
 0x1d7   : > { %v1922_v58 = vpop.permute.xlu1 %1921  ;;  %v7777_v31 = vpop.permute.xlu0 %717 }
 0x1d9   : > { %871 = vbcast.lane.b32.xlu1 %v7382_v39, 264  ;;  %1517 = vbcast.lane.b32.xlu0 %v7379_v38, 265 }
 0x1db   : > { %v7786_v18 = vpop.permute.xlu1 %505  ;;  %v990_v9 = vpop.permute.xlu0 %989 }
 0x1dc   : > { %v1150_v4 = vsel %vm1142_vm13, %v1133_v3, %v990_v9 }
 0x1dd   : > { %1441 = vbcast.lane.b32.xlu1 %v7379_v38, 264  ;;  %1789 = vbcast.lane.b32.xlu0 %v7376_v37, 266  ;;  %v2127_v37 = vsel %vm1108_vm11, %v2111_v8, %v1837_v63 }
 0x1de   : > { %5603 = vmatmul.mubr.msk.f32.gmra.mrb[6].mxu0 %vm1165_vm14, %v1150_v4  ;;  %v2143_v7 = vsel %vm1125_vm12, %v2127_v37, %v1922_v58  ;;  %v2048_v58 = vsel %vm1023_vm6, %v7620_v6, %v7635_v54 }
 0x1df   : > { %v7799_v55 = vpop.permute.xlu1 %777  ;;  %v7801_v5 = vpop.permute.xlu0 %1713 }
 0x1e1   : > { %1577 = vbcast.lane.b32.xlu1 %v7379_v38, 258  ;;  %666 = vbcast.lane.b32.xlu0 %v7343_v26, 264 }
 0x1e3   : > { %v7811_v21 = vpop.permute.xlu1 %1635  ;;  %v1986_v14 = vpop.permute.xlu0 %1985 }
 0x1e4   : > { %v2159_v24 = vsel %vm1142_vm13, %v2143_v7, %v1986_v14 }
 0x1e5   : > { %1858 = vbcast.lane.b32.xlu1 %v7386_v40, 256  ;;  %941 = vbcast.lane.b32.xlu0 %v7382_v39, 265 }
 0x1e6   : > { %5621 = vmatprep.mubr.msk.f32.mxu1 %vm1165_vm14, %v2159_v24  ;;  %v1032_v24 = vsel %vm1023_vm6, %v7661_v20, %v7657_v1 }
 0x1e7   : > { %v1926_v12 = vpop.permute.xlu1 %1925  ;;  %v7817_v29 = vpop.permute.xlu0 %509 }
 0x1e9   : > { %729 = vbcast.lane.b32.xlu1 %v7343_v26, 257  ;;  %1581 = vbcast.lane.b32.xlu0 %v7379_v38, 266  ;;  %v2064_v38 = vsel %vm1040_vm7, %v2048_v58, %v7655_v61 }
 0x1ea   : > { %v2080_v57 = vsel %vm1057_vm8, %v2064_v38, %v7676_v33 }
 0x1eb   : > { %v7821_v63 = vpop.permute.xlu1 %439  ;;  %v7823_v36 = vpop.permute.xlu0 %781  ;;  %v2096_v3 = vsel %vm1074_vm9, %v2080_v57, %v7711_v28 }
 0x1ec   : > { %v2112_v9 = vsel %vm1091_vm10, %v2096_v3, %v7727_v19 }
 0x1ed   : > { %1001 = vbcast.lane.b32.xlu1 %v7382_v39, 258  ;;  %1862 = vbcast.lane.b32.xlu0 %v7386_v40, 264  ;;  %v2128_v6 = vsel %vm1108_vm11, %v2112_v9, %v7758_v13  ;;  %v7909_v9 = vld [vmem:[%s9371_s2] ss:$0 sm:$0xff] }
 0x1ee   : > { %v2144_v54 = vsel %vm1125_vm12, %v2128_v6, %v1926_v12 }
 0x1ef   : > { %v7827_v10 = vpop.permute.xlu1 %569  ;;  %v7829_v2 = vpop.permute.xlu0 %1426 }
 0x1f1   : > { %1653 = vbcast.lane.b32.xlu1 %v7389_v41, 256  ;;  %457 = vbcast.lane.b32.xlu0 %v7346_v27, 256 }
 0x1f3   : > { %v857_v62 = vpop.permute.xlu1 %856  ;;  %v7840_v25 = vpop.permute.xlu0 %1717 }
 0x1f5   : > { %1937 = vbcast.lane.b32.xlu1 %v7386_v40, 257  ;;  %733 = vbcast.lane.b32.xlu0 %v7343_v26, 265 }
 0x1f7   : > { %v7851_v61 = vpop.permute.xlu1 %1505  ;;  %v1990_v33 = vpop.permute.xlu0 %1989 }
 0x1f8   : > { %v2160_v4 = vsel %vm1142_vm13, %v2144_v54, %v1990_v33 }
 0x1f9   : > { %521 = vbcast.lane.b32.xlu1 %v7346_v27, 257  ;;  %1005 = vbcast.lane.b32.xlu0 %v7382_v39, 266 }
 0x1fa   : > { %5622 = vmatmul.mubr.msk.f32.vlgmr.msra.gmra.mrb[0].mxu1 %vm1165_vm14, %v2160_v4 }
 0x1fb   : > { %v7857_v28 = vpop.permute.xlu1 %1777  ;;  %v7859_v19 = vpop.permute.xlu0 %651 }
 0x1fd   : > { %793 = vbcast.lane.b32.xlu1 %v7343_v26, 258  ;;  %1729 = vbcast.lane.b32.xlu0 %v7389_v41, 257 }
 0x1ff   : > { %v7863_v13 = vpop.permute.xlu1 %573  ;;  %v930_v56 = vpop.permute.xlu0 %929 }
 0x201   : > { %1657 = vbcast.lane.b32.xlu1 %v7389_v41, 264  ;;  %2001 = vbcast.lane.b32.xlu0 %v7386_v40, 258 }
 0x203   : > { %v861_v15 = vpop.permute.xlu1 %860  ;;  %v7867_v59 = vpop.permute.xlu0 %1509 }
 0x205   : > { %1941 = vbcast.lane.b32.xlu1 %v7386_v40, 265  ;;  %525 = vbcast.lane.b32.xlu0 %v7346_v27, 265 }
 0x207   : > { %v7871_v39 = vpop.permute.xlu1 %1430  ;;  %v7873_v16 = vpop.permute.xlu0 %1781 }
 0x209   : > { %461 = vbcast.lane.b32.xlu1 %v7346_v27, 264  ;;  %797 = vbcast.lane.b32.xlu0 %v7343_v26, 266  ;;  %v1049_v26 = vsel %vm1040_vm7, %v1032_v24, %v7693_v22 }
 0x20a   : > { %v1066_v12 = vsel %vm1057_vm8, %v1049_v26, %v7713_v17 }
 0x20b   : > { %v7877_v8 = vpop.permute.xlu1 %1569  ;;  %v7879_v37 = vpop.permute.xlu0 %655  ;;  %v1083_v57 = vsel %vm1074_vm9, %v1066_v12, %v7746_v51 }
 0x20c   : > { %v1100_v1 = vsel %vm1091_vm10, %v1083_v57, %v7799_v55 }
 0x20d   : > { %585 = vbcast.lane.b32.xlu1 %v7346_v27, 258  ;;  %1448 = vbcast.lane.b32.xlu0 %v7392_v42, 256  ;;  %v1117_v20 = vsel %vm1108_vm11, %v1100_v1, %v857_v62 }
 0x20e   : > { %v1134_v22 = vsel %vm1125_vm12, %v1117_v20, %v930_v56  ;;  %v1033_v56 = vsel %vm1023_vm6, %v7685_v0, %v7697_v30 }
 0x20f   : > { %v1848_v7 = vpop.permute.xlu1 %1847  ;;  %v934_v14 = vpop.permute.xlu0 %933  ;;  %v1050_v26 = vsel %vm1040_vm7, %v1033_v56, %v7717_v11 }
 0x210   : > { %v1067_v12 = vsel %vm1057_vm8, %v1050_v26, %v7733_v23 }
 0x211   : > { %878 = vbcast.lane.b32.xlu1 %v7395_v43, 256  ;;  %1733 = vbcast.lane.b32.xlu0 %v7389_v41, 265  ;;  %v1084_v20 = vsel %vm1074_vm9, %v1067_v12, %v7777_v31  ;;  %v2049_v31 = vsel %vm1023_vm6, %v7705_v34, %v7701_v53 }
 0x212   : > { %v1101_v0 = vsel %vm1091_vm10, %v1084_v20, %v7823_v36  ;;  %v2065_v36 = vsel %vm1040_vm7, %v2049_v31, %v7731_v60 }
 0x213   : > { %v7892_v58 = vpop.permute.xlu1 %721  ;;  %v7894_v38 = vpop.permute.xlu0 %1573 }
 0x215   : > { %1521 = vbcast.lane.b32.xlu1 %v7392_v42, 257  ;;  %2005 = vbcast.lane.b32.xlu0 %v7386_v40, 266 }
 0x217   : > { %v994_v3 = vpop.permute.xlu1 %993  ;;  %v7904_v17 = vpop.permute.xlu0 %1851 }
 0x218   : > { %v1151_v51 = vsel %vm1142_vm13, %v1134_v22, %v994_v3 }
 0x219   : > { %v5595_v6 = vpop.f32.mrb[0].mxu0  ;;  %1793 = vbcast.lane.b32.xlu1 %v7389_v41, 258  ;;  %673 = vbcast.lane.b32.xlu0 %v7398_v44, 256 }
 0x21a   : > { %v1290_v40 = vadd.f32 %v5595_v6, %v7909_v9  ;;  %v1284_v55 = vpop.f32.mrb[1].mxu0  ;;  %5605 = vmatprep.mubr.msk.f32.mxu0 %vm1165_vm14, %v1151_v51 }
 0x21b   : > { %v1285_v62 = vadd.f32 %v7909_v9, %v1284_v55  ;;  %v7917_v54 = vpop.permute.xlu1 %1642  ;;  %v7919_v33 = vpop.permute.xlu0 %446 }
 0x21c   : > { %v1364_v4 = vmax.f32 %v1290_v40, 0.0 }
 0x21d   : > { %v1363_v24 = vmax.f32 %v1285_v62, 0.0  ;;  %589 = vbcast.lane.b32.xlu1 %v7346_v27, 266  ;;  %945 = vbcast.lane.b32.xlu0 %v7395_v43, 257  ;;  %v1118_v27 = vsel %vm1108_vm11, %v1101_v0, %v861_v15  ;;  %v2081_v15 = vsel %vm1057_vm8, %v2065_v36, %v7764_v49 }
 0x21e   : > { %1381 = vst [vmem:[#allocation3 + $0x21] sm:$0xff] %v1364_v4  ;;  %v1135_v30 = vsel %vm1125_vm12, %v1118_v27, %v934_v14  ;;  %v2097_v51 = vsel %vm1074_vm9, %v2081_v15, %v7801_v5  ;;  %v2050_v4 = vsel %vm1023_vm6, %v7725_v35, %v7721_v32 }
 0x21f   : > { %1380 = vst [vmem:[#allocation3 + $0x19] sm:$0xff] %v1363_v24  ;;  %v1930_v57 = vpop.permute.xlu1 %1929  ;;  %v7930_v1 = vpop.permute.xlu0 %725  ;;  %v2113_v53 = vsel %vm1091_vm10, %v2097_v51, %v7857_v28 }
 0x221   : > { %882 = vbcast.lane.b32.xlu1 %v7395_v43, 264  ;;  %1525 = vbcast.lane.b32.xlu0 %v7392_v42, 265 }
 0x223   : > { %v7940_v11 = vpop.permute.xlu1 %513  ;;  %v998_v23 = vpop.permute.xlu0 %997 }
 0x224   : > { %v1152_v22 = vsel %vm1142_vm13, %v1135_v30, %v998_v23 }
 0x225   : > { %1452 = vbcast.lane.b32.xlu1 %v7392_v42, 264  ;;  %1797 = vbcast.lane.b32.xlu0 %v7389_v41, 266  ;;  %v2129_v41 = vsel %vm1108_vm11, %v2113_v53, %v1848_v7 }
 0x226   : > { %5606 = vmatmul.mubr.msk.f32.gmra.mrb[8].mxu0 %vm1165_vm14, %v1152_v22  ;;  %v2145_v34 = vsel %vm1125_vm12, %v2129_v41, %v1930_v57  ;;  %v4910_v41 = vld [vmem:[%s9372_s3 + $0x80] sm:$0xff] }
 0x227   : > { %v7953_v14 = vpop.permute.xlu1 %785  ;;  %v7955_v3 = vpop.permute.xlu0 %1721 }
 0x229   : > { %1585 = vbcast.lane.b32.xlu1 %v7392_v42, 258  ;;  %677 = vbcast.lane.b32.xlu0 %v7398_v44, 264 }
 0x22b   : > { %v7965_v60 = vpop.permute.xlu1 %1646  ;;  %v1994_v49 = vpop.permute.xlu0 %1993 }
 0x22c   : > { %v2161_v6 = vsel %vm1142_vm13, %v2145_v34, %v1994_v49  ;;  %v4911_v34 = vld [vmem:[%s9372_s3 + $0x88] sm:$0xff] }
 0x22d   : > { %1869 = vbcast.lane.b32.xlu1 %v7401_v45, 256  ;;  %949 = vbcast.lane.b32.xlu0 %v7395_v43, 265 }
 0x22e   : > { %5624 = vmatprep.mubr.msk.f32.mxu1 %vm1165_vm14, %v2161_v6  ;;  %v6368_v6 = vpack.c.bf16 %v4911_v34, %v4910_v41 }
 0x22f   : > { %v1934_v5 = vpop.permute.xlu1 %1933  ;;  %v7971_v28 = vpop.permute.xlu0 %517 }
 0x230   : > { %6369 = vmatprep.subr.bf16.mxu0 %v6368_v6 }
 0x231   : > { %737 = vbcast.lane.b32.xlu1 %v7398_v44, 257  ;;  %1589 = vbcast.lane.b32.xlu0 %v7392_v42, 266  ;;  %v2066_v42 = vsel %vm1040_vm7, %v2050_v4, %v7748_v50  ;;  %v4913_v4 = vld [vmem:[%s9372_s3 + $0x98] sm:$0xff] }
 0x232   : > { %v2082_v56 = vsel %vm1057_vm8, %v2066_v42, %v7811_v21  ;;  %6371 = vmatpush3.bf16.msra.mxu0 %v6368_v6 }
 0x233   : > { %v7975_v7 = vpop.permute.xlu1 %450  ;;  %v7977_v40 = vpop.permute.xlu0 %789  ;;  %v2098_v12 = vsel %vm1074_vm9, %v2082_v56, %v7840_v25  ;;  %v4914_v56 = vld [vmem:[%s9372_s3 + $0xa0] sm:$0xff] }
 0x234   : > { %v2114_v32 = vsel %vm1091_vm10, %v2098_v12, %v7873_v16  ;;  %v4915_v12 = vld [vmem:[%s9372_s3 + $0xa8] sm:$0xff] }
 0x235   : > { %1009 = vbcast.lane.b32.xlu1 %v7395_v43, 258  ;;  %1873 = vbcast.lane.b32.xlu0 %v7401_v45, 264  ;;  %v2130_v50 = vsel %vm1108_vm11, %v2114_v32, %v7904_v17 }
 0x236   : > { %v2146_v20 = vsel %vm1125_vm12, %v2130_v50, %v1934_v5  ;;  %v4912_v5 = vld [vmem:[%s9372_s3 + $0x90] sm:$0xff]  ;;  %v6376_v50 = vpack.c.bf16 %v4915_v12, %v4914_v56  ;;  %v1035_v12 = vsel %vm1023_vm6, %v7821_v63, %v7817_v29 }
 0x237   : > { %v7981_v55 = vpop.permute.xlu1 %577  ;;  %v7983_v62 = vpop.permute.xlu0 %1437  ;;  %v6372_v42 = vpack.c.bf16 %v4913_v4, %v4912_v5  ;;  %v9397_v5 = vld [vmem:[#allocation8_spill] sm:$0xff]  ;;  %v4920_v4 = vld [vmem:[%s9372_s3 + $0xd0] sm:$0xff] }
 0x239   : > { %1664 = vbcast.lane.b32.xlu1 %v7404_v46, 256  ;;  %741 = vbcast.lane.b32.xlu0 %v7398_v44, 265 }
 0x23a   : > { %6373 = vmatprep.subr.bf16.mxu0 %v6372_v42 }
 0x23b   : > { %v7994_v24 = vpop.permute.xlu1 %867  ;;  %v7996_v26 = vpop.permute.xlu0 %1725  ;;  %6375 = vmatpush3.bf16.msra.mxu0 %v6372_v42 }
 0x23c   : > { %6377 = vmatprep.subr.bf16.mxu0 %v6376_v50 }
 0x23d   : > { %v5598_v35 = vpop.f32.mrb[2].mxu0  ;;  %1945 = vbcast.lane.b32.xlu1 %v7401_v45, 257  ;;  %1013 = vbcast.lane.b32.xlu0 %v7395_v43, 266 }
 0x23e   : > { %v1300_v21 = vadd.f32 %v5598_v35, %v7909_v9  ;;  %v1294_v57 = vpop.f32.mrb[3].mxu0 }
 0x23f   : > { %v1295_v0 = vadd.f32 %v7909_v9, %v1294_v57  ;;  %v8009_v27 = vpop.permute.xlu1 %1513  ;;  %v1998_v25 = vpop.permute.xlu0 %1997  ;;  %v4916_v57 = vld [vmem:[%s9372_s3 + $0xb0] sm:$0xff]  ;;  %6379 = vmatpush3.bf16.msra.mxu0 %v6376_v50  ;;  %v4922_v50 = vld [vmem:[%s9372_s3 + $0xe0] sm:$0xff] }
 0x240   : > { %v1366_v30 = vmax.f32 %v1300_v21, 0.0  ;;  %v2162_v16 = vsel %vm1142_vm13, %v2146_v20, %v1998_v25  ;;  %v1034_v21 = vsel %vm1023_vm6, %v7766_v52, %v7786_v18  ;;  %v4917_v20 = vld [vmem:[%s9372_s3 + $0xb8] sm:$0xff] }
 0x241   : > { %v1365_v23 = vmax.f32 %v1295_v0, 0.0  ;;  %801 = vbcast.lane.b32.xlu1 %v7398_v44, 258  ;;  %1737 = vbcast.lane.b32.xlu0 %v7404_v46, 257  ;;  %v1051_v0 = vsel %vm1040_vm7, %v1034_v21, %v7827_v10  ;;  %v6380_v18 = vpack.c.bf16 %v4917_v20, %v4916_v57  ;;  %v4918_v10 = vld [vmem:[%s9372_s3 + $0xc0] sm:$0xff]  ;;  %v4923_v21 = vld [vmem:[%s9372_s3 + $0xe8] sm:$0xff]  ;;  %v1052_v57 = vsel %vm1040_vm7, %v1035_v12, %v7863_v13  ;;  %v4924_v13 = vld [vmem:[%s9372_s3 + $0xf0] sm:$0xff] }
 0x242   : > { %1383 = vst [vmem:[#allocation3 + $0x39] sm:$0xff] %v1366_v30  ;;  %5625 = vmatmul.mubr.msk.f32.gmra.mrb[2].mxu1 %vm1165_vm14, %v2162_v16  ;;  %v1068_v25 = vsel %vm1057_vm8, %v1051_v0, %v7859_v19  ;;  %v4919_v19 = vld [vmem:[%s9372_s3 + $0xc8] sm:$0xff]  ;;  %v1069_v20 = vsel %vm1057_vm8, %v1052_v57, %v7879_v37  ;;  %v6392_v63 = vpack.c.bf16 %v4923_v21, %v4922_v50  ;;  %v4925_v37 = vld [vmem:[%s9372_s3 + $0xf8] sm:$0xff] }
 0x243   : > { %1382 = vst [vmem:[#allocation3 + $0x31] sm:$0xff] %v1365_v23  ;;  %v8015_v43 = vpop.permute.xlu1 %1785  ;;  %v8017_v17 = vpop.permute.xlu0 %662  ;;  %6381 = vmatprep.subr.bf16.mxu0 %v6380_v18  ;;  %v6384_v6 = vpack.c.bf16 %v4919_v19, %v4918_v10  ;;  %v6396_v19 = vpack.c.bf16 %v4925_v37, %v4924_v13 }
 0x244   : > { %6383 = vmatpush3.bf16.msra.mxu0 %v6380_v18 }
 0x245   : > { %1668 = vbcast.lane.b32.xlu1 %v7404_v46, 264  ;;  %2009 = vbcast.lane.b32.xlu0 %v7401_v45, 258 }
 0x246   : > { %6385 = vmatprep.subr.bf16.mxu0 %v6384_v6 }
 0x247   : > { %v8021_v22 = vpop.permute.xlu1 %581  ;;  %v938_v31 = vpop.permute.xlu0 %937 }
 0x248   : > { %6387 = vmatpush3.bf16.msra.mxu0 %v6384_v6 }
 0x249   : > { %1949 = vbcast.lane.b32.xlu1 %v7401_v45, 265  ;;  %889 = vbcast.lane.b32.xlu0 %v7407_v47, 256 }
 0x24b   : > { %v8025_v36 = vpop.permute.xlu1 %871  ;;  %v8027_v15 = vpop.permute.xlu0 %1517 }
 0x24d   : > { %805 = vbcast.lane.b32.xlu1 %v7398_v44, 266  ;;  %1529 = vbcast.lane.b32.xlu0 %v7410_v48, 257 }
 0x24f   : > { %v8031_v51 = vpop.permute.xlu1 %1441  ;;  %v8033_v53 = vpop.permute.xlu0 %1789 }
 0x251   : > { %1459 = vbcast.lane.b32.xlu1 %v7410_v48, 256  ;;  %1801 = vbcast.lane.b32.xlu0 %v7404_v46, 258 }
 0x253   : > { %v8043_v49 = vpop.permute.xlu1 %1577  ;;  %v8045_v44 = vpop.permute.xlu0 %666 }
 0x255   : > { %1741 = vbcast.lane.b32.xlu1 %v7404_v46, 265  ;;  %893 = vbcast.lane.b32.xlu0 %v7407_v47, 264 }
 0x257   : > { %v8061_v32 = vpop.permute.xlu1 %1858  ;;  %v942_v35 = vpop.permute.xlu0 %941 }
 0x259   : > { %2013 = vbcast.lane.b32.xlu1 %v7401_v45, 266  ;;  %1463 = vbcast.lane.b32.xlu0 %v7410_v48, 264  ;;  %v1085_v45 = vsel %vm1074_vm9, %v1068_v25, %v7892_v58 }
 0x25a   : > { %v1102_v16 = vsel %vm1091_vm10, %v1085_v45, %v7953_v14  ;;  %v9398_v45 = vld [vmem:[#allocation9_spill] sm:$0xff] }
 0x25b   : > { %v8078_v30 = vpop.permute.xlu1 %729  ;;  %v8080_v52 = vpop.permute.xlu0 %1581  ;;  %v1119_v58 = vsel %vm1108_vm11, %v1102_v16, %v7994_v24  ;;  %v4921_v24 = vld [vmem:[%s9372_s3 + $0xd8] sm:$0xff] }
 0x25c   : > { %v1136_v23 = vsel %vm1125_vm12, %v1119_v58, %v938_v31  ;;  %v6388_v56 = vpack.c.bf16 %v4921_v24, %v4920_v4  ;;  %v2051_v58 = vsel %vm1023_vm6, %v7829_v2, %v7851_v61 }
 0x25d   : > { %953 = vbcast.lane.b32.xlu1 %v7407_v47, 257  ;;  %1593 = vbcast.lane.b32.xlu0 %v7410_v48, 258 }
 0x25e   : > { %6389 = vmatprep.subr.bf16.mxu0 %v6388_v56 }
 0x25f   : > { %v1002_v41 = vpop.permute.xlu1 %1001  ;;  %v8097_v34 = vpop.permute.xlu0 %1862  ;;  %6391 = vmatpush3.bf16.msra.mxu0 %v6388_v56 }
 0x260   : > { %v1153_v14 = vsel %vm1142_vm13, %v1136_v23, %v1002_v41  ;;  %6393 = vmatprep.subr.bf16.mxu0 %v6392_v63 }
 0x261   : > { %1533 = vbcast.lane.b32.xlu1 %v7410_v48, 265  ;;  %1880 = vbcast.lane.b32.xlu0 %v9397_v5, 256 }
 0x262   : > { %5608 = vmatprep.mubr.msk.f32.mxu0 %vm1165_vm14, %v1153_v14 }
 0x263   : > { %v8109_v31 = vpop.permute.xlu1 %1653  ;;  %v8111_v42 = vpop.permute.xlu0 %457  ;;  %6395 = vmatpush3.bf16.msra.mxu0 %v6392_v63 }
 0x264   : > { %6397 = vmatprep.subr.bf16.mxu0 %v6396_v19 }
 0x265   : > { %1805 = vbcast.lane.b32.xlu1 %v7404_v46, 266  ;;  %1017 = vbcast.lane.b32.xlu0 %v7407_v47, 258  ;;  %v1086_v46 = vsel %vm1074_vm9, %v1069_v20, %v7930_v1 }
 0x266   : > { %v1103_v25 = vsel %vm1091_vm10, %v1086_v46, %v7977_v40  ;;  %v9399_v46 = vld [vmem:[#allocation10_spill] sm:$0xff] }
 0x267   : > { %v1938_v0 = vpop.permute.xlu1 %1937  ;;  %v8128_v29 = vpop.permute.xlu0 %733  ;;  %v1120_v1 = vsel %vm1108_vm11, %v1103_v25, %v8025_v36  ;;  %v2067_v36 = vsel %vm1040_vm7, %v2051_v58, %v7877_v8  ;;  %6399 = vmatpush3.bf16.msra.mxu0 %v6396_v19 }
 0x268   : > { %v1137_v18 = vsel %vm1125_vm12, %v1120_v1, %v942_v35  ;;  %v2083_v35 = vsel %vm1057_vm8, %v2067_v36, %v7917_v54 }
 0x269   : > { %957 = vbcast.lane.b32.xlu1 %v7407_v47, 265  ;;  %1675 = vbcast.lane.b32.xlu0 %v9398_v45, 256  ;;  %v2099_v2 = vsel %vm1074_vm9, %v2083_v35, %v7955_v3 }
 0x26b   : > { %v8145_v16 = vpop.permute.xlu1 %521  ;;  %v1006_v40 = vpop.permute.xlu0 %1005 }
 0x26c   : > { %v1154_v10 = vsel %vm1142_vm13, %v1137_v18, %v1006_v40 }
 0x26d   : > { %1597 = vbcast.lane.b32.xlu1 %v7410_v48, 266  ;;  %1953 = vbcast.lane.b32.xlu0 %v9397_v5, 257  ;;  %v2115_v48 = vsel %vm1091_vm10, %v2099_v2, %v8015_v43  ;;  %v9401_v2 = vld [vmem:[#allocation12_spill] sm:$0xff] }
 0x26e   : > { %5609 = vmatmul.mubr.msk.f32.gmra.mrb[10].mxu0 %vm1165_vm14, %v1154_v10  ;;  %v2131_v61 = vsel %vm1108_vm11, %v2115_v48, %v8061_v32 }
 0x26f   : > { %v8158_v23 = vpop.permute.xlu1 %793  ;;  %v8160_v41 = vpop.permute.xlu0 %1729  ;;  %v2147_v8 = vsel %vm1125_vm12, %v2131_v61, %v1938_v0  ;;  %v2052_v0 = vsel %vm1023_vm6, %v7871_v39, %v7867_v59 }
 0x270   : > { %v2068_v63 = vsel %vm1040_vm7, %v2052_v0, %v7894_v38 }
 0x271   : > { %1884 = vbcast.lane.b32.xlu1 %v9397_v5, 264  ;;  %1679 = vbcast.lane.b32.xlu0 %v9398_v45, 264  ;;  %v2084_v25 = vsel %vm1057_vm8, %v2068_v63, %v7965_v60 }
 0x272   : > { %v2100_v37 = vsel %vm1074_vm9, %v2084_v25, %v7996_v26 }
 0x273   : > { %v8171_v54 = vpop.permute.xlu1 %1657  ;;  %v2002_v14 = vpop.permute.xlu0 %2001  ;;  %v2116_v1 = vsel %vm1091_vm10, %v2100_v37, %v8033_v53 }
 0x274   : > { %v2163_v6 = vsel %vm1142_vm13, %v2147_v8, %v2002_v14  ;;  %v2132_v59 = vsel %vm1108_vm11, %v2116_v1, %v8097_v34  ;;  %v9400_v34 = vld [vmem:[#allocation11_spill] sm:$0xff] }
 0x275   : > { %v5601_v3 = vpop.f32.mrb[4].mxu0  ;;  %1021 = vbcast.lane.b32.xlu1 %v7407_v47, 266  ;;  %1957 = vbcast.lane.b32.xlu0 %v9397_v5, 265 }
 0x276   : > { %v1310_v43 = vadd.f32 %v5601_v3, %v7909_v9  ;;  %v1304_v4 = vpop.f32.mrb[5].mxu0  ;;  %5627 = vmatprep.mubr.msk.f32.mxu1 %vm1165_vm14, %v2163_v6 }
 0x277   : > { %v1305_v32 = vadd.f32 %v7909_v9, %v1304_v4  ;;  %v1942_v24 = vpop.permute.xlu1 %1941  ;;  %v526_v56 = vpop.permute.xlu0 %525  ;;  %v1036_v4 = vsel %vm1023_vm6, %v7919_v33, %v7940_v11  ;;  %v9402_v11 = vld [vmem:[#allocation13_spill] sm:$0xff] }
 0x278   : > { %v1368_v12 = vmax.f32 %v1310_v43, 0.0  ;;  %v2148_v39 = vsel %vm1125_vm12, %v2132_v59, %v1942_v24 }
 0x279   : > { %v1367_v50 = vmax.f32 %v1305_v32, 0.0  ;;  %1745 = vbcast.lane.b32.xlu1 %v9398_v45, 257  ;;  %1749 = vbcast.lane.b32.xlu0 %v9398_v45, 265  ;;  %v1053_v32 = vsel %vm1040_vm7, %v1036_v4, %v7981_v55 }
 0x27a   : > { %1385 = vst [vmem:[#allocation3 + $0x51] sm:$0xff] %v1368_v12  ;;  %v1070_v24 = vsel %vm1057_vm8, %v1053_v32, %v8017_v17 }
 0x27b   : > { %1384 = vst [vmem:[#allocation3 + $0x49] sm:$0xff] %v1367_v50  ;;  %v462_v47 = vpop.permute.xlu1 %461  ;;  %v8181_v21 = vpop.permute.xlu0 %797  ;;  %v1087_v50 = vsel %vm1074_vm9, %v1070_v24, %v8078_v30  ;;  %v1037_v30 = vsel %vm1023_vm6, %v7975_v7, %v7971_v28 }
 0x27c   : > { %v1039_v48 = vsel %vm1023_vm6, %v462_v47, %v526_v56  ;;  %v1104_v33 = vsel %vm1091_vm10, %v1087_v50, %v8158_v23  ;;  %v1054_v23 = vsel %vm1040_vm7, %v1037_v30, %v8021_v22 }
 0x27d   : > { %2017 = vbcast.lane.b32.xlu1 %v9397_v5, 258  ;;  %2021 = vbcast.lane.b32.xlu0 %v9397_v5, 266  ;;  %v1071_v25 = vsel %vm1057_vm8, %v1054_v23, %v8045_v44 }
 0x27e   : > { %v1088_v1 = vsel %vm1074_vm9, %v1071_v25, %v8128_v29 }
 0x27f   : > { %v8185_v57 = vpop.permute.xlu1 %585  ;;  %v8187_v20 = vpop.permute.xlu0 %1448  ;;  %v1105_v28 = vsel %vm1091_vm10, %v1088_v1, %v8181_v21  ;;  %v9403_v21 = vld [vmem:[#allocation14_spill] sm:$0xff] }
 0x281   : > { %1809 = vbcast.lane.b32.xlu1 %v9398_v45, 258  ;;  %1891 = vbcast.lane.b32.xlu0 %v9399_v46, 256 }
 0x283   : > { %v879_v13 = vpop.permute.xlu1 %878  ;;  %v8198_v5 = vpop.permute.xlu0 %1733 }
 0x284   : > { %v1121_v55 = vsel %vm1108_vm11, %v1104_v33, %v879_v13 }
 0x285   : > { %1813 = vbcast.lane.b32.xlu1 %v9398_v45, 266  ;;  %1961 = vbcast.lane.b32.xlu0 %v9399_v46, 257 }
 0x287   : > { %v8209_v38 = vpop.permute.xlu1 %1521  ;;  %v2006_v60 = vpop.permute.xlu0 %2005 }
 0x288   : > { %v2164_v18 = vsel %vm1142_vm13, %v2148_v39, %v2006_v60  ;;  %v2053_v60 = vsel %vm1023_vm6, %v7983_v62, %v8009_v27 }
 0x289   : > { %1895 = vbcast.lane.b32.xlu1 %v9399_v46, 264  ;;  %2025 = vbcast.lane.b32.xlu0 %v9399_v46, 258 }
 0x28a   : > { %5628 = vmatmul.mubr.msk.f32.gmra.mrb[4].mxu1 %vm1165_vm14, %v2164_v18  ;;  %v2069_v18 = vsel %vm1040_vm7, %v2053_v60, %v8043_v49 }
 0x28b   : > { %v8215_v26 = vpop.permute.xlu1 %1793  ;;  %v8217_v53 = vpop.permute.xlu0 %673 }
 0x28d   : > { %1965 = vbcast.lane.b32.xlu1 %v9399_v46, 265  ;;  %1470 = vbcast.lane.b32.xlu0 %v9400_v34, 256 }
 0x28f   : > { %v590_v45 = vpop.permute.xlu1 %589  ;;  %v946_v40 = vpop.permute.xlu0 %945 }
 0x290   : > { %v1056_v61 = vsel %vm1040_vm7, %v1039_v48, %v590_v45  ;;  %v1138_v17 = vsel %vm1125_vm12, %v1121_v55, %v946_v40  ;;  %v2085_v40 = vsel %vm1057_vm8, %v2069_v18, %v8109_v31 }
 0x291   : > { %2029 = vbcast.lane.b32.xlu1 %v9399_v46, 266  ;;  %1474 = vbcast.lane.b32.xlu0 %v9400_v34, 264  ;;  %v2101_v27 = vsel %vm1074_vm9, %v2085_v40, %v8160_v41 }
 0x292   : > { %v2117_v49 = vsel %vm1091_vm10, %v2101_v27, %v8215_v26 }
 0x293   : > { %v883_v10 = vpop.permute.xlu1 %882  ;;  %v1526_v19 = vpop.permute.xlu0 %1525 }
 0x294   : > { %v1122_v7 = vsel %vm1108_vm11, %v1105_v28, %v883_v10 }
 0x295   : > { %1537 = vbcast.lane.b32.xlu1 %v9400_v34, 257  ;;  %1601 = vbcast.lane.b32.xlu0 %v9400_v34, 258 }
 0x297   : > { %v1453_v58 = vpop.permute.xlu1 %1452  ;;  %v8225_v36 = vpop.permute.xlu0 %1797 }
 0x298   : > { %v2056_v35 = vsel %vm1023_vm6, %v1453_v58, %v1526_v19 }
 0x299   : > { %1541 = vbcast.lane.b32.xlu1 %v9400_v34, 265  ;;  %1686 = vbcast.lane.b32.xlu0 %v9401_v2, 256 }
 0x29b   : > { %v8232_v8 = vpop.permute.xlu1 %1585  ;;  %v678_v14 = vpop.permute.xlu0 %677 }
 0x29c   : > { %v8235_v6 = vsel %vm1057_vm8, %v1056_v61, %v678_v14 }
 0x29d   : > { %1605 = vbcast.lane.b32.xlu1 %v9400_v34, 266  ;;  %1753 = vbcast.lane.b32.xlu0 %v9401_v2, 257 }
 0x29f   : > { %v1870_v3 = vpop.permute.xlu1 %1869  ;;  %v950_v43 = vpop.permute.xlu0 %949 }
 0x2a0   : > { %v1139_v22 = vsel %vm1125_vm12, %v1122_v7, %v950_v43  ;;  %v2133_v31 = vsel %vm1108_vm11, %v2117_v49, %v1870_v3  ;;  %v9404_v3 = vld [vmem:[#allocation15_spill] sm:$0xff]  ;;  %v1038_v7 = vsel %vm1023_vm6, %v8111_v42, %v8145_v16 }
 0x2a1   : > { %1690 = vbcast.lane.b32.xlu1 %v9401_v2, 264  ;;  %1817 = vbcast.lane.b32.xlu0 %v9401_v2, 258 }
 0x2a3   : > { %v8248_v56 = vpop.permute.xlu1 %737  ;;  %v1590_v12 = vpop.permute.xlu0 %1589 }
 0x2a4   : > { %v8253_v47 = vsel %vm1040_vm7, %v2056_v35, %v1590_v12  ;;  %v2054_v12 = vsel %vm1023_vm6, %v8031_v51, %v8027_v15  ;;  %v9405_v15 = vld [vmem:[#allocation16_spill] sm:$0xff] }
 0x2a5   : > { %1757 = vbcast.lane.b32.xlu1 %v9401_v2, 265  ;;  %1902 = vbcast.lane.b32.xlu0 %v9402_v11, 256  ;;  %v2070_v50 = vsel %vm1040_vm7, %v2054_v12, %v8080_v52 }
 0x2a6   : > { %v2086_v33 = vsel %vm1057_vm8, %v2070_v50, %v8171_v54 }
 0x2a7   : > { %v1010_v0 = vpop.permute.xlu1 %1009  ;;  %v8261_v46 = vpop.permute.xlu0 %1873 }
 0x2a8   : > { %v1155_v63 = vsel %vm1142_vm13, %v1138_v17, %v1010_v0  ;;  %v2102_v17 = vsel %vm1074_vm9, %v2086_v33, %v8198_v5 }
 0x2a9   : > { %1821 = vbcast.lane.b32.xlu1 %v9401_v2, 266  ;;  %1969 = vbcast.lane.b32.xlu0 %v9402_v11, 257  ;;  %v2118_v0 = vsel %vm1091_vm10, %v2102_v17, %v8225_v36 }
 0x2aa   : > { %5611 = vmatprep.mubr.msk.f32.mxu0 %vm1165_vm14, %v1155_v63  ;;  %v2134_v51 = vsel %vm1108_vm11, %v2118_v0, %v8261_v46 }
 0x2ab   : > { %v8274_v13 = vpop.permute.xlu1 %1664  ;;  %v8276_v37 = vpop.permute.xlu0 %741 }
 0x2ac   : > { %v1090_v27 = vsel %vm1074_vm9, %v8235_v6, %v8276_v37 }
 0x2ad   : > { %1906 = vbcast.lane.b32.xlu1 %v9402_v11, 264  ;;  %2033 = vbcast.lane.b32.xlu0 %v9402_v11, 258 }
 0x2af   : > { %v1946_v59 = vpop.permute.xlu1 %1945  ;;  %v1014_v44 = vpop.permute.xlu0 %1013 }
 0x2b0   : > { %v1156_v39 = vsel %vm1142_vm13, %v1139_v22, %v1014_v44  ;;  %v2149_v2 = vsel %vm1125_vm12, %v2133_v31, %v1946_v59  ;;  %v1055_v59 = vsel %vm1040_vm7, %v1038_v7, %v8185_v57 }
 0x2b1   : > { %v5604_v29 = vpop.f32.mrb[6].mxu0  ;;  %1973 = vbcast.lane.b32.xlu1 %v9402_v11, 265  ;;  %1481 = vbcast.lane.b32.xlu0 %v9403_v21, 256  ;;  %v1072_v44 = vsel %vm1057_vm8, %v1055_v59, %v8217_v53 }
 0x2b2   : > { %v1320_v34 = vadd.f32 %v5604_v29, %v7909_v9  ;;  %v1314_v45 = vpop.f32.mrb[7].mxu0  ;;  %5612 = vmatmul.mubr.msk.f32.gmra.mrb[12].mxu0 %vm1165_vm14, %v1156_v39  ;;  %v1089_v29 = vsel %vm1074_vm9, %v1072_v44, %v8248_v56 }
 0x2b3   : > { %v1315_v10 = vadd.f32 %v7909_v9, %v1314_v45  ;;  %v8299_v19 = vpop.permute.xlu1 %801  ;;  %v8301_v62 = vpop.permute.xlu0 %1737 }
 0x2b4   : > { %v1370_v58 = vmax.f32 %v1320_v34, 0.0  ;;  %v1106_v42 = vsel %vm1091_vm10, %v1089_v29, %v8299_v19 }
 0x2b5   : > { %v1369_v35 = vmax.f32 %v1315_v10, 0.0  ;;  %2037 = vbcast.lane.b32.xlu1 %v9402_v11, 266  ;;  %1485 = vbcast.lane.b32.xlu0 %v9403_v21, 264 }
 0x2b6   : > { %1387 = vst [vmem:[#allocation3 + $0x69] sm:$0xff] %v1370_v58 }
 0x2b7   : > { %1386 = vst [vmem:[#allocation3 + $0x61] sm:$0xff] %v1369_v35  ;;  %v8311_v48 = vpop.permute.xlu1 %1668  ;;  %v2010_v61 = vpop.permute.xlu0 %2009 }
 0x2b8   : > { %v2165_v41 = vsel %vm1142_vm13, %v2149_v2, %v2010_v61  ;;  %v2433_v61 = vld [vmem:[#allocation3 + $0x1] ss:$2 sm:$0xff] }
 0x2b9   : > { %1545 = vbcast.lane.b32.xlu1 %v9403_v21, 257  ;;  %1609 = vbcast.lane.b32.xlu0 %v9403_v21, 258 }
 0x2ba   : > { %5630 = vmatprep.mubr.msk.f32.mxu1 %vm1165_vm14, %v2165_v41 }
 0x2bb   : > { %v1950_v26 = vpop.permute.xlu1 %1949  ;;  %v890_v14 = vpop.permute.xlu0 %889 }
 0x2bc   : > { %v2150_v52 = vsel %vm1125_vm12, %v2134_v51, %v1950_v26  ;;  %v1123_v16 = vsel %vm1108_vm11, %v1106_v42, %v890_v14  ;;  %v2055_v26 = vsel %vm1023_vm6, %v8187_v20, %v8209_v38  ;;  %v2088_v14 = vsel %vm1057_vm8, %v8253_v47, %v8311_v48  ;;  %v2435_v38 = vld [vmem:[#allocation3 + $0x31] ss:$2 sm:$0xff] }
 0x2bd   : > { %1549 = vbcast.lane.b32.xlu1 %v9403_v21, 265  ;;  %1697 = vbcast.lane.b32.xlu0 %v9404_v3, 256  ;;  %v2071_v6 = vsel %vm1040_vm7, %v2055_v26, %v8232_v8 }
 0x2be   : > { %v2087_v37 = vsel %vm1057_vm8, %v2071_v6, %v8274_v13  ;;  %v2437_v13 = vld [vmem:[#allocation3 + $0x61] ss:$2 sm:$0xff] }
 0x2bf   : > { %v806_v43 = vpop.permute.xlu1 %805  ;;  %v8319_v4 = vpop.permute.xlu0 %1529  ;;  %v2103_v12 = vsel %vm1074_vm9, %v2087_v37, %v8301_v62 }
 0x2c0   : > { %v1107_v58 = vsel %vm1091_vm10, %v1090_v27, %v806_v43 }
 0x2c1   : > { %1613 = vbcast.lane.b32.xlu1 %v9403_v21, 266  ;;  %1761 = vbcast.lane.b32.xlu0 %v9404_v3, 257 }
 0x2c3   : > { %v8323_v32 = vpop.permute.xlu1 %1459  ;;  %v8325_v24 = vpop.permute.xlu0 %1801 }
 0x2c4   : > { %v2119_v8 = vsel %vm1091_vm10, %v2103_v12, %v8325_v24  ;;  %v2057_v24 = vsel %vm1023_vm6, %v8323_v32, %v8319_v4 }
 0x2c5   : > { %1701 = vbcast.lane.b32.xlu1 %v9404_v3, 264  ;;  %1825 = vbcast.lane.b32.xlu0 %v9404_v3, 258 }
 0x2c7   : > { %v8336_v11 = vpop.permute.xlu1 %1741  ;;  %v894_v55 = vpop.permute.xlu0 %893 }
 0x2c8   : > { %v1124_v49 = vsel %vm1108_vm11, %v1107_v58, %v894_v55  ;;  %v2104_v20 = vsel %vm1074_vm9, %v2088_v14, %v8336_v11 }
 0x2c9   : > { %1765 = vbcast.lane.b32.xlu1 %v9404_v3, 265  ;;  %1913 = vbcast.lane.b32.xlu0 %v9405_v15, 256 }
 0x2cb   : > { %v2014_v63 = vpop.permute.xlu1 %2013  ;;  %v8347_v54 = vpop.permute.xlu0 %1463 }
 0x2cc   : > { %v2166_v30 = vsel %vm1142_vm13, %v2150_v52, %v2014_v63 }
 0x2cd   : > { %v5623_v23 = vpop.f32.mrb[0].mxu1  ;;  %1829 = vbcast.lane.b32.xlu1 %v9404_v3, 266  ;;  %1977 = vbcast.lane.b32.xlu0 %v9405_v15, 257 }
 0x2ce   : > { %v2295_v5 = vadd.f32 %v5623_v23, %v7909_v9  ;;  %v2289_v36 = vpop.f32.mrb[1].mxu1  ;;  %5631 = vmatmul.mubr.msk.f32.gmra.mrb[6].mxu1 %vm1165_vm14, %v2166_v30 }
 0x2cf   : > { %v2290_v25 = vadd.f32 %v7909_v9, %v2289_v36  ;;  %v954_v46 = vpop.permute.xlu1 %953  ;;  %v8355_v1 = vpop.permute.xlu0 %1593 }
 0x2d0   : > { %v2369_v28 = vmax.f32 %v2295_v5, 0.0  ;;  %v1140_v57 = vsel %vm1125_vm12, %v1123_v16, %v954_v46  ;;  %v2073_v52 = vsel %vm1040_vm7, %v2057_v24, %v8355_v1 }
 0x2d1   : > { %v2368_v22 = vmax.f32 %v2290_v25, 0.0  ;;  %1917 = vbcast.lane.b32.xlu1 %v9405_v15, 264  ;;  %2041 = vbcast.lane.b32.xlu0 %v9405_v15, 258 }
 0x2d2   : > { %2386 = vst [vmem:[#allocation3 + $0xe1] sm:$0xff] %v2369_v28 }
 0x2d3   : > { %2385 = vst [vmem:[#allocation3 + $0xd9] sm:$0xff] %v2368_v22  ;;  %v8366_v39 = vpop.permute.xlu1 %1533  ;;  %v1881_v60 = vpop.permute.xlu0 %1880 }
 0x2d4   : > { %v2135_v33 = vsel %vm1108_vm11, %v2119_v8, %v1881_v60  ;;  %v2058_v60 = vsel %vm1023_vm6, %v8347_v54, %v8366_v39 }
 0x2d5   : > { %1981 = vbcast.lane.b32.xlu1 %v9405_v15, 265 }
 0x2d7   : > { %v1806_v21 = vpop.permute.xlu1 %1805  ;;  %v1018_v18 = vpop.permute.xlu0 %1017 }
 0x2d8   : > { %v1157_v53 = vsel %vm1142_vm13, %v1140_v57, %v1018_v18  ;;  %v2120_v50 = vsel %vm1091_vm10, %v2104_v20, %v1806_v21 }
 0x2d9   : > { %2045 = vbcast.lane.b32.xlu1 %v9405_v15, 266  ;;  %5614 = vmatprep.mubr.msk.f32.mxu0 %vm1165_vm14, %v1157_v53 }
 0x2db   : > { %v958_v34 = vpop.permute.xlu1 %957  ;;  %v1676_v45 = vpop.permute.xlu0 %1675 }
 0x2dc   : > { %v1141_v35 = vsel %vm1125_vm12, %v1124_v49, %v958_v34  ;;  %v2089_v63 = vsel %vm1057_vm8, %v2073_v52, %v1676_v45 }
 0x2df   : > { %v1598_v56 = vpop.permute.xlu1 %1597  ;;  %v1954_v40 = vpop.permute.xlu0 %1953 }
 0x2e0   : > { %v2151_v48 = vsel %vm1125_vm12, %v2135_v33, %v1954_v40  ;;  %v2074_v42 = vsel %vm1040_vm7, %v2058_v60, %v1598_v56 }
 0x2e3   : > { %v1885_v10 = vpop.permute.xlu1 %1884  ;;  %v1680_v19 = vpop.permute.xlu0 %1679 }
 0x2e4   : > { %v2136_v47 = vsel %vm1108_vm11, %v2120_v50, %v1885_v10  ;;  %v2090_v16 = vsel %vm1057_vm8, %v2074_v42, %v1680_v19 }
 0x2e7   : > { %v1022_v31 = vpop.permute.xlu1 %1021  ;;  %v1958_v2 = vpop.permute.xlu0 %1957 }
 0x2e8   : > { %v1158_v41 = vsel %vm1142_vm13, %v1141_v35, %v1022_v31  ;;  %v2152_v62 = vsel %vm1125_vm12, %v2136_v47, %v1958_v2 }
 0x2e9   : > { %5615 = vmatmul.mubr.msk.f32.gmra.mrb[14].mxu0 %vm1165_vm14, %v1158_v41 }
 0x2ea   : > { %5677 = vmatprep.mubr.f32.mxu0 %v2433_v61 }
 0x2eb   : > { %v1746_v3 = vpop.permute.xlu1 %1745  ;;  %v1750_v43 = vpop.permute.xlu0 %1749 }
 0x2ec   : > { %v2105_v30 = vsel %vm1074_vm9, %v2089_v63, %v1746_v3  ;;  %v2106_v18 = vsel %vm1074_vm9, %v2090_v16, %v1750_v43 }
 0x2ed   : > { %5678 = vmatmul.mubr.f32.vlgmr.msra.gmra.mrb[16].mxu0 %v2435_v38 }
 0x2ee   : > { %5680 = vmatprep.mubr.f32.mxu0 %v2437_v13 }
 0x2ef   : > { %v2018_v55 = vpop.permute.xlu1 %2017  ;;  %v2022_v17 = vpop.permute.xlu0 %2021 }
 0x2f0   : > { %v2167_v11 = vsel %vm1142_vm13, %v2151_v48, %v2018_v55  ;;  %v2168_v0 = vsel %vm1142_vm13, %v2152_v62, %v2022_v17 }
 0x2f1   : > { %5633 = vmatprep.mubr.msk.f32.mxu1 %vm1165_vm14, %v2167_v11 }
 0x2f2   : > { %5634 = vmatmul.mubr.msk.f32.gmra.mrb[8].mxu1 %vm1165_vm14, %v2168_v0 }
 0x2f3   : > { %v1810_v15 = vpop.permute.xlu1 %1809  ;;  %v1892_v51 = vpop.permute.xlu0 %1891 }
 0x2f4   : > { %v2121_v23 = vsel %vm1091_vm10, %v2105_v30, %v1810_v15 }
 0x2f5   : > { %v2137_v46 = vsel %vm1108_vm11, %v2121_v23, %v1892_v51 }
 0x2f7   : > { %v1814_v5 = vpop.permute.xlu1 %1813  ;;  %v1962_v36 = vpop.permute.xlu0 %1961 }
 0x2f8   : > { %v2153_v4 = vsel %vm1125_vm12, %v2137_v46, %v1962_v36  ;;  %v2122_v53 = vsel %vm1091_vm10, %v2106_v18, %v1814_v5 }
 0x2f9   : > { %v5607_v25 = vpop.f32.mrb[8].mxu0 }
 0x2fa   : > { %v1330_v28 = vadd.f32 %v5607_v25, %v7909_v9  ;;  %v1324_v7 = vpop.f32.mrb[9].mxu0 }
 0x2fb   : > { %v1325_v32 = vadd.f32 %v7909_v9, %v1324_v7  ;;  %v1896_v22 = vpop.permute.xlu1 %1895  ;;  %v2026_v1 = vpop.permute.xlu0 %2025 }
 0x2fc   : > { %v1372_v59 = vmax.f32 %v1330_v28, 0.0  ;;  %v2169_v44 = vsel %vm1142_vm13, %v2153_v4, %v2026_v1  ;;  %v2138_v34 = vsel %vm1108_vm11, %v2122_v53, %v1896_v22 }
 0x2fd   : > { %v1371_v29 = vmax.f32 %v1325_v32, 0.0  ;;  %5636 = vmatprep.mubr.msk.f32.mxu1 %vm1165_vm14, %v2169_v44 }
 0x2fe   : > { %1389 = vst [vmem:[#allocation3 + $0x81] sm:$0xff] %v1372_v59 }
 0x2ff   : > { %1388 = vst [vmem:[#allocation3 + $0x79] sm:$0xff] %v1371_v29  ;;  %v1966_v57 = vpop.permute.xlu1 %1965  ;;  %v1471_v21 = vpop.permute.xlu0 %1470 }
 0x300   : > { %v2154_v45 = vsel %vm1125_vm12, %v2138_v34, %v1966_v57  ;;  %v8465_v34 = vld [vmem:[%s9371_s2] ss:$0 sm:$0xff] }
 0x303   : > { %v2030_v54 = vpop.permute.xlu1 %2029  ;;  %v1475_v39 = vpop.permute.xlu0 %1474 }
 0x304   : > { %v2170_v40 = vsel %vm1142_vm13, %v2154_v45, %v2030_v54 }
 0x305   : > { %5637 = vmatmul.mubr.msk.f32.gmra.mrb[10].mxu1 %vm1165_vm14, %v2170_v40 }
 0x307   : > { %v1538_v56 = vpop.permute.xlu1 %1537  ;;  %v1602_v10 = vpop.permute.xlu0 %1601 }
 0x308   : > { %v2059_v26 = vsel %vm1023_vm6, %v1471_v21, %v1538_v56 }
 0x309   : > { %v2075_v12 = vsel %vm1040_vm7, %v2059_v26, %v1602_v10 }
 0x30b   : > { %v1542_v19 = vpop.permute.xlu1 %1541  ;;  %v1687_v27 = vpop.permute.xlu0 %1686 }
 0x30c   : > { %v2091_v20 = vsel %vm1057_vm8, %v2075_v12, %v1687_v27  ;;  %v2060_v55 = vsel %vm1023_vm6, %v1475_v39, %v1542_v19 }
 0x30f   : > { %v1606_v58 = vpop.permute.xlu1 %1605  ;;  %v1754_v49 = vpop.permute.xlu0 %1753 }
 0x310   : > { %v2107_v50 = vsel %vm1074_vm9, %v2091_v20, %v1754_v49  ;;  %v2076_v17 = vsel %vm1040_vm7, %v2060_v55, %v1606_v58  ;;  %v2418_v20 = vld [vmem:[%s9372_s3 + $0x10] sm:$0xff] }
 0x313   : > { %v1691_v35 = vpop.permute.xlu1 %1690  ;;  %v1818_v31 = vpop.permute.xlu0 %1817 }
 0x314   : > { %v2123_v13 = vsel %vm1091_vm10, %v2107_v50, %v1818_v31  ;;  %v2092_v11 = vsel %vm1057_vm8, %v2076_v17, %v1691_v35 }
 0x315   : > { %v5626_v2 = vpop.f32.mrb[2].mxu1 }
 0x316   : > { %v2305_v61 = vadd.f32 %v5626_v2, %v7909_v9  ;;  %v2299_v41 = vpop.f32.mrb[3].mxu1 }
 0x317   : > { %v2300_v6 = vadd.f32 %v7909_v9, %v2299_v41  ;;  %v1758_v37 = vpop.permute.xlu1 %1757  ;;  %v1903_v14 = vpop.permute.xlu0 %1902 }
 0x318   : > { %v2371_v3 = vmax.f32 %v2305_v61, 0.0  ;;  %v2139_v33 = vsel %vm1108_vm11, %v2123_v13, %v1903_v14  ;;  %v2108_v15 = vsel %vm1074_vm9, %v2092_v11, %v1758_v37  ;;  %v2416_v14 = vld [vmem:[%s9372_s3] sm:$0xff] }
 0x319   : > { %v2370_v43 = vmax.f32 %v2300_v6, 0.0  ;;  %v2420_v13 = vld [vmem:[%s9372_s3 + $0x20] sm:$0xff] }
 0x31a   : > { %2388 = vst [vmem:[#allocation3 + $0xf9] sm:$0xff] %v2371_v3  ;;  %v2417_v3 = vld [vmem:[%s9372_s3 + $0x8] sm:$0xff] }
 0x31b   : > { %2387 = vst [vmem:[#allocation3 + $0xf1] sm:$0xff] %v2370_v43  ;;  %v1822_v38 = vpop.permute.xlu1 %1821  ;;  %v1970_v8 = vpop.permute.xlu0 %1969  ;;  %v6400_v12 = vpack.c.bf16 %v2417_v3, %v2416_v14 }
 0x31c   : > { %v2155_v9 = vsel %vm1125_vm12, %v2139_v33, %v1970_v8  ;;  %v2124_v51 = vsel %vm1091_vm10, %v2108_v15, %v1822_v38  ;;  %v2419_v38 = vld [vmem:[%s9372_s3 + $0x18] sm:$0xff]  ;;  %v2421_v33 = vld [vmem:[%s9372_s3 + $0x28] sm:$0xff]  ;;  %v2426_v15 = vld [vmem:[%s9372_s3 + $0x50] sm:$0xff] }
 0x31d   : > { %v6404_v8 = vpack.c.bf16 %v2419_v38, %v2418_v20  ;;  %6401 = vmatprep.subr.bf16.mxu0 %v6400_v12  ;;  %v2401_v38 = vld [vmem:[#allocation3] ss:$2 sm:$0xff] }
 0x31e   : > { %6403 = vmatpush3.bf16.msra.mxu0 %v6400_v12 }
 0x31f   : > { %v1907_v47 = vpop.permute.xlu1 %1906  ;;  %v2034_v48 = vpop.permute.xlu0 %2033  ;;  %6405 = vmatprep.subr.bf16.mxu0 %v6404_v8 }
 0x320   : > { %v2171_v62 = vsel %vm1142_vm13, %v2155_v9, %v2034_v48  ;;  %v2140_v52 = vsel %vm1108_vm11, %v2124_v51, %v1907_v47  ;;  %v6408_v9 = vpack.c.bf16 %v2421_v33, %v2420_v13  ;;  %v2422_v47 = vld [vmem:[%s9372_s3 + $0x30] sm:$0xff]  ;;  %v2423_v48 = vld [vmem:[%s9372_s3 + $0x38] sm:$0xff] }
 0x321   : > { %5639 = vmatprep.mubr.msk.f32.mxu1 %vm1165_vm14, %v2171_v62  ;;  %v6412_v62 = vpack.c.bf16 %v2423_v48, %v2422_v47  ;;  %v4929_v13 = vld [vmem:[%s9372_s3 + $0x118] sm:$0xff]  ;;  %v4930_v47 = vld [vmem:[%s9372_s3 + $0x120] sm:$0xff]  ;;  %v4931_v48 = vld [vmem:[%s9372_s3 + $0x128] sm:$0xff] }
 0x322   : > { %6407 = vmatpush3.bf16.msra.mxu0 %v6404_v8 }
 0x323   : > { %v1974_v0 = vpop.permute.xlu1 %1973  ;;  %v1482_v24 = vpop.permute.xlu0 %1481  ;;  %6409 = vmatprep.subr.bf16.mxu0 %v6408_v9 }
 0x324   : > { %v2156_v63 = vsel %vm1125_vm12, %v2140_v52, %v1974_v0  ;;  %v2424_v0 = vld [vmem:[%s9372_s3 + $0x40] sm:$0xff] }
 0x326   : > { %6411 = vmatpush3.bf16.msra.mxu0 %v6408_v9  ;;  %v2403_v9 = vld [vmem:[#allocation3 + $0x30] ss:$2 sm:$0xff] }
 0x327   : > { %v2038_v30 = vpop.permute.xlu1 %2037  ;;  %v1486_v23 = vpop.permute.xlu0 %1485  ;;  %6413 = vmatprep.subr.bf16.mxu0 %v6412_v62 }
 0x328   : > { %v2172_v5 = vsel %vm1142_vm13, %v2156_v63, %v2038_v30  ;;  %v2427_v63 = vld [vmem:[%s9372_s3 + $0x58] sm:$0xff] }
 0x329   : > { %5640 = vmatmul.mubr.msk.f32.gmra.mrb[12].mxu1 %vm1165_vm14, %v2172_v5  ;;  %v2428_v5 = vld [vmem:[%s9372_s3 + $0x60] sm:$0xff] }
 0x32a   : > { %6415 = vmatpush3.bf16.msra.mxu0 %v6412_v62  ;;  %v2405_v62 = vld [vmem:[#allocation3 + $0x60] ss:$2 sm:$0xff] }
 0x32b   : > { %v1546_v36 = vpop.permute.xlu1 %1545  ;;  %v1610_v25 = vpop.permute.xlu0 %1609 }
 0x32c   : > { %v2061_v1 = vsel %vm1023_vm6, %v1482_v24, %v1546_v36  ;;  %v2425_v24 = vld [vmem:[%s9372_s3 + $0x48] sm:$0xff] }
 0x32d   : > { %v2077_v60 = vsel %vm1040_vm7, %v2061_v1, %v1610_v25  ;;  %v6416_v52 = vpack.c.bf16 %v2425_v24, %v2424_v0  ;;  %v2429_v36 = vld [vmem:[%s9372_s3 + $0x68] sm:$0xff]  ;;  %v4933_v0 = vld [vmem:[%s9372_s3 + $0x138] sm:$0xff] }
 0x32f   : > { %v1550_v46 = vpop.permute.xlu1 %1549  ;;  %v1698_v28 = vpop.permute.xlu0 %1697  ;;  %6417 = vmatprep.subr.bf16.mxu0 %v6416_v52 }
 0x330   : > { %v2093_v29 = vsel %vm1057_vm8, %v2077_v60, %v1698_v28  ;;  %v2062_v58 = vsel %vm1023_vm6, %v1486_v23, %v1550_v46  ;;  %v6420_v23 = vpack.c.bf16 %v2427_v63, %v2426_v15  ;;  %6419 = vmatpush3.bf16.msra.mxu0 %v6416_v52  ;;  %v6424_v46 = vpack.c.bf16 %v2429_v36, %v2428_v5  ;;  %v2430_v28 = vld [vmem:[%s9372_s3 + $0x70] sm:$0xff]  ;;  %v4934_v52 = vld [vmem:[%s9372_s3 + $0x140] sm:$0xff]  ;;  %v4935_v63 = vld [vmem:[%s9372_s3 + $0x148] sm:$0xff] }
 0x331   : > { %v2676_v5 = vld [vmem:[#allocation3 + $0x2] ss:$2 sm:$0xff] }
 0x332   : > { %6421 = vmatprep.subr.bf16.mxu0 %v6420_v23 }
 0x333   : > { %v1614_v7 = vpop.permute.xlu1 %1613  ;;  %v1762_v4 = vpop.permute.xlu0 %1761 }
 0x334   : > { %v2109_v57 = vsel %vm1074_vm9, %v2093_v29, %v1762_v4  ;;  %v2078_v35 = vsel %vm1040_vm7, %v2062_v58, %v1614_v7  ;;  %v2431_v7 = vld [vmem:[%s9372_s3 + $0x78] sm:$0xff]  ;;  %6423 = vmatpush3.bf16.msra.mxu0 %v6420_v23  ;;  %v6448_v23 = vpack.c.bf16 %v4935_v63, %v4934_v52 }
 0x335   : > { %6425 = vmatprep.subr.bf16.mxu0 %v6424_v46  ;;  %v6428_v4 = vpack.c.bf16 %v2431_v7, %v2430_v28  ;;  %v4938_v7 = vld [vmem:[%s9372_s3 + $0x160] sm:$0xff]  ;;  %v4961_v52 = vld [vmem:[%s9372_s3 + $0x218] sm:$0xff] }
 0x337   : > { %v1702_v32 = vpop.permute.xlu1 %1701  ;;  %v1826_v22 = vpop.permute.xlu0 %1825 }
 0x338   : > { %v2125_v21 = vsel %vm1091_vm10, %v2109_v57, %v1826_v22  ;;  %v2094_v31 = vsel %vm1057_vm8, %v2078_v35, %v1702_v32  ;;  %v4926_v32 = vld [vmem:[%s9372_s3 + $0x100] sm:$0xff]  ;;  %v4927_v22 = vld [vmem:[%s9372_s3 + $0x108] sm:$0xff]  ;;  %6427 = vmatpush3.bf16.msra.mxu0 %v6424_v46  ;;  %v4937_v46 = vld [vmem:[%s9372_s3 + $0x158] sm:$0xff] }
 0x339   : > { %6429 = vmatprep.subr.bf16.mxu0 %v6428_v4  ;;  %v6432_v1 = vpack.c.bf16 %v4927_v22, %v4926_v32 }
 0x33b   : > { %v1766_v59 = vpop.permute.xlu1 %1765  ;;  %v1914_v44 = vpop.permute.xlu0 %1913 }
 0x33c   : > { %v2141_v53 = vsel %vm1108_vm11, %v2125_v21, %v1914_v44  ;;  %v2110_v61 = vsel %vm1074_vm9, %v2094_v31, %v1766_v59  ;;  %6431 = vmatpush3.bf16.msra.mxu0 %v6428_v4  ;;  %v4939_v4 = vld [vmem:[%s9372_s3 + $0x168] sm:$0xff] }
 0x33d   : > { %6433 = vmatprep.subr.bf16.mxu0 %v6432_v1  ;;  %v6456_v22 = vpack.c.bf16 %v4939_v4, %v4938_v7  ;;  %v2829_v7 = vld [vmem:[#allocation3 + $0xd8] ss:$2 sm:$0xff] }
 0x33f   : > { %v1830_v42 = vpop.permute.xlu1 %1829  ;;  %v1978_v16 = vpop.permute.xlu0 %1977 }
 0x340   : > { %v2157_v39 = vsel %vm1125_vm12, %v2141_v53, %v1978_v16  ;;  %v2126_v41 = vsel %vm1091_vm10, %v2110_v61, %v1830_v42 }
 0x341   : > { %v5610_v18 = vpop.f32.mrb[10].mxu0 }
 0x342   : > { %v1340_v45 = vadd.f32 %v8465_v34, %v5610_v18  ;;  %v1334_v54 = vpop.f32.mrb[11].mxu0 }
 0x343   : > { %v1335_v40 = vadd.f32 %v8465_v34, %v1334_v54  ;;  %v1918_v56 = vpop.permute.xlu1 %1917  ;;  %v2042_v10 = vpop.permute.xlu0 %2041 }
 0x344   : > { %v1374_v19 = vmax.f32 %v1340_v45, 0.0  ;;  %v2173_v27 = vsel %vm1142_vm13, %v2157_v39, %v2042_v10  ;;  %v2142_v26 = vsel %vm1108_vm11, %v2126_v41, %v1918_v56 }
 0x345   : > { %v1373_v49 = vmax.f32 %v1335_v40, 0.0  ;;  %5642 = vmatprep.mubr.msk.f32.mxu1 %vm1165_vm14, %v2173_v27 }
 0x346   : > { %1391 = vst [vmem:[#allocation3 + $0x99] sm:$0xff] %v1374_v19 }
 0x347   : > { %1390 = vst [vmem:[#allocation3 + $0x91] sm:$0xff] %v1373_v49  ;;  %v1982_v2 = vpop.permute.xlu1 %1981 }
 0x348   : > { %v2158_v6 = vsel %vm1125_vm12, %v2142_v26, %v1982_v2  ;;  %v2443_v26 = vld [vmem:[#allocation3 + $0xf1] ss:$2 sm:$0xff] }
 0x34b   : > { %v2046_v37 = vpop.permute.xlu1 %2045 }
 0x34c   : > { %v2174_v43 = vsel %vm1142_vm13, %v2158_v6, %v2046_v37 }
 0x34d   : > { %5643 = vmatmul.mubr.msk.f32.gmra.mrb[14].mxu1 %vm1165_vm14, %v2174_v43 }
 0x34e   : > { %v2439_v50 = vld [vmem:[#allocation3 + $0x91] ss:$2 sm:$0xff] }
 0x34f   : > { %5681 = vmatmul.mubr.f32.gmra.mrb[18].mxu0 %v2439_v50  ;;  %v4928_v50 = vld [vmem:[%s9372_s3 + $0x110] sm:$0xff] }
 0x350   : > { %v6436_v33 = vpack.c.bf16 %v4929_v13, %v4928_v50  ;;  %v4956_v13 = vld [vmem:[%s9372_s3 + $0x1f0] sm:$0xff] }
 0x35d   : > { %v5629_v55 = vpop.f32.mrb[4].mxu1 }
 0x35e   : > { %v2315_v17 = vadd.f32 %v8465_v34, %v5629_v55  ;;  %v2309_v11 = vpop.f32.mrb[5].mxu1  ;;  %v6440_v55 = vpack.c.bf16 %v4931_v48, %v4930_v47 }
 0x35f   : > { %v2310_v51 = vadd.f32 %v8465_v34, %v2309_v11  ;;  %v4932_v11 = vld [vmem:[%s9372_s3 + $0x130] sm:$0xff] }
 0x360   : > { %v2373_v30 = vmax.f32 %v2315_v17, 0.0  ;;  %v2407_v17 = vld [vmem:[#allocation3 + $0x90] ss:$2 sm:$0xff]  ;;  %v6444_v15 = vpack.c.bf16 %v4933_v0, %v4932_v11 }
 0x361   : > { %v2372_v25 = vmax.f32 %v2310_v51, 0.0  ;;  %v2411_v51 = vld [vmem:[#allocation3 + $0xf0] ss:$2 sm:$0xff] }
 0x362   : > { %2390 = vst [vmem:[#allocation3 + $0x111] sm:$0xff] %v2373_v30 }
 0x363   : > { %2389 = vst [vmem:[#allocation3 + $0x109] sm:$0xff] %v2372_v25  ;;  %v4936_v25 = vld [vmem:[%s9372_s3 + $0x150] sm:$0xff] }
 0x364   : > { %v6452_v28 = vpack.c.bf16 %v4937_v46, %v4936_v25  ;;  %v4964_v46 = vld [vmem:[%s9372_s3 + $0x230] sm:$0xff] }
 0x385   : > { %v5613_v59 = vpop.f32.mrb[12].mxu0 }
 0x386   : > { %v1350_v44 = vadd.f32 %v8465_v34, %v5613_v59  ;;  %v1344_v60 = vpop.f32.mrb[13].mxu0 }
 0x387   : > { %v1345_v29 = vadd.f32 %v8465_v34, %v1344_v60  ;;  %v4941_v60 = vld [vmem:[%s9372_s3 + $0x178] sm:$0xff] }
 0x388   : > { %v1376_v42 = vmax.f32 %v1350_v44, 0.0  ;;  %v4940_v44 = vld [vmem:[%s9372_s3 + $0x170] sm:$0xff] }
 0x389   : > { %v1375_v16 = vmax.f32 %v1345_v29, 0.0 }
 0x38a   : > { %1393 = vst [vmem:[#allocation3 + $0xb1] sm:$0xff] %v1376_v42 }
 0x38b   : > { %1392 = vst [vmem:[#allocation3 + $0xa9] sm:$0xff] %v1375_v16 }
 0x392   : > { %v2827_v25 = vld [vmem:[#allocation3 + $0xa8] ss:$2 sm:$0xff] }
 0x3a1   : > { %v5632_v57 = vpop.f32.mrb[6].mxu1 }
 0x3a2   : > { %v2325_v21 = vadd.f32 %v8465_v34, %v5632_v57  ;;  %v2319_v18 = vpop.f32.mrb[7].mxu1  ;;  %v6460_v57 = vpack.c.bf16 %v4941_v60, %v4940_v44 }
 0x3a3   : > { %v2320_v53 = vadd.f32 %v8465_v34, %v2319_v18  ;;  %v4943_v18 = vld [vmem:[%s9372_s3 + $0x188] sm:$0xff] }
 0x3a4   : > { %v2375_v45 = vmax.f32 %v2325_v21, 0.0  ;;  %v4942_v21 = vld [vmem:[%s9372_s3 + $0x180] sm:$0xff] }
 0x3a5   : > { %v2374_v54 = vmax.f32 %v2320_v53, 0.0  ;;  %v6464_v53 = vpack.c.bf16 %v4943_v18, %v4942_v21  ;;  %v4970_v21 = vld [vmem:[%s9372_s3 + $0x260] sm:$0xff]  ;;  %v4971_v18 = vld [vmem:[%s9372_s3 + $0x268] sm:$0xff] }
 0x3a6   : > { %2392 = vst [vmem:[#allocation3 + $0x129] sm:$0xff] %v2375_v45  ;;  %v4944_v45 = vld [vmem:[%s9372_s3 + $0x190] sm:$0xff] }
 0x3a7   : > { %2391 = vst [vmem:[#allocation3 + $0x121] sm:$0xff] %v2374_v54  ;;  %v4945_v54 = vld [vmem:[%s9372_s3 + $0x198] sm:$0xff] }
 0x3ae   : > { %v2445_v6 = vld [vmem:[#allocation3 + $0x121] ss:$2 sm:$0xff]  ;;  %v2413_v30 = vld [vmem:[#allocation3 + $0x120] ss:$2 sm:$0xff] }
 0x3bc   : > { %v5616_v39 = vpop.f32.mrb[14].mxu0 }
 0x3bd   : > { %v1360_v40 = vadd.f32 %v8465_v34, %v5616_v39  ;;  %v1354_v56 = vpop.f32.mrb[15].mxu0  ;;  %v6468_v39 = vpack.c.bf16 %v4945_v54, %v4944_v45  ;;  %v4972_v45 = vld [vmem:[%s9372_s3 + $0x270] sm:$0xff]  ;;  %v4973_v54 = vld [vmem:[%s9372_s3 + $0x278] sm:$0xff] }
 0x3be   : > { %v1355_v10 = vadd.f32 %v8465_v34, %v1354_v56  ;;  %v4946_v56 = vld [vmem:[%s9372_s3 + $0x1a0] sm:$0xff] }
 0x3bf   : > { %v1378_v19 = vmax.f32 %v1360_v40, 0.0  ;;  %v2678_v40 = vld [vmem:[#allocation3 + $0x32] ss:$2 sm:$0xff] }
 0x3c0   : > { %v1377_v27 = vmax.f32 %v1355_v10, 0.0  ;;  %v4947_v10 = vld [vmem:[%s9372_s3 + $0x1a8] sm:$0xff] }
 0x3c1   : > { %1395 = vst [vmem:[#allocation3 + $0xc9] sm:$0xff] %v1378_v19  ;;  %v2680_v19 = vld [vmem:[#allocation3 + $0x62] ss:$2 sm:$0xff] }
 0x3c2   : > { %1394 = vst [vmem:[#allocation3 + $0xc1] sm:$0xff] %v1377_v27  ;;  %v6472_v27 = vpack.c.bf16 %v4947_v10, %v4946_v56  ;;  %v4975_v56 = vld [vmem:[%s9372_s3 + $0x288] sm:$0xff] }
 0x3c5   : > { %v5635_v58 = vpop.f32.mrb[8].mxu1 }
 0x3c6   : > { %v2335_v49 = vadd.f32 %v8465_v34, %v5635_v58  ;;  %v2329_v35 = vpop.f32.mrb[9].mxu1  ;;  %v2682_v58 = vld [vmem:[#allocation3 + $0x92] ss:$2 sm:$0xff] }
 0x3c7   : > { %v2330_v31 = vadd.f32 %v8465_v34, %v2329_v35  ;;  %v4949_v35 = vld [vmem:[%s9372_s3 + $0x1b8] sm:$0xff] }
 0x3c8   : > { %v2377_v2 = vmax.f32 %v2335_v49, 0.0  ;;  %v4948_v49 = vld [vmem:[%s9372_s3 + $0x1b0] sm:$0xff] }
 0x3c9   : > { %v2376_v61 = vmax.f32 %v2330_v31, 0.0  ;;  %v2441_v41 = vld [vmem:[#allocation3 + $0xc1] ss:$2 sm:$0xff]  ;;  %v2409_v24 = vld [vmem:[#allocation3 + $0xc0] ss:$2 sm:$0xff] }
 0x3ca   : > { %2394 = vst [vmem:[#allocation3 + $0x141] sm:$0xff] %v2377_v2  ;;  %5683 = vmatprep.mubr.f32.mxu0 %v2441_v41  ;;  %v2684_v31 = vld [vmem:[#allocation3 + $0xc2] ss:$2 sm:$0xff]  ;;  %v6476_v2 = vpack.c.bf16 %v4949_v35, %v4948_v49  ;;  %v2969_v49 = vld [vmem:[#allocation3 + $0x49] ss:$2 sm:$0xff] }
 0x3cb   : > { %2393 = vst [vmem:[#allocation3 + $0x139] sm:$0xff] %v2376_v61  ;;  %5684 = vmatmul.mubr.f32.gmra.mrb[20].mxu0 %v2443_v26  ;;  %v2686_v61 = vld [vmem:[#allocation3 + $0xf2] ss:$2 sm:$0xff]  ;;  %v4950_v41 = vld [vmem:[%s9372_s3 + $0x1c0] sm:$0xff] }
 0x3cc   : > { %5686 = vmatprep.mubr.f32.mxu0 %v2445_v6  ;;  %v4951_v26 = vld [vmem:[%s9372_s3 + $0x1c8] sm:$0xff]  ;;  %v4978_v35 = vld [vmem:[%s9372_s3 + $0x2a0] sm:$0xff] }
 0x3cd   : > { %v2688_v6 = vld [vmem:[#allocation3 + $0x122] ss:$2 sm:$0xff] }
 0x3d8   : > { %v5638_v37 = vpop.f32.mrb[10].mxu1 }
 0x3d9   : > { %v2345_v14 = vadd.f32 %v8465_v34, %v5638_v37  ;;  %v2339_v3 = vpop.f32.mrb[11].mxu1  ;;  %v6480_v37 = vpack.c.bf16 %v4951_v26, %v4950_v41  ;;  %v2973_v41 = vld [vmem:[#allocation3 + $0xa9] ss:$2 sm:$0xff]  ;;  %v4980_v26 = vld [vmem:[%s9372_s3 + $0x2b0] sm:$0xff] }
 0x3da   : > { %v2340_v43 = vadd.f32 %v8465_v34, %v2339_v3  ;;  %v4952_v3 = vld [vmem:[%s9372_s3 + $0x1d0] sm:$0xff] }
 0x3db   : > { %v2379_v12 = vmax.f32 %v2345_v14, 0.0 }
 0x3dc   : > { %v2378_v20 = vmax.f32 %v2340_v43, 0.0  ;;  %v4953_v43 = vld [vmem:[%s9372_s3 + $0x1d8] sm:$0xff] }
 0x3dd   : > { %2396 = vst [vmem:[#allocation3 + $0x159] sm:$0xff] %v2379_v12  ;;  %v2821_v12 = vld [vmem:[#allocation3 + $0x18] ss:$2 sm:$0xff] }
 0x3de   : > { %2395 = vst [vmem:[#allocation3 + $0x151] sm:$0xff] %v2378_v20  ;;  %v6484_v20 = vpack.c.bf16 %v4953_v43, %v4952_v3  ;;  %v2977_v3 = vld [vmem:[#allocation3 + $0x109] ss:$2 sm:$0xff] }
 0x3df   : > { %v4982_v43 = vld [vmem:[%s9372_s3 + $0x2c0] sm:$0xff] }
 0x3e5   : > { %v2447_v8 = vld [vmem:[#allocation3 + $0x151] ss:$2 sm:$0xff]  ;;  %v2415_v36 = vld [vmem:[#allocation3 + $0x150] ss:$2 sm:$0xff] }
 0x3e6   : > { %5687 = vmatmul.mubr.f32.gmra.mrb[22].mxu0 %v2447_v8  ;;  %v2690_v14 = vld [vmem:[#allocation3 + $0x152] ss:$2 sm:$0xff] }
 0x3e7   : > { %5721 = vmatprep.mubr.f32.mxu0 %v2401_v38  ;;  %v4954_v38 = vld [vmem:[%s9372_s3 + $0x1e0] sm:$0xff]  ;;  %v4955_v8 = vld [vmem:[%s9372_s3 + $0x1e8] sm:$0xff] }
 0x3e8   : > { %v6488_v50 = vpack.c.bf16 %v4955_v8, %v4954_v38  ;;  %v3113_v38 = vld [vmem:[#allocation3 + $0x1a] ss:$2 sm:$0xff] }
 0x3ea   : > { %5722 = vmatmul.mubr.f32.vlgmr.msra.gmra.mrb[16].mxu0 %v2403_v9 }
 0x3eb   : > { %6435 = vmatpush3.bf16.msra.mxu0 %v6432_v1  ;;  %5724 = vmatprep.mubr.f32.mxu0 %v2405_v62 }
 0x3ec   : > { %6437 = vmatprep.subr.bf16.mxu0 %v6436_v33 }
 0x3ee   : > { %5725 = vmatmul.mubr.f32.gmra.mrb[18].mxu0 %v2407_v17  ;;  %v4959_v17 = vld [vmem:[%s9372_s3 + $0x208] sm:$0xff] }
 0x3ef   : > { %6439 = vmatpush3.bf16.msra.mxu0 %v6436_v33  ;;  %5727 = vmatprep.mubr.f32.mxu0 %v2409_v24  ;;  %v4957_v33 = vld [vmem:[%s9372_s3 + $0x1f8] sm:$0xff] }
 0x3f0   : > { %6441 = vmatprep.subr.bf16.mxu0 %v6440_v55  ;;  %v6492_v47 = vpack.c.bf16 %v4957_v33, %v4956_v13  ;;  %v4984_v13 = vld [vmem:[%s9372_s3 + $0x2d0] sm:$0xff]  ;;  %v4985_v33 = vld [vmem:[%s9372_s3 + $0x2d8] sm:$0xff] }
 0x3f2   : > { %5728 = vmatmul.mubr.f32.gmra.mrb[20].mxu0 %v2411_v51  ;;  %v4960_v51 = vld [vmem:[%s9372_s3 + $0x210] sm:$0xff] }
 0x3f3   : > { %6443 = vmatpush3.bf16.msra.mxu0 %v6440_v55  ;;  %5730 = vmatprep.mubr.f32.mxu0 %v2413_v30  ;;  %v4958_v55 = vld [vmem:[%s9372_s3 + $0x200] sm:$0xff]  ;;  %v6500_v63 = vpack.c.bf16 %v4961_v52, %v4960_v51  ;;  %v4987_v51 = vld [vmem:[%s9372_s3 + $0x2e8] sm:$0xff] }
 0x3f4   : > { %6445 = vmatprep.subr.bf16.mxu0 %v6444_v15  ;;  %v2823_v30 = vld [vmem:[#allocation3 + $0x48] ss:$2 sm:$0xff] }
 0x3f6   : > { %5731 = vmatmul.mubr.f32.gmra.mrb[22].mxu0 %v2415_v36 }
 0x3f7   : > { %6447 = vmatpush3.bf16.msra.mxu0 %v6444_v15  ;;  %5765 = vmatprep.mubr.f32.mxu0 %v2676_v5  ;;  %v6496_v15 = vpack.c.bf16 %v4959_v17, %v4958_v55  ;;  %v2825_v5 = vld [vmem:[#allocation3 + $0x78] ss:$2 sm:$0xff]  ;;  %v6548_v17 = vpack.c.bf16 %v4985_v33, %v4984_v13 }
 0x3f8   : > { %6449 = vmatprep.subr.bf16.mxu0 %v6448_v23  ;;  %v5042_v55 = vld [vmem:[%s9374_s5 + $0x98] sm:$0xff]  ;;  %v3267_v13 = vld [vmem:[#allocation3 + $0xf0] ss:$2 sm:$0xff] }
 0x3fb   : > { %6451 = vmatpush3.bf16.msra.mxu0 %v6448_v23  ;;  %v4963_v23 = vld [vmem:[%s9372_s3 + $0x228] sm:$0xff] }
 0x3fc   : > { %v5641_v32 = vpop.f32.mrb[12].mxu1  ;;  %6453 = vmatprep.subr.bf16.mxu0 %v6452_v28 }
 0x3fd   : > { %v2355_v1 = vadd.f32 %v8465_v34, %v5641_v32  ;;  %v2349_v59 = vpop.f32.mrb[13].mxu1  ;;  %v2831_v32 = vld [vmem:[#allocation3 + $0x108] ss:$2 sm:$0xff] }
 0x3fe   : > { %v2350_v29 = vadd.f32 %v8465_v34, %v2349_v59  ;;  %v2833_v59 = vld [vmem:[#allocation3 + $0x138] ss:$2 sm:$0xff] }
 0x3ff   : > { %v2381_v42 = vmax.f32 %v2355_v1, 0.0  ;;  %6455 = vmatpush3.bf16.msra.mxu0 %v6452_v28  ;;  %v4965_v28 = vld [vmem:[%s9372_s3 + $0x238] sm:$0xff]  ;;  %v4967_v1 = vld [vmem:[%s9372_s3 + $0x248] sm:$0xff] }
 0x400   : > { %v2380_v16 = vmax.f32 %v2350_v29, 0.0  ;;  %6457 = vmatprep.subr.bf16.mxu0 %v6456_v22  ;;  %v6508_v4 = vpack.c.bf16 %v4965_v28, %v4964_v46  ;;  %v4968_v29 = vld [vmem:[%s9372_s3 + $0x250] sm:$0xff]  ;;  %v4993_v28 = vld [vmem:[%s9372_s3 + $0x318] sm:$0xff] }
 0x401   : > { %2398 = vst [vmem:[#allocation3 + $0x171] sm:$0xff] %v2381_v42  ;;  %v4969_v42 = vld [vmem:[%s9372_s3 + $0x258] sm:$0xff]  ;;  %v4992_v46 = vld [vmem:[%s9372_s3 + $0x310] sm:$0xff] }
 0x402   : > { %2397 = vst [vmem:[#allocation3 + $0x169] sm:$0xff] %v2380_v16  ;;  %v2967_v16 = vld [vmem:[#allocation3 + $0x19] ss:$2 sm:$0xff] }
 0x403   : > { %6459 = vmatpush3.bf16.msra.mxu0 %v6456_v22  ;;  %v4966_v22 = vld [vmem:[%s9372_s3 + $0x240] sm:$0xff] }
 0x404   : > { %6461 = vmatprep.subr.bf16.mxu0 %v6460_v57  ;;  %v6512_v44 = vpack.c.bf16 %v4967_v1, %v4966_v22  ;;  %v4995_v22 = vld [vmem:[%s9372_s3 + $0x328] sm:$0xff]  ;;  %v3117_v1 = vld [vmem:[#allocation3 + $0x7a] ss:$2 sm:$0xff] }
 0x407   : > { %6463 = vmatpush3.bf16.msra.mxu0 %v6460_v57  ;;  %v6516_v57 = vpack.c.bf16 %v4969_v42, %v4968_v29  ;;  %v4997_v29 = vld [vmem:[%s9372_s3 + $0x338] sm:$0xff] }
 0x408   : > { %6465 = vmatprep.subr.bf16.mxu0 %v6464_v53  ;;  %v3121_v42 = vld [vmem:[#allocation3 + $0xda] ss:$2 sm:$0xff] }
 0x409   : > { %v2835_v60 = vld [vmem:[#allocation3 + $0x168] ss:$2 sm:$0xff] }
 0x40a   : > { %5766 = vmatmul.mubr.f32.vlgmr.msra.gmra.mrb[16].mxu0 %v2678_v40  ;;  %v4974_v40 = vld [vmem:[%s9372_s3 + $0x280] sm:$0xff] }
 0x40b   : > { %5768 = vmatprep.mubr.f32.mxu0 %v2680_v19  ;;  %6467 = vmatpush3.bf16.msra.mxu0 %v6464_v53  ;;  %v6520_v53 = vpack.c.bf16 %v4971_v18, %v4970_v21  ;;  %v6528_v10 = vpack.c.bf16 %v4975_v56, %v4974_v40  ;;  %v4976_v19 = vld [vmem:[%s9372_s3 + $0x290] sm:$0xff]  ;;  %v4998_v21 = vld [vmem:[%s9372_s3 + $0x340] sm:$0xff]  ;;  %v4999_v18 = vld [vmem:[%s9372_s3 + $0x348] sm:$0xff] }
 0x40c   : > { %6469 = vmatprep.subr.bf16.mxu0 %v6468_v39  ;;  %v5001_v40 = vld [vmem:[%s9372_s3 + $0x358] sm:$0xff]  ;;  %v3259_v56 = vld [vmem:[#allocation3 + $0x30] ss:$2 sm:$0xff] }
 0x40e   : > { %5769 = vmatmul.mubr.f32.gmra.mrb[18].mxu0 %v2682_v58 }
 0x40f   : > { %5771 = vmatprep.mubr.f32.mxu0 %v2684_v31  ;;  %6471 = vmatpush3.bf16.msra.mxu0 %v6468_v39  ;;  %v6524_v39 = vpack.c.bf16 %v4973_v54, %v4972_v45  ;;  %v4979_v31 = vld [vmem:[%s9372_s3 + $0x2a8] sm:$0xff]  ;;  %v6576_v45 = vpack.c.bf16 %v4999_v18, %v4998_v21  ;;  %v5030_v21 = vld [vmem:[%s9372_s3 + $0x440] sm:$0xff] }
 0x410   : > { %6473 = vmatprep.subr.bf16.mxu0 %v6472_v27  ;;  %v3127_v54 = vld [vmem:[#allocation3 + $0x16a] ss:$2 sm:$0xff] }
 0x411   : > { %v5031_v18 = vld [vmem:[%s9372_s3 + $0x448] sm:$0xff] }
 0x412   : > { %5772 = vmatmul.mubr.f32.gmra.mrb[20].mxu0 %v2686_v61  ;;  %v6536_v61 = vpack.c.bf16 %v4979_v31, %v4978_v35  ;;  %v5005_v35 = vld [vmem:[%s9372_s3 + $0x378] sm:$0xff] }
 0x413   : > { %5774 = vmatprep.mubr.f32.mxu0 %v2688_v6  ;;  %6475 = vmatpush3.bf16.msra.mxu0 %v6472_v27  ;;  %v4977_v27 = vld [vmem:[%s9372_s3 + $0x298] sm:$0xff] }
 0x414   : > { %6477 = vmatprep.subr.bf16.mxu0 %v6476_v2  ;;  %v6532_v58 = vpack.c.bf16 %v4977_v27, %v4976_v19  ;;  %v4981_v6 = vld [vmem:[%s9372_s3 + $0x2b8] sm:$0xff]  ;;  %v5002_v19 = vld [vmem:[%s9372_s3 + $0x360] sm:$0xff]  ;;  %v5003_v27 = vld [vmem:[%s9372_s3 + $0x368] sm:$0xff] }
 0x416   : > { %5775 = vmatmul.mubr.f32.gmra.mrb[22].mxu0 %v2690_v14  ;;  %v6540_v14 = vpack.c.bf16 %v4981_v6, %v4980_v26  ;;  %v5008_v26 = vld [vmem:[%s9372_s3 + $0x390] sm:$0xff]  ;;  %v5009_v6 = vld [vmem:[%s9372_s3 + $0x398] sm:$0xff] }
 0x417   : > { %6479 = vmatpush3.bf16.msra.mxu0 %v6476_v2  ;;  %5809 = vmatprep.mubr.f32.mxu0 %v2821_v12  ;;  %v2971_v2 = vld [vmem:[#allocation3 + $0x79] ss:$2 sm:$0xff]  ;;  %v4983_v12 = vld [vmem:[%s9372_s3 + $0x2c8] sm:$0xff] }
 0x418   : > { %6481 = vmatprep.subr.bf16.mxu0 %v6480_v37  ;;  %v6544_v8 = vpack.c.bf16 %v4983_v12, %v4982_v43  ;;  %v5011_v43 = vld [vmem:[%s9372_s3 + $0x3a8] sm:$0xff] }
 0x419   : > { %v3263_v12 = vld [vmem:[#allocation3 + $0x90] ss:$2 sm:$0xff] }
 0x41b   : > { %6483 = vmatpush3.bf16.msra.mxu0 %v6480_v37  ;;  %v2975_v37 = vld [vmem:[#allocation3 + $0xd9] ss:$2 sm:$0xff] }
 0x41c   : > { %6485 = vmatprep.subr.bf16.mxu0 %v6484_v20 }
 0x41f   : > { %6487 = vmatpush3.bf16.msra.mxu0 %v6484_v20  ;;  %v2979_v20 = vld [vmem:[#allocation3 + $0x139] ss:$2 sm:$0xff] }
 0x420   : > { %v5644_v9 = vpop.f32.mrb[14].mxu1  ;;  %6489 = vmatprep.subr.bf16.mxu0 %v6488_v50 }
 0x421   : > { %v2365_v48 = vadd.f32 %v8465_v34, %v5644_v9  ;;  %v2359_v62 = vpop.f32.mrb[15].mxu1  ;;  %v5039_v9 = vld [vmem:[%s9374_s5 + $0x80] sm:$0xff] }
 0x422   : > { %v2360_v11 = vadd.f32 %v8465_v34, %v2359_v62  ;;  %v4962_v34 = vld [vmem:[%s9372_s3 + $0x220] sm:$0xff] }
 0x423   : > { %v2383_v0 = vmax.f32 %v2365_v48, 0.0  ;;  %6491 = vmatpush3.bf16.msra.mxu0 %v6488_v50  ;;  %v6504_v36 = vpack.c.bf16 %v4963_v23, %v4962_v34  ;;  %v2981_v50 = vld [vmem:[#allocation3 + $0x169] ss:$2 sm:$0xff]  ;;  %v5041_v48 = vld [vmem:[%s9374_s5 + $0x90] sm:$0xff]  ;;  %v4989_v34 = vld [vmem:[%s9372_s3 + $0x2f8] sm:$0xff] }
 0x424   : > { %v2382_v24 = vmax.f32 %v2360_v11, 0.0  ;;  %6493 = vmatprep.subr.bf16.mxu0 %v6492_v47  ;;  %v6660_v11 = vpack.c.bf16 %v5042_v55, %v5041_v48  ;;  %v5015_v48 = vld [vmem:[%s9372_s3 + $0x3c8] sm:$0xff] }
 0x425   : > { %2400 = vst [vmem:[#allocation3 + $0x189] sm:$0xff] %v2383_v0  ;;  %v5043_v0 = vld [vmem:[%s9374_s5 + $0xa0] sm:$0xff] }
 0x426   : > { %2399 = vst [vmem:[#allocation3 + $0x181] sm:$0xff] %v2382_v24  ;;  %v5044_v24 = vld [vmem:[%s9374_s5 + $0xa8] sm:$0xff] }
 0x427   : > { %6495 = vmatpush3.bf16.msra.mxu0 %v6492_v47  ;;  %v5040_v47 = vld [vmem:[%s9374_s5 + $0x88] sm:$0xff]  ;;  %v6664_v52 = vpack.c.bf16 %v5044_v24, %v5043_v0  ;;  %v5017_v0 = vld [vmem:[%s9372_s3 + $0x3d8] sm:$0xff] }
 0x428   : > { %6497 = vmatprep.subr.bf16.mxu0 %v6496_v15  ;;  %v6656_v62 = vpack.c.bf16 %v5040_v47, %v5039_v9  ;;  %v3269_v9 = vld [vmem:[#allocation3 + $0x120] ss:$2 sm:$0xff]  ;;  %v3405_v24 = vld [vmem:[#allocation3 + $0x31] ss:$2 sm:$0xff] }
 0x429   : > { %v5014_v47 = vld [vmem:[%s9372_s3 + $0x3c0] sm:$0xff] }
 0x42a   : > { %5810 = vmatmul.mubr.f32.vlgmr.msra.gmra.mrb[16].mxu0 %v2823_v30  ;;  %6657 = vmatprep.subr.bf16.mxu1 %v6656_v62  ;;  %v4988_v30 = vld [vmem:[%s9372_s3 + $0x2f0] sm:$0xff]  ;;  %v6608_v55 = vpack.c.bf16 %v5015_v48, %v5014_v47  ;;  %v5052_v47 = vld [vmem:[%s9374_s5 + $0xe8] sm:$0xff] }
 0x42b   : > { %5812 = vmatprep.mubr.f32.mxu0 %v2825_v5  ;;  %6499 = vmatpush3.bf16.msra.mxu0 %v6496_v15  ;;  %v4986_v15 = vld [vmem:[%s9372_s3 + $0x2e0] sm:$0xff]  ;;  %v6556_v23 = vpack.c.bf16 %v4989_v34, %v4988_v30  ;;  %v5020_v30 = vld [vmem:[%s9372_s3 + $0x3f0] sm:$0xff]  ;;  %v5021_v34 = vld [vmem:[%s9372_s3 + $0x3f8] sm:$0xff] }
 0x42c   : > { %6501 = vmatprep.subr.bf16.mxu0 %v6500_v63  ;;  %6659 = vmatpush3.bf16.msra.mxu1 %v6656_v62  ;;  %v4990_v5 = vld [vmem:[%s9372_s3 + $0x300] sm:$0xff]  ;;  %v3271_v62 = vld [vmem:[#allocation3 + $0x150] ss:$2 sm:$0xff] }
 0x42d   : > { %6661 = vmatprep.subr.bf16.mxu1 %v6660_v11 }
 0x42e   : > { %5813 = vmatmul.mubr.f32.gmra.mrb[18].mxu0 %v2827_v25 }
 0x42f   : > { %5815 = vmatprep.mubr.f32.mxu0 %v2829_v7  ;;  %6503 = vmatpush3.bf16.msra.mxu0 %v6500_v63  ;;  %v6552_v63 = vpack.c.bf16 %v4987_v51, %v4986_v15  ;;  %v6564_v7 = vpack.c.bf16 %v4993_v28, %v4992_v46  ;;  %v5018_v51 = vld [vmem:[%s9372_s3 + $0x3e0] sm:$0xff]  ;;  %v5024_v46 = vld [vmem:[%s9372_s3 + $0x410] sm:$0xff]  ;;  %v5025_v28 = vld [vmem:[%s9372_s3 + $0x418] sm:$0xff] }
 0x430   : > { %6505 = vmatprep.subr.bf16.mxu0 %v6504_v36  ;;  %6663 = vmatpush3.bf16.msra.mxu1 %v6660_v11  ;;  %v5016_v11 = vld [vmem:[%s9372_s3 + $0x3d0] sm:$0xff] }
 0x431   : > { %6665 = vmatprep.subr.bf16.mxu1 %v6664_v52  ;;  %v6612_v15 = vpack.c.bf16 %v5017_v0, %v5016_v11  ;;  %v3735_v11 = vld [vmem:[%s9374_s5] sm:$0xff]  ;;  %v3736_v0 = vld [vmem:[%s9374_s5 + $0x8] sm:$0xff] }
 0x432   : > { %5816 = vmatmul.mubr.f32.gmra.mrb[20].mxu0 %v2831_v32  ;;  %v4994_v32 = vld [vmem:[%s9372_s3 + $0x320] sm:$0xff] }
 0x433   : > { %5818 = vmatprep.mubr.f32.mxu0 %v2833_v59  ;;  %6507 = vmatpush3.bf16.msra.mxu0 %v6504_v36  ;;  %v4991_v36 = vld [vmem:[%s9372_s3 + $0x308] sm:$0xff]  ;;  %v6568_v59 = vpack.c.bf16 %v4995_v22, %v4994_v32  ;;  %v5026_v32 = vld [vmem:[%s9372_s3 + $0x420] sm:$0xff] }
 0x434   : > { %6509 = vmatprep.subr.bf16.mxu0 %v6508_v4  ;;  %6667 = vmatpush3.bf16.msra.mxu1 %v6664_v52  ;;  %v6560_v25 = vpack.c.bf16 %v4991_v36, %v4990_v5  ;;  %v5019_v52 = vld [vmem:[%s9372_s3 + $0x3e8] sm:$0xff]  ;;  %v5022_v5 = vld [vmem:[%s9372_s3 + $0x400] sm:$0xff] }
 0x435   : > { %v5023_v36 = vld [vmem:[%s9372_s3 + $0x408] sm:$0xff] }
 0x436   : > { %5819 = vmatmul.mubr.f32.gmra.mrb[22].mxu0 %v2835_v60  ;;  %v4996_v60 = vld [vmem:[%s9372_s3 + $0x330] sm:$0xff]  ;;  %v5027_v22 = vld [vmem:[%s9372_s3 + $0x428] sm:$0xff] }
 0x437   : > { %6511 = vmatpush3.bf16.msra.mxu0 %v6508_v4  ;;  %5853 = vmatprep.mubr.f32.mxu0 %v2967_v16  ;;  %v3115_v4 = vld [vmem:[#allocation3 + $0x4a] ss:$2 sm:$0xff]  ;;  %v6572_v16 = vpack.c.bf16 %v4997_v29, %v4996_v60  ;;  %v5029_v29 = vld [vmem:[%s9372_s3 + $0x438] sm:$0xff] }
 0x438   : > { %6513 = vmatprep.subr.bf16.mxu0 %v6512_v44  ;;  %v5028_v60 = vld [vmem:[%s9372_s3 + $0x430] sm:$0xff] }
 0x43b   : > { %6515 = vmatpush3.bf16.msra.mxu0 %v6512_v44  ;;  %v3119_v44 = vld [vmem:[#allocation3 + $0xaa] ss:$2 sm:$0xff] }
 0x43c   : > { %6517 = vmatprep.subr.bf16.mxu0 %v6516_v57 }
 0x43f   : > { %6519 = vmatpush3.bf16.msra.mxu0 %v6516_v57  ;;  %v3123_v57 = vld [vmem:[#allocation3 + $0x10a] ss:$2 sm:$0xff] }
 0x440   : > { %6521 = vmatprep.subr.bf16.mxu0 %v6520_v53 }
 0x443   : > { %6523 = vmatpush3.bf16.msra.mxu0 %v6520_v53  ;;  %v3125_v53 = vld [vmem:[#allocation3 + $0x13a] ss:$2 sm:$0xff] }
 0x444   : > { %6525 = vmatprep.subr.bf16.mxu0 %v6524_v39 }
 0x447   : > { %6527 = vmatpush3.bf16.msra.mxu0 %v6524_v39  ;;  %v5000_v39 = vld [vmem:[%s9372_s3 + $0x350] sm:$0xff] }
 0x448   : > { %6529 = vmatprep.subr.bf16.mxu0 %v6528_v10 }
 0x44a   : > { %5854 = vmatmul.mubr.f32.vlgmr.msra.gmra.mrb[16].mxu0 %v2969_v49  ;;  %v5004_v49 = vld [vmem:[%s9372_s3 + $0x370] sm:$0xff] }
 0x44b   : > { %5856 = vmatprep.mubr.f32.mxu0 %v2971_v2  ;;  %6531 = vmatpush3.bf16.msra.mxu0 %v6528_v10  ;;  %v6580_v10 = vpack.c.bf16 %v5001_v40, %v5000_v39  ;;  %v6588_v31 = vpack.c.bf16 %v5005_v35, %v5004_v49  ;;  %v5006_v2 = vld [vmem:[%s9372_s3 + $0x380] sm:$0xff]  ;;  %v5032_v39 = vld [vmem:[%s9372_s3 + $0x450] sm:$0xff]  ;;  %v5033_v40 = vld [vmem:[%s9372_s3 + $0x458] sm:$0xff] }
 0x44c   : > { %6533 = vmatprep.subr.bf16.mxu0 %v6532_v58  ;;  %v5036_v49 = vld [vmem:[%s9372_s3 + $0x470] sm:$0xff]  ;;  %v5037_v35 = vld [vmem:[%s9372_s3 + $0x478] sm:$0xff] }
 0x44e   : > { %5857 = vmatmul.mubr.f32.gmra.mrb[18].mxu0 %v2973_v41 }
 0x44f   : > { %5859 = vmatprep.mubr.f32.mxu0 %v2975_v37  ;;  %6535 = vmatpush3.bf16.msra.mxu0 %v6532_v58  ;;  %v6584_v58 = vpack.c.bf16 %v5003_v27, %v5002_v19  ;;  %v6596_v37 = vpack.c.bf16 %v5009_v6, %v5008_v26  ;;  %v5034_v19 = vld [vmem:[%s9372_s3 + $0x460] sm:$0xff]  ;;  %v5035_v27 = vld [vmem:[%s9372_s3 + $0x468] sm:$0xff] }
 0x450   : > { %6537 = vmatprep.subr.bf16.mxu0 %v6536_v61  ;;  %v3559_v26 = vld [vmem:[#allocation3 + $0xf2] ss:$2 sm:$0xff]  ;;  %v3561_v6 = vld [vmem:[#allocation3 + $0x122] ss:$2 sm:$0xff] }
 0x452   : > { %5860 = vmatmul.mubr.f32.gmra.mrb[20].mxu0 %v2977_v3  ;;  %v5010_v3 = vld [vmem:[%s9372_s3 + $0x3a0] sm:$0xff] }
 0x453   : > { %5862 = vmatprep.mubr.f32.mxu0 %v2979_v20  ;;  %6539 = vmatpush3.bf16.msra.mxu0 %v6536_v61  ;;  %v5007_v61 = vld [vmem:[%s9372_s3 + $0x388] sm:$0xff]  ;;  %v6600_v20 = vpack.c.bf16 %v5011_v43, %v5010_v3  ;;  %v5045_v3 = vld [vmem:[%s9374_s5 + $0xb0] sm:$0xff]  ;;  %v5046_v43 = vld [vmem:[%s9374_s5 + $0xb8] sm:$0xff] }
 0x454   : > { %6541 = vmatprep.subr.bf16.mxu0 %v6540_v14  ;;  %v6592_v41 = vpack.c.bf16 %v5007_v61, %v5006_v2  ;;  %v3553_v2 = vld [vmem:[#allocation3 + $0x62] ss:$2 sm:$0xff]  ;;  %v3555_v61 = vld [vmem:[#allocation3 + $0x92] ss:$2 sm:$0xff] }
 0x456   : > { %5863 = vmatmul.mubr.f32.gmra.mrb[22].mxu0 %v2981_v50  ;;  %v5013_v50 = vld [vmem:[%s9372_s3 + $0x3b8] sm:$0xff] }
 0x457   : > { %6543 = vmatpush3.bf16.msra.mxu0 %v6540_v14  ;;  %5897 = vmatprep.mubr.f32.mxu0 %v3113_v38  ;;  %v3261_v14 = vld [vmem:[#allocation3 + $0x60] ss:$2 sm:$0xff] }
 0x458   : > { %6545 = vmatprep.subr.bf16.mxu0 %v6544_v8  ;;  %v3265_v38 = vld [vmem:[#allocation3 + $0xc0] ss:$2 sm:$0xff] }
 0x45b   : > { %6547 = vmatpush3.bf16.msra.mxu0 %v6544_v8  ;;  %v5012_v8 = vld [vmem:[%s9372_s3 + $0x3b0] sm:$0xff] }
 0x45c   : > { %6549 = vmatprep.subr.bf16.mxu0 %v6548_v17  ;;  %v6604_v33 = vpack.c.bf16 %v5013_v50, %v5012_v8  ;;  %v5049_v50 = vld [vmem:[%s9374_s5 + $0xd0] sm:$0xff] }
 0x45f   : > { %6551 = vmatpush3.bf16.msra.mxu0 %v6548_v17  ;;  %v3273_v17 = vld [vmem:[#allocation3 + $0x180] ss:$2 sm:$0xff] }
 0x460   : > { %6553 = vmatprep.subr.bf16.mxu0 %v6552_v63 }
 0x463   : > { %6555 = vmatpush3.bf16.msra.mxu0 %v6552_v63  ;;  %v6616_v63 = vpack.c.bf16 %v5019_v52, %v5018_v51 }
 0x464   : > { %6557 = vmatprep.subr.bf16.mxu0 %v6556_v23 }
 0x467   : > { %6559 = vmatpush3.bf16.msra.mxu0 %v6556_v23  ;;  %v6620_v23 = vpack.c.bf16 %v5021_v34, %v5020_v30 }
 0x468   : > { %6561 = vmatprep.subr.bf16.mxu0 %v6560_v25 }
 0x46a   : > { %5898 = vmatmul.mubr.f32.vlgmr.msra.gmra.mrb[16].mxu0 %v3115_v4  ;;  %v3407_v4 = vld [vmem:[#allocation3 + $0x61] ss:$2 sm:$0xff] }
 0x46b   : > { %5900 = vmatprep.mubr.f32.mxu0 %v3117_v1  ;;  %6563 = vmatpush3.bf16.msra.mxu0 %v6560_v25  ;;  %v6624_v25 = vpack.c.bf16 %v5023_v36, %v5022_v5  ;;  %v3409_v1 = vld [vmem:[#allocation3 + $0x91] ss:$2 sm:$0xff] }
 0x46c   : > { %6565 = vmatprep.subr.bf16.mxu0 %v6564_v7 }
 0x46e   : > { %5901 = vmatmul.mubr.f32.gmra.mrb[18].mxu0 %v3119_v44  ;;  %v3411_v44 = vld [vmem:[#allocation3 + $0xc1] ss:$2 sm:$0xff] }
 0x46f   : > { %5903 = vmatprep.mubr.f32.mxu0 %v3121_v42  ;;  %6567 = vmatpush3.bf16.msra.mxu0 %v6564_v7  ;;  %v6628_v7 = vpack.c.bf16 %v5025_v28, %v5024_v46  ;;  %v3413_v42 = vld [vmem:[#allocation3 + $0xf1] ss:$2 sm:$0xff] }
 0x470   : > { %6569 = vmatprep.subr.bf16.mxu0 %v6568_v59 }
 0x472   : > { %5904 = vmatmul.mubr.f32.gmra.mrb[20].mxu0 %v3123_v57  ;;  %v3415_v57 = vld [vmem:[#allocation3 + $0x121] ss:$2 sm:$0xff] }
 0x473   : > { %5906 = vmatprep.mubr.f32.mxu0 %v3125_v53  ;;  %6571 = vmatpush3.bf16.msra.mxu0 %v6568_v59  ;;  %v6632_v59 = vpack.c.bf16 %v5027_v22, %v5026_v32  ;;  %v3417_v53 = vld [vmem:[#allocation3 + $0x151] ss:$2 sm:$0xff] }
 0x474   : > { %6573 = vmatprep.subr.bf16.mxu0 %v6572_v16 }
 0x476   : > { %5907 = vmatmul.mubr.f32.gmra.mrb[22].mxu0 %v3127_v54  ;;  %v3419_v54 = vld [vmem:[#allocation3 + $0x181] ss:$2 sm:$0xff] }
 0x477   : > { %6575 = vmatpush3.bf16.msra.mxu0 %v6572_v16  ;;  %5941 = vmatprep.mubr.f32.mxu0 %v3259_v56  ;;  %v6636_v16 = vpack.c.bf16 %v5029_v29, %v5028_v60  ;;  %v3551_v56 = vld [vmem:[#allocation3 + $0x32] ss:$2 sm:$0xff] }
 0x478   : > { %6577 = vmatprep.subr.bf16.mxu0 %v6576_v45 }
 0x47b   : > { %6579 = vmatpush3.bf16.msra.mxu0 %v6576_v45  ;;  %v6640_v45 = vpack.c.bf16 %v5031_v18, %v5030_v21 }
 0x47c   : > { %6581 = vmatprep.subr.bf16.mxu0 %v6580_v10 }
 0x47f   : > { %6583 = vmatpush3.bf16.msra.mxu0 %v6580_v10  ;;  %v6644_v10 = vpack.c.bf16 %v5033_v40, %v5032_v39  ;;  %v3738_v39 = vld [vmem:[%s9374_s5 + $0x18] sm:$0xff]  ;;  %v3728_v40 = vld [vmem:[#allocation4] ss:$2 sm:$0xf] }
 0x480   : > { %6585 = vmatprep.subr.bf16.mxu0 %v6584_v58 }
 0x483   : > { %6587 = vmatpush3.bf16.msra.mxu0 %v6584_v58  ;;  %v6648_v58 = vpack.c.bf16 %v5035_v27, %v5034_v19 }
 0x484   : > { %6589 = vmatprep.subr.bf16.mxu0 %v6588_v31 }
 0x487   : > { %6591 = vmatpush3.bf16.msra.mxu0 %v6588_v31  ;;  %v6652_v31 = vpack.c.bf16 %v5037_v35, %v5036_v49  ;;  %v3739_v35 = vld [vmem:[%s9374_s5 + $0x20] sm:$0xff] }
 0x488   : > { %6593 = vmatprep.subr.bf16.mxu0 %v6592_v41 }
 0x48a   : > { %5942 = vmatmul.mubr.f32.vlgmr.msra.gmra.mrb[16].mxu0 %v3261_v14  ;;  %v3565_v14 = vld [vmem:[#allocation3 + $0x182] ss:$2 sm:$0xff] }
 0x48b   : > { %5944 = vmatprep.mubr.f32.mxu0 %v3263_v12  ;;  %6595 = vmatpush3.bf16.msra.mxu0 %v6592_v41  ;;  %v3557_v41 = vld [vmem:[#allocation3 + $0xc2] ss:$2 sm:$0xff]  ;;  %v6668_v12 = vpack.c.bf16 %v5046_v43, %v5045_v3  ;;  %v3745_v3 = vld [vmem:[%s9374_s5 + $0x50] sm:$0xff] }
 0x48c   : > { %6597 = vmatprep.subr.bf16.mxu0 %v6596_v37  ;;  %v3746_v43 = vld [vmem:[%s9374_s5 + $0x58] sm:$0xff] }
 0x48d   : > { %6669 = vmatprep.subr.bf16.mxu1 %v6668_v12 }
 0x48e   : > { %5945 = vmatmul.mubr.f32.gmra.mrb[18].mxu0 %v3265_v38  ;;  %6671 = vmatpush3.bf16.msra.mxu1 %v6668_v12  ;;  %v5048_v38 = vld [vmem:[%s9374_s5 + $0xc8] sm:$0xff]  ;;  %v6708_v12 = vpack.c.bf16 %v3746_v43, %v3745_v3 }
 0x48f   : > { %5947 = vmatprep.mubr.f32.mxu0 %v3267_v13  ;;  %6599 = vmatpush3.bf16.msra.mxu0 %v6596_v37  ;;  %v3563_v37 = vld [vmem:[#allocation3 + $0x152] ss:$2 sm:$0xff] }
 0x490   : > { %6601 = vmatprep.subr.bf16.mxu0 %v6600_v20  ;;  %v5050_v13 = vld [vmem:[%s9374_s5 + $0xd8] sm:$0xff]  ;;  %v5084_v3 = vld [vmem:[%s9374_s5 + $0x1e8] sm:$0xff] }
 0x492   : > { %5948 = vmatmul.mubr.f32.gmra.mrb[20].mxu0 %v3269_v9  ;;  %v5051_v9 = vld [vmem:[%s9374_s5 + $0xe0] sm:$0xff] }
 0x493   : > { %5950 = vmatprep.mubr.f32.mxu0 %v3271_v62  ;;  %6603 = vmatpush3.bf16.msra.mxu0 %v6600_v20  ;;  %v5047_v20 = vld [vmem:[%s9374_s5 + $0xc0] sm:$0xff]  ;;  %v6680_v48 = vpack.c.bf16 %v5052_v47, %v5051_v9  ;;  %v5053_v62 = vld [vmem:[%s9374_s5 + $0xf0] sm:$0xff]  ;;  %v5056_v47 = vld [vmem:[%s9374_s5 + $0x108] sm:$0xff] }
 0x494   : > { %6605 = vmatprep.subr.bf16.mxu0 %v6604_v33  ;;  %v6672_v8 = vpack.c.bf16 %v5048_v38, %v5047_v20  ;;  %v3747_v20 = vld [vmem:[%s9374_s5 + $0x60] sm:$0xff]  ;;  %v3748_v38 = vld [vmem:[%s9374_s5 + $0x68] sm:$0xff] }
 0x495   : > { %v5055_v9 = vld [vmem:[%s9374_s5 + $0x100] sm:$0xff] }
 0x496   : > { %5951 = vmatmul.mubr.f32.gmra.mrb[22].mxu0 %v3273_v17  ;;  %6673 = vmatprep.subr.bf16.mxu1 %v6672_v8 }
 0x497   : > { %6607 = vmatpush3.bf16.msra.mxu0 %v6604_v33  ;;  %5985 = vmatprep.mubr.f32.mxu0 %v3405_v24  ;;  %v6676_v33 = vpack.c.bf16 %v5050_v13, %v5049_v50  ;;  %v6688_v24 = vpack.c.bf16 %v3736_v0, %v3735_v11  ;;  %v3749_v50 = vld [vmem:[%s9374_s5 + $0x70] sm:$0xff]  ;;  %v3750_v13 = vld [vmem:[%s9374_s5 + $0x78] sm:$0xff] }
 0x498   : > { %6609 = vmatprep.subr.bf16.mxu0 %v6608_v55  ;;  %6675 = vmatpush3.bf16.msra.mxu1 %v6672_v8  ;;  %v6712_v8 = vpack.c.bf16 %v3748_v38, %v3747_v20  ;;  %v3943_v11 = vld [vmem:[#allocation4 + $0x2] ss:$2 sm:$0xf]  ;;  %v5086_v20 = vld [vmem:[%s9374_s5 + $0x1f8] sm:$0xff] }
 0x499   : > { %6677 = vmatprep.subr.bf16.mxu1 %v6676_v33 }
 0x49b   : > { %6611 = vmatpush3.bf16.msra.mxu0 %v6608_v55  ;;  %v5054_v55 = vld [vmem:[%s9374_s5 + $0xf8] sm:$0xff] }
 0x49c   : > { %6613 = vmatprep.subr.bf16.mxu0 %v6612_v15  ;;  %6679 = vmatpush3.bf16.msra.mxu1 %v6676_v33  ;;  %v6684_v17 = vpack.c.bf16 %v5054_v55, %v5053_v62  ;;  %v6716_v33 = vpack.c.bf16 %v3750_v13, %v3749_v50  ;;  %v5057_v55 = vld [vmem:[%s9374_s5 + $0x110] sm:$0xff]  ;;  %v5088_v50 = vld [vmem:[%s9374_s5 + $0x208] sm:$0xff] }
 0x49d   : > { %6681 = vmatprep.subr.bf16.mxu1 %v6680_v48 }
 0x49f   : > { %6615 = vmatpush3.bf16.msra.mxu0 %v6612_v15  ;;  %v5038_v15 = vld [vmem:[%s9373_s4] ss:$0 sm:$0xff] }
 0x4a0   : > { %6617 = vmatprep.subr.bf16.mxu0 %v6616_v63  ;;  %6683 = vmatpush3.bf16.msra.mxu1 %v6680_v48  ;;  %v6720_v48 = vpack.c.bf16 %v5056_v47, %v5055_v9  ;;  %v5089_v9 = vld [vmem:[%s9374_s5 + $0x210] sm:$0xff]  ;;  %v5090_v47 = vld [vmem:[%s9374_s5 + $0x218] sm:$0xff] }
 0x4a1   : > { %6685 = vmatprep.subr.bf16.mxu1 %v6684_v17 }
 0x4a3   : > { %6619 = vmatpush3.bf16.msra.mxu0 %v6616_v63 }
 0x4a4   : > { %6621 = vmatprep.subr.bf16.mxu0 %v6620_v23  ;;  %6687 = vmatpush3.bf16.msra.mxu1 %v6684_v17  ;;  %v5058_v17 = vld [vmem:[%s9374_s5 + $0x118] sm:$0xff] }
 0x4a5   : > { %6689 = vmatprep.subr.bf16.mxu1 %v6688_v24 }
 0x4a7   : > { %6623 = vmatpush3.bf16.msra.mxu0 %v6620_v23 }
 0x4a8   : > { %6625 = vmatprep.subr.bf16.mxu0 %v6624_v25 }
 0x4aa   : > { %5986 = vmatmul.mubr.f32.vlgmr.msra.gmra.mrb[16].mxu0 %v3407_v4 }
 0x4ab   : > { %5988 = vmatprep.mubr.f32.mxu0 %v3409_v1  ;;  %6627 = vmatpush3.bf16.msra.mxu0 %v6624_v25 }
 0x4ac   : > { %6629 = vmatprep.subr.bf16.mxu0 %v6628_v7 }
 0x4ae   : > { %5989 = vmatmul.mubr.f32.gmra.mrb[18].mxu0 %v3411_v44 }
 0x4af   : > { %5991 = vmatprep.mubr.f32.mxu0 %v3413_v42  ;;  %6631 = vmatpush3.bf16.msra.mxu0 %v6628_v7 }
 0x4b0   : > { %6633 = vmatprep.subr.bf16.mxu0 %v6632_v59 }
 0x4b2   : > { %5992 = vmatmul.mubr.f32.gmra.mrb[20].mxu0 %v3415_v57 }
 0x4b3   : > { %5994 = vmatprep.mubr.f32.mxu0 %v3417_v53  ;;  %6635 = vmatpush3.bf16.msra.mxu0 %v6632_v59  ;;  %v3752_v59 = vld [vmem:[#allocation4 + $0x1] ss:$2 sm:$0xf] }
 0x4b4   : > { %6637 = vmatprep.subr.bf16.mxu0 %v6636_v16 }
 0x4b6   : > { %5995 = vmatmul.mubr.f32.gmra.mrb[22].mxu0 %v3419_v54  ;;  %v3737_v54 = vld [vmem:[%s9374_s5 + $0x10] sm:$0xff] }
 0x4b7   : > { %6639 = vmatpush3.bf16.msra.mxu0 %v6636_v16  ;;  %6029 = vmatprep.mubr.f32.mxu0 %v3551_v56 }
 0x4b8   : > { %6641 = vmatprep.subr.bf16.mxu0 %v6640_v45 }
 0x4bb   : > { %6643 = vmatpush3.bf16.msra.mxu0 %v6640_v45 }
 0x4bc   : > { %6645 = vmatprep.subr.bf16.mxu0 %v6644_v10 }
 0x4bf   : > { %6647 = vmatpush3.bf16.msra.mxu0 %v6644_v10 }
 0x4c0   : > { %6649 = vmatprep.subr.bf16.mxu0 %v6648_v58 }
 0x4c3   : > { %6651 = vmatpush3.bf16.msra.mxu0 %v6648_v58  ;;  %v6692_v58 = vpack.c.bf16 %v3738_v39, %v3737_v54 }
 0x4c4   : > { %6653 = vmatprep.subr.bf16.mxu0 %v6652_v31 }
 0x4c7   : > { %6655 = vmatpush3.bf16.msra.mxu0 %v6652_v31  ;;  %v3740_v31 = vld [vmem:[%s9374_s5 + $0x28] sm:$0xff] }
 0x4ca   : > { %6030 = vmatmul.mubr.f32.vlgmr.msra.gmra.mrb[16].mxu0 %v3553_v2  ;;  %v6696_v2 = vpack.c.bf16 %v3740_v31, %v3739_v35  ;;  %v5078_v35 = vld [vmem:[%s9374_s5 + $0x1b8] sm:$0xff] }
 0x4cb   : > { %6032 = vmatprep.mubr.f32.mxu0 %v3555_v61  ;;  %v3741_v61 = vld [vmem:[%s9374_s5 + $0x30] sm:$0xff] }
 0x4ce   : > { %6033 = vmatmul.mubr.f32.gmra.mrb[18].mxu0 %v3557_v41  ;;  %v3742_v41 = vld [vmem:[%s9374_s5 + $0x38] sm:$0xff] }
 0x4cf   : > { %6035 = vmatprep.mubr.f32.mxu0 %v3559_v26  ;;  %v6700_v26 = vpack.c.bf16 %v3742_v41, %v3741_v61  ;;  %v5080_v61 = vld [vmem:[%s9374_s5 + $0x1c8] sm:$0xff] }
 0x4d2   : > { %6036 = vmatmul.mubr.f32.gmra.mrb[20].mxu0 %v3561_v6  ;;  %v3743_v6 = vld [vmem:[%s9374_s5 + $0x40] sm:$0xff] }
 0x4d3   : > { %6038 = vmatprep.mubr.f32.mxu0 %v3563_v37  ;;  %v3744_v37 = vld [vmem:[%s9374_s5 + $0x48] sm:$0xff] }
 0x4d6   : > { %6039 = vmatmul.mubr.f32.gmra.mrb[22].mxu0 %v3565_v14  ;;  %v6704_v14 = vpack.c.bf16 %v3744_v37, %v3743_v6  ;;  %v5082_v6 = vld [vmem:[%s9374_s5 + $0x1d8] sm:$0xff] }
 0x59d   : > { %v6031_v51 = vpop.f32.mrb[16].mxu0 }
 0x59e   : > { %v3704_v52 = vadd.f32 %v6031_v51, %v5038_v15  ;;  %v3649_v63 = vpop.f32.mrb[17].mxu0  ;;  %v6724_v51 = vpack.c.bf16 %v5058_v17, %v5057_v55 }
 0x59f   : > { %v3703_v30 = vadd.f32 %v5038_v15, %v3649_v63  ;;  %v5059_v63 = vld [vmem:[%s9374_s5 + $0x120] sm:$0xff] }
 0x5a0   : > { %v3712_v34 = vmax.f32 %v3704_v52, 0.0 }
 0x5a1   : > { %v3711_v23 = vmax.f32 %v3703_v30, 0.0  ;;  %v6034_v5 = vpop.f32.mrb[18].mxu0  ;;  %v5060_v30 = vld [vmem:[%s9374_s5 + $0x128] sm:$0xff] }
 0x5a2   : > { %3721 = vst [vmem:[#allocation4 + $0x21] sm:$0xff] %v3712_v34  ;;  %v3706_v36 = vadd.f32 %v6034_v5, %v5038_v15  ;;  %v3659_v25 = vpop.f32.mrb[19].mxu0  ;;  %v6728_v34 = vpack.c.bf16 %v5060_v30, %v5059_v63  ;;  %v5062_v5 = vld [vmem:[%s9374_s5 + $0x138] sm:$0xff] }
 0x5a3   : > { %3720 = vst [vmem:[#allocation4 + $0x11] sm:$0xff] %v3711_v23  ;;  %v3705_v46 = vadd.f32 %v5038_v15, %v3659_v25  ;;  %v5061_v23 = vld [vmem:[%s9374_s5 + $0x130] sm:$0xff]  ;;  %v5063_v25 = vld [vmem:[%s9374_s5 + $0x140] sm:$0xff]  ;;  %v5094_v63 = vld [vmem:[%s9374_s5 + $0x238] sm:$0xff] }
 0x5a4   : > { %v3714_v28 = vmax.f32 %v3706_v36, 0.0  ;;  %v6732_v36 = vpack.c.bf16 %v5062_v5, %v5061_v23  ;;  %v5096_v23 = vld [vmem:[%s9374_s5 + $0x248] sm:$0xff] }
 0x5a5   : > { %v3713_v7 = vmax.f32 %v3705_v46, 0.0  ;;  %v6037_v4 = vpop.f32.mrb[20].mxu0  ;;  %v5064_v46 = vld [vmem:[%s9374_s5 + $0x148] sm:$0xff] }
 0x5a6   : > { %3723 = vst [vmem:[#allocation4 + $0x41] sm:$0xff] %v3714_v28  ;;  %v3708_v32 = vadd.f32 %v6037_v4, %v5038_v15  ;;  %v3669_v22 = vpop.f32.mrb[21].mxu0  ;;  %v6736_v28 = vpack.c.bf16 %v5064_v46, %v5063_v25  ;;  %v5066_v4 = vld [vmem:[%s9374_s5 + $0x158] sm:$0xff] }
 0x5a7   : > { %3722 = vst [vmem:[#allocation4 + $0x31] sm:$0xff] %v3713_v7  ;;  %v3707_v1 = vadd.f32 %v5038_v15, %v3669_v22  ;;  %v5065_v7 = vld [vmem:[%s9374_s5 + $0x150] sm:$0xff]  ;;  %v5067_v22 = vld [vmem:[%s9374_s5 + $0x160] sm:$0xff]  ;;  %v5098_v25 = vld [vmem:[%s9374_s5 + $0x258] sm:$0xff] }
 0x5a8   : > { %v3716_v44 = vmax.f32 %v3708_v32, 0.0  ;;  %v6740_v32 = vpack.c.bf16 %v5066_v4, %v5065_v7  ;;  %v5100_v7 = vld [vmem:[%s9374_s5 + $0x268] sm:$0xff] }
 0x5a9   : > { %v3715_v60 = vmax.f32 %v3707_v1, 0.0  ;;  %v6040_v29 = vpop.f32.mrb[22].mxu0  ;;  %v3754_v42 = vld [vmem:[#allocation4 + $0x21] ss:$2 sm:$0xf] }
 0x5aa   : > { %3725 = vst [vmem:[#allocation4 + $0x61] sm:$0xff] %v3716_v44  ;;  %v3710_v16 = vadd.f32 %v6040_v29, %v5038_v15  ;;  %v3679_v57 = vpop.f32.mrb[23].mxu0  ;;  %v3780_v21 = vcombine.low %v3752_v59, %v3754_v42  ;;  %v3730_v56 = vld [vmem:[#allocation4 + $0x20] ss:$2 sm:$0xf]  ;;  %v5069_v44 = vld [vmem:[%s9374_s5 + $0x170] sm:$0xff] }
 0x5ab   : > { %3724 = vst [vmem:[#allocation4 + $0x51] sm:$0xff] %v3715_v60  ;;  %v3709_v18 = vadd.f32 %v5038_v15, %v3679_v57  ;;  %v3863_v49 = vcombine.low %v3728_v40, %v3730_v56  ;;  %v3945_v0 = vld [vmem:[#allocation4 + $0x22] ss:$2 sm:$0xf]  ;;  %v5070_v60 = vld [vmem:[%s9374_s5 + $0x178] sm:$0xff]  ;;  %v5071_v42 = vld [vmem:[%s9374_s5 + $0x180] sm:$0xff] }
 0x5ac   : > { %v3718_v53 = vmax.f32 %v3710_v16, 0.0  ;;  %6073 = vmatprep.mubr.f32.mxu1 %v3780_v21  ;;  %v3971_v52 = vcombine.low %v3943_v11, %v3945_v0  ;;  %v5068_v1 = vld [vmem:[%s9374_s5 + $0x168] sm:$0xff]  ;;  %v6748_v29 = vpack.c.bf16 %v5070_v60, %v5069_v44  ;;  %v4052_v40 = vld [vmem:[#allocation4 + $0x10] ss:$2 sm:$0xf]  ;;  %v6788_v11 = vpack.c.bf16 %v5090_v47, %v5089_v9 }
 0x5ad   : > { %v3717_v45 = vmax.f32 %v3709_v18, 0.0  ;;  %v3756_v10 = vld [vmem:[#allocation4 + $0x41] ss:$2 sm:$0xf]  ;;  %v6744_v59 = vpack.c.bf16 %v5068_v1, %v5067_v22  ;;  %v5073_v18 = vld [vmem:[%s9374_s5 + $0x190] sm:$0xff]  ;;  %v5102_v22 = vld [vmem:[%s9374_s5 + $0x278] sm:$0xff] }
 0x5ae   : > { %3727 = vst [vmem:[#allocation4 + $0x81] sm:$0xff] %v3718_v53  ;;  %v5072_v16 = vld [vmem:[%s9374_s5 + $0x188] sm:$0xff]  ;;  %v5074_v53 = vld [vmem:[%s9374_s5 + $0x198] sm:$0xff] }
 0x5af   : > { %3726 = vst [vmem:[#allocation4 + $0x71] sm:$0xff] %v3717_v45  ;;  %v6752_v57 = vpack.c.bf16 %v5072_v16, %v5071_v42  ;;  %v4054_v45 = vld [vmem:[#allocation4 + $0x30] ss:$2 sm:$0xf]  ;;  %v6756_v56 = vpack.c.bf16 %v5074_v53, %v5073_v18  ;;  %v5104_v44 = vld [vmem:[%s9374_s5 + $0x288] sm:$0xff]  ;;  %v5105_v42 = vld [vmem:[%s9374_s5 + $0x290] sm:$0xff] }
 0x5b0   : > { %v3947_v54 = vld [vmem:[#allocation4 + $0x42] ss:$2 sm:$0xf]  ;;  %v4162_v17 = vld [vmem:[#allocation4 + $0x11] ss:$2 sm:$0xf] }
 0x5b1   : > { %v3758_v19 = vld [vmem:[#allocation4 + $0x61] ss:$2 sm:$0xf]  ;;  %v3734_v62 = vld [vmem:[#allocation4 + $0x60] ss:$2 sm:$0xf] }
 0x5b2   : > { %v3781_v27 = vcombine.low %v3756_v10, %v3758_v19  ;;  %v3949_v21 = vld [vmem:[#allocation4 + $0x62] ss:$2 sm:$0xf]  ;;  %v4080_v10 = vcombine.low %v4052_v40, %v4054_v45  ;;  %v5075_v19 = vld [vmem:[%s9374_s5 + $0x1a0] sm:$0xff]  ;;  %v5106_v16 = vld [vmem:[%s9374_s5 + $0x298] sm:$0xff] }
 0x5b3   : > { %v3972_v39 = vcombine.low %v3947_v54, %v3949_v21  ;;  %v4166_v21 = vld [vmem:[#allocation4 + $0x51] ss:$2 sm:$0xf]  ;;  %v4272_v53 = vld [vmem:[#allocation4 + $0x12] ss:$2 sm:$0xf]  ;;  %v6820_v45 = vpack.c.bf16 %v5106_v16, %v5105_v42 }
 0x5b4   : > { %6074 = vmatmul.mubr.f32.vlgmr.msra.gmra.mrb[16].mxu1 %v3781_v27  ;;  %v5076_v27 = vld [vmem:[%s9374_s5 + $0x1a8] sm:$0xff] }
 0x5b5   : > { %6691 = vmatpush3.bf16.msra.mxu1 %v6688_v24  ;;  %6108 = vmatprep.mubr.f32.mxu1 %v3863_v49  ;;  %v3732_v24 = vld [vmem:[#allocation4 + $0x40] ss:$2 sm:$0xf]  ;;  %v5077_v49 = vld [vmem:[%s9374_s5 + $0x1b0] sm:$0xff] }
 0x5b6   : > { %6693 = vmatprep.subr.bf16.mxu1 %v6692_v58  ;;  %v3864_v15 = vcombine.low %v3732_v24, %v3734_v62  ;;  %v6764_v31 = vpack.c.bf16 %v5078_v35, %v5077_v49  ;;  %v4056_v62 = vld [vmem:[#allocation4 + $0x50] ss:$2 sm:$0xf]  ;;  %v5091_v24 = vld [vmem:[%s9374_s5 + $0x220] sm:$0xff]  ;;  %v5108_v40 = vld [vmem:[%s9374_s5 + $0x2a8] sm:$0xff] }
 0x5b7   : > { %v5112_v49 = vld [vmem:[%s9374_s5 + $0x2c8] sm:$0xff] }
 0x5b8   : > { %v4382_v47 = vld [vmem:[#allocation4 + $0x20] ss:$2 sm:$0xf]  ;;  %v4492_v16 = vld [vmem:[#allocation4 + $0x21] ss:$2 sm:$0xf] }
 0x5b9   : > { %6695 = vmatpush3.bf16.msra.mxu1 %v6692_v58  ;;  %v6760_v58 = vpack.c.bf16 %v5076_v27, %v5075_v19  ;;  %v5110_v19 = vld [vmem:[%s9374_s5 + $0x2b8] sm:$0xff] }
 0x5ba   : > { %6697 = vmatprep.subr.bf16.mxu1 %v6696_v2 }
 0x5bd   : > { %6699 = vmatpush3.bf16.msra.mxu1 %v6696_v2  ;;  %v5079_v2 = vld [vmem:[%s9374_s5 + $0x1c0] sm:$0xff] }
 0x5be   : > { %6701 = vmatprep.subr.bf16.mxu1 %v6700_v26  ;;  %v6768_v41 = vpack.c.bf16 %v5080_v61, %v5079_v2  ;;  %v5114_v2 = vld [vmem:[%s9374_s5 + $0x2d8] sm:$0xff] }
 0x5c1   : > { %6703 = vmatpush3.bf16.msra.mxu1 %v6700_v26  ;;  %v5081_v26 = vld [vmem:[%s9374_s5 + $0x1d0] sm:$0xff] }
 0x5c2   : > { %6705 = vmatprep.subr.bf16.mxu1 %v6704_v14  ;;  %v6772_v37 = vpack.c.bf16 %v5082_v6, %v5081_v26  ;;  %v5116_v26 = vld [vmem:[%s9374_s5 + $0x2e8] sm:$0xff] }
 0x5c5   : > { %6707 = vmatpush3.bf16.msra.mxu1 %v6704_v14  ;;  %v5083_v14 = vld [vmem:[%s9374_s5 + $0x1e0] sm:$0xff] }
 0x5c6   : > { %6709 = vmatprep.subr.bf16.mxu1 %v6708_v12  ;;  %v6776_v43 = vpack.c.bf16 %v5084_v3, %v5083_v14  ;;  %v5118_v14 = vld [vmem:[%s9374_s5 + $0x2f8] sm:$0xff] }
 0x5c9   : > { %6711 = vmatpush3.bf16.msra.mxu1 %v6708_v12  ;;  %v5085_v12 = vld [vmem:[%s9374_s5 + $0x1f0] sm:$0xff] }
 0x5ca   : > { %6713 = vmatprep.subr.bf16.mxu1 %v6712_v8  ;;  %v6780_v38 = vpack.c.bf16 %v5086_v20, %v5085_v12  ;;  %v5120_v12 = vld [vmem:[%s9374_s5 + $0x308] sm:$0xff] }
 0x5cd   : > { %6715 = vmatpush3.bf16.msra.mxu1 %v6712_v8  ;;  %v5087_v8 = vld [vmem:[%s9374_s5 + $0x200] sm:$0xff] }
 0x5ce   : > { %6717 = vmatprep.subr.bf16.mxu1 %v6716_v33  ;;  %v6784_v13 = vpack.c.bf16 %v5088_v50, %v5087_v8  ;;  %v5121_v8 = vld [vmem:[%s9374_s5 + $0x310] sm:$0xff]  ;;  %v5122_v50 = vld [vmem:[%s9374_s5 + $0x318] sm:$0xff] }
 0x5d1   : > { %6719 = vmatpush3.bf16.msra.mxu1 %v6716_v33  ;;  %v4058_v33 = vld [vmem:[#allocation4 + $0x70] ss:$2 sm:$0xf] }
 0x5d2   : > { %6721 = vmatprep.subr.bf16.mxu1 %v6720_v48  ;;  %v4081_v55 = vcombine.low %v4056_v62, %v4058_v33  ;;  %v4276_v33 = vld [vmem:[#allocation4 + $0x52] ss:$2 sm:$0xf] }
 0x5d4   : > { %6109 = vmatmul.mubr.f32.vlgmr.msra.gmra.mrb[16].mxu1 %v3864_v15  ;;  %v5092_v15 = vld [vmem:[%s9374_s5 + $0x228] sm:$0xff] }
 0x5d5   : > { %6723 = vmatpush3.bf16.msra.mxu1 %v6720_v48  ;;  %6143 = vmatprep.mubr.f32.mxu1 %v3971_v52  ;;  %v4164_v48 = vld [vmem:[#allocation4 + $0x31] ss:$2 sm:$0xf]  ;;  %v5093_v52 = vld [vmem:[%s9374_s5 + $0x230] sm:$0xff] }
 0x5d6   : > { %6725 = vmatprep.subr.bf16.mxu1 %v6724_v51  ;;  %v4190_v0 = vcombine.low %v4162_v17, %v4164_v48  ;;  %v6796_v30 = vpack.c.bf16 %v5094_v63, %v5093_v52  ;;  %v6852_v48 = vpack.c.bf16 %v5122_v50, %v5121_v8  ;;  %v5124_v17 = vld [vmem:[%s9374_s5 + $0x328] sm:$0xff] }
 0x5d7   : > { %v5128_v52 = vld [vmem:[%s9374_s5 + $0x348] sm:$0xff] }
 0x5d8   : > { %v4602_v50 = vld [vmem:[#allocation4 + $0x22] ss:$2 sm:$0xf] }
 0x5d9   : > { %6727 = vmatpush3.bf16.msra.mxu1 %v6724_v51  ;;  %v6792_v51 = vpack.c.bf16 %v5092_v15, %v5091_v24  ;;  %v5126_v24 = vld [vmem:[%s9374_s5 + $0x338] sm:$0xff] }
 0x5da   : > { %6729 = vmatprep.subr.bf16.mxu1 %v6728_v34 }
 0x5dd   : > { %6731 = vmatpush3.bf16.msra.mxu1 %v6728_v34  ;;  %v5095_v34 = vld [vmem:[%s9374_s5 + $0x240] sm:$0xff] }
 0x5de   : > { %6733 = vmatprep.subr.bf16.mxu1 %v6732_v36  ;;  %v6800_v5 = vpack.c.bf16 %v5096_v23, %v5095_v34  ;;  %v5130_v34 = vld [vmem:[%s9374_s5 + $0x358] sm:$0xff] }
 0x5e1   : > { %6735 = vmatpush3.bf16.msra.mxu1 %v6732_v36  ;;  %v5097_v36 = vld [vmem:[%s9374_s5 + $0x250] sm:$0xff] }
 0x5e2   : > { %6737 = vmatprep.subr.bf16.mxu1 %v6736_v28  ;;  %v6804_v46 = vpack.c.bf16 %v5098_v25, %v5097_v36  ;;  %v5132_v36 = vld [vmem:[%s9374_s5 + $0x368] sm:$0xff] }
 0x5e5   : > { %6739 = vmatpush3.bf16.msra.mxu1 %v6736_v28  ;;  %v5099_v28 = vld [vmem:[%s9374_s5 + $0x260] sm:$0xff] }
 0x5e6   : > { %6741 = vmatprep.subr.bf16.mxu1 %v6740_v32  ;;  %v6808_v4 = vpack.c.bf16 %v5100_v7, %v5099_v28  ;;  %v5134_v28 = vld [vmem:[%s9374_s5 + $0x378] sm:$0xff] }
 0x5e9   : > { %6743 = vmatpush3.bf16.msra.mxu1 %v6740_v32  ;;  %v5101_v32 = vld [vmem:[%s9374_s5 + $0x270] sm:$0xff] }
 0x5ea   : > { %6745 = vmatprep.subr.bf16.mxu1 %v6744_v59  ;;  %v6812_v1 = vpack.c.bf16 %v5102_v22, %v5101_v32  ;;  %v5136_v32 = vld [vmem:[%s9374_s5 + $0x388] sm:$0xff] }
 0x5ed   : > { %6747 = vmatpush3.bf16.msra.mxu1 %v6744_v59  ;;  %v5103_v59 = vld [vmem:[%s9374_s5 + $0x280] sm:$0xff] }
 0x5ee   : > { %6749 = vmatprep.subr.bf16.mxu1 %v6748_v29  ;;  %v6816_v60 = vpack.c.bf16 %v5104_v44, %v5103_v59  ;;  %v5137_v59 = vld [vmem:[%s9374_s5 + $0x390] sm:$0xff]  ;;  %v5138_v44 = vld [vmem:[%s9374_s5 + $0x398] sm:$0xff] }
 0x5f1   : > { %6751 = vmatpush3.bf16.msra.mxu1 %v6748_v29  ;;  %v4168_v29 = vld [vmem:[#allocation4 + $0x71] ss:$2 sm:$0xf] }
 0x5f2   : > { %6753 = vmatprep.subr.bf16.mxu1 %v6752_v57  ;;  %v4191_v18 = vcombine.low %v4166_v21, %v4168_v29  ;;  %v4386_v29 = vld [vmem:[#allocation4 + $0x60] ss:$2 sm:$0xf] }
 0x5f4   : > { %6144 = vmatmul.mubr.f32.vlgmr.msra.gmra.mrb[16].mxu1 %v3972_v39  ;;  %v5107_v39 = vld [vmem:[%s9374_s5 + $0x2a0] sm:$0xff] }
 0x5f5   : > { %6755 = vmatpush3.bf16.msra.mxu1 %v6752_v57  ;;  %6178 = vmatprep.mubr.f32.mxu1 %v4080_v10  ;;  %v4274_v57 = vld [vmem:[#allocation4 + $0x32] ss:$2 sm:$0xf]  ;;  %v5109_v10 = vld [vmem:[%s9374_s5 + $0x2b0] sm:$0xff] }
 0x5f6   : > { %6757 = vmatprep.subr.bf16.mxu1 %v6756_v56  ;;  %v4300_v54 = vcombine.low %v4272_v53, %v4274_v57  ;;  %v6828_v27 = vpack.c.bf16 %v5110_v19, %v5109_v10  ;;  %v6884_v57 = vpack.c.bf16 %v5138_v44, %v5137_v59  ;;  %v5140_v53 = vld [vmem:[%s9374_s5 + $0x3a8] sm:$0xff] }
 0x5f7   : > { %v5144_v10 = vld [vmem:[%s9374_s5 + $0x3c8] sm:$0xff] }
 0x5f9   : > { %6759 = vmatpush3.bf16.msra.mxu1 %v6756_v56  ;;  %v6824_v56 = vpack.c.bf16 %v5108_v40, %v5107_v39  ;;  %v5142_v39 = vld [vmem:[%s9374_s5 + $0x3b8] sm:$0xff] }
 0x5fa   : > { %6761 = vmatprep.subr.bf16.mxu1 %v6760_v58 }
 0x5fd   : > { %6763 = vmatpush3.bf16.msra.mxu1 %v6760_v58  ;;  %v5111_v58 = vld [vmem:[%s9374_s5 + $0x2c0] sm:$0xff] }
 0x5fe   : > { %6765 = vmatprep.subr.bf16.mxu1 %v6764_v31  ;;  %v6832_v35 = vpack.c.bf16 %v5112_v49, %v5111_v58  ;;  %v5146_v58 = vld [vmem:[%s9374_s5 + $0x3d8] sm:$0xff] }
 0x601   : > { %6767 = vmatpush3.bf16.msra.mxu1 %v6764_v31  ;;  %v5113_v31 = vld [vmem:[%s9374_s5 + $0x2d0] sm:$0xff] }
 0x602   : > { %6769 = vmatprep.subr.bf16.mxu1 %v6768_v41  ;;  %v6836_v61 = vpack.c.bf16 %v5114_v2, %v5113_v31  ;;  %v5148_v31 = vld [vmem:[%s9374_s5 + $0x3e8] sm:$0xff] }
 0x605   : > { %6771 = vmatpush3.bf16.msra.mxu1 %v6768_v41  ;;  %v5115_v41 = vld [vmem:[%s9374_s5 + $0x2e0] sm:$0xff] }
 0x606   : > { %6773 = vmatprep.subr.bf16.mxu1 %v6772_v37  ;;  %v6840_v6 = vpack.c.bf16 %v5116_v26, %v5115_v41  ;;  %v5150_v41 = vld [vmem:[%s9374_s5 + $0x3f8] sm:$0xff] }
 0x609   : > { %6775 = vmatpush3.bf16.msra.mxu1 %v6772_v37  ;;  %v5117_v37 = vld [vmem:[%s9374_s5 + $0x2f0] sm:$0xff] }
 0x60a   : > { %6777 = vmatprep.subr.bf16.mxu1 %v6776_v43  ;;  %v6844_v3 = vpack.c.bf16 %v5118_v14, %v5117_v37  ;;  %v5152_v37 = vld [vmem:[%s9374_s5 + $0x408] sm:$0xff] }
 0x60d   : > { %6779 = vmatpush3.bf16.msra.mxu1 %v6776_v43  ;;  %v5119_v43 = vld [vmem:[%s9374_s5 + $0x300] sm:$0xff] }
 0x60e   : > { %6781 = vmatprep.subr.bf16.mxu1 %v6780_v38  ;;  %v6848_v20 = vpack.c.bf16 %v5120_v12, %v5119_v43  ;;  %v5153_v43 = vld [vmem:[%s9374_s5 + $0x410] sm:$0xff]  ;;  %v5154_v12 = vld [vmem:[%s9374_s5 + $0x418] sm:$0xff] }
 0x611   : > { %6783 = vmatpush3.bf16.msra.mxu1 %v6780_v38  ;;  %v4278_v38 = vld [vmem:[#allocation4 + $0x72] ss:$2 sm:$0xf] }
 0x612   : > { %6785 = vmatprep.subr.bf16.mxu1 %v6784_v13  ;;  %v4301_v9 = vcombine.low %v4276_v33, %v4278_v38  ;;  %v4496_v38 = vld [vmem:[#allocation4 + $0x61] ss:$2 sm:$0xf] }
 0x614   : > { %6179 = vmatmul.mubr.f32.vlgmr.msra.gmra.mrb[16].mxu1 %v4081_v55  ;;  %v5123_v55 = vld [vmem:[%s9374_s5 + $0x320] sm:$0xff] }
 0x615   : > { %6787 = vmatpush3.bf16.msra.mxu1 %v6784_v13  ;;  %6213 = vmatprep.mubr.f32.mxu1 %v4190_v0  ;;  %v4384_v13 = vld [vmem:[#allocation4 + $0x40] ss:$2 sm:$0xf]  ;;  %v5125_v0 = vld [vmem:[%s9374_s5 + $0x330] sm:$0xff] }
 0x616   : > { %6789 = vmatprep.subr.bf16.mxu1 %v6788_v11  ;;  %v4410_v62 = vcombine.low %v4382_v47, %v4384_v13  ;;  %v6860_v15 = vpack.c.bf16 %v5126_v24, %v5125_v0  ;;  %v6916_v13 = vpack.c.bf16 %v5154_v12, %v5153_v43  ;;  %v5156_v47 = vld [vmem:[%s9374_s5 + $0x428] sm:$0xff] }
 0x617   : > { %v5160_v0 = vld [vmem:[%s9374_s5 + $0x448] sm:$0xff] }
 0x619   : > { %6791 = vmatpush3.bf16.msra.mxu1 %v6788_v11  ;;  %v6856_v11 = vpack.c.bf16 %v5124_v17, %v5123_v55  ;;  %v5158_v55 = vld [vmem:[%s9374_s5 + $0x438] sm:$0xff] }
 0x61a   : > { %6793 = vmatprep.subr.bf16.mxu1 %v6792_v51 }
 0x61d   : > { %6795 = vmatpush3.bf16.msra.mxu1 %v6792_v51  ;;  %v5127_v51 = vld [vmem:[%s9374_s5 + $0x340] sm:$0xff] }
 0x61e   : > { %6797 = vmatprep.subr.bf16.mxu1 %v6796_v30  ;;  %v6864_v63 = vpack.c.bf16 %v5128_v52, %v5127_v51  ;;  %v5162_v51 = vld [vmem:[%s9374_s5 + $0x458] sm:$0xff] }
 0x621   : > { %6799 = vmatpush3.bf16.msra.mxu1 %v6796_v30  ;;  %v5129_v30 = vld [vmem:[%s9374_s5 + $0x350] sm:$0xff] }
 0x622   : > { %6801 = vmatprep.subr.bf16.mxu1 %v6800_v5  ;;  %v6868_v23 = vpack.c.bf16 %v5130_v34, %v5129_v30  ;;  %v5164_v30 = vld [vmem:[%s9374_s5 + $0x468] sm:$0xff] }
 0x625   : > { %6803 = vmatpush3.bf16.msra.mxu1 %v6800_v5  ;;  %v5131_v5 = vld [vmem:[%s9374_s5 + $0x360] sm:$0xff] }
 0x626   : > { %6805 = vmatprep.subr.bf16.mxu1 %v6804_v46  ;;  %v6872_v25 = vpack.c.bf16 %v5132_v36, %v5131_v5  ;;  %v5166_v5 = vld [vmem:[%s9374_s5 + $0x478] sm:$0xff] }
 0x629   : > { %6807 = vmatpush3.bf16.msra.mxu1 %v6804_v46  ;;  %v5133_v46 = vld [vmem:[%s9374_s5 + $0x370] sm:$0xff] }
 0x62a   : > { %6809 = vmatprep.subr.bf16.mxu1 %v6808_v4  ;;  %v6876_v7 = vpack.c.bf16 %v5134_v28, %v5133_v46  ;;  %v4606_v46 = vld [vmem:[#allocation4 + $0x62] ss:$2 sm:$0xf] }
 0x62d   : > { %6811 = vmatpush3.bf16.msra.mxu1 %v6808_v4  ;;  %v5135_v4 = vld [vmem:[%s9374_s5 + $0x380] sm:$0xff] }
 0x62e   : > { %6813 = vmatprep.subr.bf16.mxu1 %v6812_v1  ;;  %v6880_v22 = vpack.c.bf16 %v5136_v32, %v5135_v4 }
 0x631   : > { %6815 = vmatpush3.bf16.msra.mxu1 %v6812_v1  ;;  %v4388_v1 = vld [vmem:[#allocation4 + $0x80] ss:$2 sm:$0xf] }
 0x632   : > { %6817 = vmatprep.subr.bf16.mxu1 %v6816_v60  ;;  %v4411_v42 = vcombine.low %v4386_v29, %v4388_v1 }
 0x634   : > { %6214 = vmatmul.mubr.f32.vlgmr.msra.gmra.mrb[16].mxu1 %v4191_v18  ;;  %v5139_v18 = vld [vmem:[%s9374_s5 + $0x3a0] sm:$0xff] }
 0x635   : > { %6819 = vmatpush3.bf16.msra.mxu1 %v6816_v60  ;;  %6248 = vmatprep.mubr.f32.mxu1 %v4300_v54  ;;  %v4494_v60 = vld [vmem:[#allocation4 + $0x41] ss:$2 sm:$0xf]  ;;  %v5141_v54 = vld [vmem:[%s9374_s5 + $0x3b0] sm:$0xff] }
 0x636   : > { %6821 = vmatprep.subr.bf16.mxu1 %v6820_v45  ;;  %v4520_v21 = vcombine.low %v4492_v16, %v4494_v60  ;;  %v6892_v40 = vpack.c.bf16 %v5142_v39, %v5141_v54 }
 0x639   : > { %6823 = vmatpush3.bf16.msra.mxu1 %v6820_v45  ;;  %v6888_v45 = vpack.c.bf16 %v5140_v53, %v5139_v18 }
 0x63a   : > { %6825 = vmatprep.subr.bf16.mxu1 %v6824_v56 }
 0x63d   : > { %6827 = vmatpush3.bf16.msra.mxu1 %v6824_v56  ;;  %v5143_v56 = vld [vmem:[%s9374_s5 + $0x3c0] sm:$0xff] }
 0x63e   : > { %6829 = vmatprep.subr.bf16.mxu1 %v6828_v27  ;;  %v6896_v19 = vpack.c.bf16 %v5144_v10, %v5143_v56 }
 0x641   : > { %6831 = vmatpush3.bf16.msra.mxu1 %v6828_v27  ;;  %v5145_v27 = vld [vmem:[%s9374_s5 + $0x3d0] sm:$0xff] }
 0x642   : > { %6833 = vmatprep.subr.bf16.mxu1 %v6832_v35  ;;  %v6900_v49 = vpack.c.bf16 %v5146_v58, %v5145_v27 }
 0x645   : > { %6835 = vmatpush3.bf16.msra.mxu1 %v6832_v35  ;;  %v5147_v35 = vld [vmem:[%s9374_s5 + $0x3e0] sm:$0xff] }
 0x646   : > { %6837 = vmatprep.subr.bf16.mxu1 %v6836_v61  ;;  %v6904_v2 = vpack.c.bf16 %v5148_v31, %v5147_v35 }
 0x649   : > { %6839 = vmatpush3.bf16.msra.mxu1 %v6836_v61  ;;  %v5149_v61 = vld [vmem:[%s9374_s5 + $0x3f0] sm:$0xff] }
 0x64a   : > { %6841 = vmatprep.subr.bf16.mxu1 %v6840_v6  ;;  %v6908_v26 = vpack.c.bf16 %v5150_v41, %v5149_v61 }
 0x64d   : > { %6843 = vmatpush3.bf16.msra.mxu1 %v6840_v6  ;;  %v5151_v6 = vld [vmem:[%s9374_s5 + $0x400] sm:$0xff] }
 0x64e   : > { %6845 = vmatprep.subr.bf16.mxu1 %v6844_v3  ;;  %v6912_v14 = vpack.c.bf16 %v5152_v37, %v5151_v6 }
 0x651   : > { %6847 = vmatpush3.bf16.msra.mxu1 %v6844_v3  ;;  %v4498_v3 = vld [vmem:[#allocation4 + $0x81] ss:$2 sm:$0xf] }
 0x652   : > { %6849 = vmatprep.subr.bf16.mxu1 %v6848_v20  ;;  %v4521_v8 = vcombine.low %v4496_v38, %v4498_v3 }
 0x654   : > { %6249 = vmatmul.mubr.f32.vlgmr.msra.gmra.mrb[16].mxu1 %v4301_v9  ;;  %v5155_v9 = vld [vmem:[%s9374_s5 + $0x420] sm:$0xff] }
 0x655   : > { %6851 = vmatpush3.bf16.msra.mxu1 %v6848_v20  ;;  %6283 = vmatprep.mubr.f32.mxu1 %v4410_v62  ;;  %v4604_v20 = vld [vmem:[#allocation4 + $0x42] ss:$2 sm:$0xf] }
 0x656   : > { %6853 = vmatprep.subr.bf16.mxu1 %v6852_v48  ;;  %v4630_v33 = vcombine.low %v4602_v50, %v4604_v20  ;;  %v5157_v62 = vld [vmem:[%s9374_s5 + $0x430] sm:$0xff] }
 0x657   : > { %v6924_v17 = vpack.c.bf16 %v5158_v55, %v5157_v62 }
 0x659   : > { %6855 = vmatpush3.bf16.msra.mxu1 %v6852_v48  ;;  %v6920_v48 = vpack.c.bf16 %v5156_v47, %v5155_v9 }
 0x65a   : > { %6857 = vmatprep.subr.bf16.mxu1 %v6856_v11 }
 0x65d   : > { %6859 = vmatpush3.bf16.msra.mxu1 %v6856_v11  ;;  %v5159_v11 = vld [vmem:[%s9374_s5 + $0x440] sm:$0xff] }
 0x65e   : > { %6861 = vmatprep.subr.bf16.mxu1 %v6860_v15  ;;  %v6928_v24 = vpack.c.bf16 %v5160_v0, %v5159_v11 }
 0x661   : > { %6863 = vmatpush3.bf16.msra.mxu1 %v6860_v15  ;;  %v5161_v15 = vld [vmem:[%s9374_s5 + $0x450] sm:$0xff] }
 0x662   : > { %6865 = vmatprep.subr.bf16.mxu1 %v6864_v63  ;;  %v6932_v52 = vpack.c.bf16 %v5162_v51, %v5161_v15 }
 0x665   : > { %6867 = vmatpush3.bf16.msra.mxu1 %v6864_v63  ;;  %v5163_v63 = vld [vmem:[%s9374_s5 + $0x460] sm:$0xff] }
 0x666   : > { %6869 = vmatprep.subr.bf16.mxu1 %v6868_v23  ;;  %v6936_v34 = vpack.c.bf16 %v5164_v30, %v5163_v63 }
 0x669   : > { %6871 = vmatpush3.bf16.msra.mxu1 %v6868_v23  ;;  %v5165_v23 = vld [vmem:[%s9374_s5 + $0x470] sm:$0xff] }
 0x66a   : > { %6873 = vmatprep.subr.bf16.mxu1 %v6872_v25  ;;  %v6940_v36 = vpack.c.bf16 %v5166_v5, %v5165_v23 }
 0x66d   : > { %6875 = vmatpush3.bf16.msra.mxu1 %v6872_v25  ;;  %v4608_v25 = vld [vmem:[#allocation4 + $0x82] ss:$2 sm:$0xf] }
 0x66e   : > { %6877 = vmatprep.subr.bf16.mxu1 %v6876_v7  ;;  %v4631_v28 = vcombine.low %v4606_v46, %v4608_v25 }
 0x671   : > { %6879 = vmatpush3.bf16.msra.mxu1 %v6876_v7  ;;  %v5167_v7 = vld [vmem:[%s9375_s6] ss:$0 sm:$0xff] }
 0x672   : > { %6881 = vmatprep.subr.bf16.mxu1 %v6880_v22 }
 0x674   : > { %6284 = vmatmul.mubr.f32.vlgmr.msra.gmra.mrb[16].mxu1 %v4411_v42 }
 0x675   : > { %6883 = vmatpush3.bf16.msra.mxu1 %v6880_v22  ;;  %6318 = vmatprep.mubr.f32.mxu1 %v4520_v21 }
 0x676   : > { %6885 = vmatprep.subr.bf16.mxu1 %v6884_v57 }
 0x679   : > { %6887 = vmatpush3.bf16.msra.mxu1 %v6884_v57 }
 0x67a   : > { %6889 = vmatprep.subr.bf16.mxu1 %v6888_v45 }
 0x67d   : > { %6891 = vmatpush3.bf16.msra.mxu1 %v6888_v45 }
 0x67e   : > { %6893 = vmatprep.subr.bf16.mxu1 %v6892_v40 }
 0x681   : > { %6895 = vmatpush3.bf16.msra.mxu1 %v6892_v40 }
 0x682   : > { %6897 = vmatprep.subr.bf16.mxu1 %v6896_v19 }
 0x685   : > { %6899 = vmatpush3.bf16.msra.mxu1 %v6896_v19 }
 0x686   : > { %6901 = vmatprep.subr.bf16.mxu1 %v6900_v49 }
 0x689   : > { %6903 = vmatpush3.bf16.msra.mxu1 %v6900_v49 }
 0x68a   : > { %6905 = vmatprep.subr.bf16.mxu1 %v6904_v2 }
 0x68d   : > { %6907 = vmatpush3.bf16.msra.mxu1 %v6904_v2 }
 0x68e   : > { %6909 = vmatprep.subr.bf16.mxu1 %v6908_v26 }
 0x691   : > { %6911 = vmatpush3.bf16.msra.mxu1 %v6908_v26 }
 0x692   : > { %6913 = vmatprep.subr.bf16.mxu1 %v6912_v14 }
 0x694   : > { %6319 = vmatmul.mubr.f32.vlgmr.msra.gmra.mrb[16].mxu1 %v4521_v8 }
 0x695   : > { %6915 = vmatpush3.bf16.msra.mxu1 %v6912_v14  ;;  %6353 = vmatprep.mubr.f32.mxu1 %v4630_v33 }
 0x696   : > { %6917 = vmatprep.subr.bf16.mxu1 %v6916_v13 }
 0x699   : > { %6919 = vmatpush3.bf16.msra.mxu1 %v6916_v13 }
 0x69a   : > { %6921 = vmatprep.subr.bf16.mxu1 %v6920_v48 }
 0x69d   : > { %6923 = vmatpush3.bf16.msra.mxu1 %v6920_v48 }
 0x69e   : > { %6925 = vmatprep.subr.bf16.mxu1 %v6924_v17 }
 0x6a1   : > { %6927 = vmatpush3.bf16.msra.mxu1 %v6924_v17 }
 0x6a2   : > { %6929 = vmatprep.subr.bf16.mxu1 %v6928_v24 }
 0x6a5   : > { %6931 = vmatpush3.bf16.msra.mxu1 %v6928_v24 }
 0x6a6   : > { %6933 = vmatprep.subr.bf16.mxu1 %v6932_v52 }
 0x6a9   : > { %6935 = vmatpush3.bf16.msra.mxu1 %v6932_v52 }
 0x6aa   : > { %6937 = vmatprep.subr.bf16.mxu1 %v6936_v34 }
 0x6ad   : > { %6939 = vmatpush3.bf16.msra.mxu1 %v6936_v34 }
 0x6ae   : > { %6941 = vmatprep.subr.bf16.mxu1 %v6940_v36 }
 0x6b1   : > { %6943 = vmatpush3.bf16.msra.mxu1 %v6940_v36 }
 0x6b4   : > { %6354 = vmatmul.mubr.f32.vlgmr.msra.gmra.mrb[16].mxu1 %v4631_v28 }
 0x787   : > { %v6355_v4 = vpop.f32.mrb[16].mxu1 }
 0x788   : > { %v4719_v32 = vadd.f32 %v6355_v4, %v5167_v7  ;;  %v4700_v22 = vpop.f32.mrb[17].mxu1 }
 0x789   : > { %v4718_v1 = vadd.f32 %v5167_v7, %v4700_v22 }
 0x78a   : > { %v4721_v59 = vmax.f32 %v4719_v32, 0.0 }
 0x78b   : > { %v4720_v44 = vmax.f32 %v4718_v1, 0.0 }
 0x78c   : > { %4723 = vst [vmem:[%s271_s21 + $0x8] sm:$0xff] %v4721_v59 }
 0x78d   : > { %4722 = vst [vmem:[%s271_s21] sm:$0xff] %v4720_v44 }
 0x78e   : > { %7082 = shalt.err (!%p7079_p3)
}
 0x78f   : > { %s7083_s17 = scalar_lea.hbm %s9326_s9, 256  ;;  %s7087_s20 = scalar_lea.hbm %s9376_s7, 512 }
 0x790   : > { %p7084_p4 = scmp.ne.s32.totalorder %s9326_s9, %s7083_s17  ;;  %p7088_p9 = scmp.lt.u32.totalorder %s9326_s9, %s9376_s7 }
 0x791   : > { %p7089_p10 = scmp.lt.u32.totalorder %s7087_s20, %s7083_s17  ;;  %p7091_p12 = scmp.lt.u32.totalorder %s7083_s17, %s9326_s9 }
 0x792   : > { %p7085_p7 = pnand %p7084_p4, %p7217_p5 }
 0x793   : > { %p7090_p11 = por %p7089_p10, %p7088_p9 }
 0x794   : > { %p7086_p8 = pneg %p7085_p7 }
 0x795   : > { %p7092_p13 = por %p7091_p12, %p7090_p11 }
 0x797   : > { %p7093_p0 = pnand %p7092_p13, %p7086_p8 }
 0x799   : > { %7096 = shalt.err (!%p7093_p0)
}
 0x79a   : > { %s7137_s29 = smov 128   ;;  %s7138_s8 = smov 8  }
 0x79b   : > { %7024 = dma.vmem_to_hbm [thread:$0]  (%p7217_p5), %s9321_s22, 256, %s9326_s9, %s9328_s13, %s7137_s29, %s7137_s29, %s7138_s8  }
 0x79c PF: > { %p7030_p1 = scmp.ge.s32.totalorder %s7131_s27, 2  ;;  %s4753_s28 = sand.u32 1, %s7119_s24  }
 0x79d   : > { %s4754_s14 = scalar_lea.sflag [#allocation6], %s4753_s28 }
 0x79e   : > { %p7027_p2 = pnand %p7030_p1, %p7221_p6 }
 0x7a0   : > { %7114 = dma.done.wait (!%p7027_p2), %s4754_s14, 256  }
 0x7a1   : > { %7116 = vsyncadd (!%p7027_p2), %s4754_s14, 4294967040  ;;  %p17_p3 = scmp.ge.s32.totalorder %s7204_s30, 4   ;;  %s9406_s24 = smov %s7123_s25 }
 0x7a2   : > { %s9407_s25 = smov %s7127_s26  ;;  %s9408_s26 = smov %s7215_s10 }
 0x7a3   : > { %s9409_s27 = smov %s7204_s30  ;;  %19 = sbr.rel (!%p17_p3) target bundleno = 3 (0x3), region = 206 }
 0x7aa   :  { %4759 = vsyncpa [#allocation6], 1 }
 0x7ab   :  { %4761 = vsyncpa [#allocation6 + $0x1], 1 }

</bundles_post_ra>
